<compile_context>
chip_gen: v7x
topology: tpu7x:2x2x1
jax: 0.10.0
libtpu: 0.0.40
codegen_flags: <defaults>
</compile_context>

<pallas_src>
import jax
import jax.numpy as jnp
import numpy as np
from jax.experimental import pallas as pl
from jax.experimental.pallas import tpu as pltpu


def _round_up(x, m):
    return (x + m - 1) // m * m


def make_recovery_kernel(num_layers: int, t_chunk: int, b_tile: int,
                         h_pad: int, out_pad: int):
    L, HP = num_layers, h_pad

    def kernel(x_ref, wih_ref, whh_ref, bih_ref, bhh_ref, wfc_ref, bfc_ref,
               out_ref, h_ref):
        # x_ref   : (t_chunk, b_tile, HP)       time-major input chunk
        # wih_ref : (L, HP, 3*HP)               packed input->hidden weights (pre-T)
        # whh_ref : (L, HP, 3*HP)               packed hidden->hidden weights (pre-T)
        # bih_ref : (L, 1, 3*HP),  bhh_ref : (L, 1, 3*HP)
        # wfc_ref : (HP, out_pad), bfc_ref : (1, out_pad)
        # out_ref : (t_chunk, b_tile, out_pad)  lane-dense output slab for this chunk
        # h_ref   : VMEM (L, b_tile, HP)        hidden state, persists across chunks
        tc = pl.program_id(1)

        @pl.when(tc == 0)
        def _():
            h_ref[...] = jnp.zeros_like(h_ref)

        # Layer-0 input projection for the WHOLE chunk as one big MXU matmul.
        # (t_chunk, b_tile, HP) -> (t_chunk*b_tile, HP) is a free reshape
        # (b_tile is a multiple of 8, HP a multiple of 128).
        x_all = x_ref[...].reshape(t_chunk * b_tile, HP)
        gi0_all = (jnp.dot(x_all, wih_ref[0], preferred_element_type=jnp.float32)
                   + bih_ref[0])                               # (t_chunk*b_tile, 3*HP)

        h_tops = []
        # Fully-unrolled static loops: all ref indices / slices below are static and
        # sublane/lane-tile aligned.
        for i in range(t_chunk):
            gi = gi0_all[i * b_tile:(i + 1) * b_tile, :]       # (b_tile, 3*HP)
            inp = None
            for l in range(L):
                h_prev = h_ref[l]                              # (b_tile, HP)
                if l > 0:
                    gi = (jnp.dot(inp, wih_ref[l],
                                  preferred_element_type=jnp.float32) + bih_ref[l])
                gh = (jnp.dot(h_prev, whh_ref[l],
                              preferred_element_type=jnp.float32) + bhh_ref[l])
                # PyTorch GRU gate order: r, z, n — each in its own 128-lane tile.
                r = jax.nn.sigmoid(gi[:, 0 * HP:1 * HP] + gh[:, 0 * HP:1 * HP])
                z = jax.nn.sigmoid(gi[:, 1 * HP:2 * HP] + gh[:, 1 * HP:2 * HP])
                n = jnp.tanh(gi[:, 2 * HP:3 * HP] + r * gh[:, 2 * HP:3 * HP])
                h_new = (1.0 - z) * n + z * h_prev
                h_ref[l] = h_new
                inp = h_new
            h_tops.append(inp)

        # Linear head over the whole chunk as one matmul; single unmasked store.
        h_top = jnp.concatenate(h_tops, axis=0)                # (t_chunk*b_tile, HP)
        out_all = (jnp.dot(h_top, wfc_ref[...],
                           preferred_element_type=jnp.float32) + bfc_ref[...])
        out_ref[...] = out_all.reshape(t_chunk, b_tile, out_pad).astype(out_ref.dtype)

    return kernel


def recovery_forward(x, params, *, t_chunk=8, b_tile=None):
    """x: (B, T, hidden_dim), batch_first. Returns (B, T, input_dim)."""
    B, T, H = x.shape
    assert H == params["hidden_dim"]
    L = params["num_layers"]
    D_out = params["input_dim"]

    H_pad = _round_up(H, 128)
    OUT_pad = _round_up(D_out, 128)

    # Time chunking: multiple of 8 sublanes; pad T up to a multiple of it (the padded
    # timesteps come after all real ones, so causality makes them harmless).
    t_chunk = _round_up(t_chunk, 8)
    t_chunk = min(t_chunk, _round_up(T, 8))
    T_pad = _round_up(T, t_chunk)

    # Batch tiling: pad to 8 sublanes so every block is (8,128)-tile aligned.
    B_pad = _round_up(B, 8)
    if b_tile is None:
        b_tile = B_pad
    b_tile = _round_up(b_tile, 8)
    B_pad = _round_up(B_pad, b_tile)
    n_bt = B_pad // b_tile
    n_tc = T_pad // t_chunk

    f32 = jnp.float32
    # Time-major, zero-padded input: (T_pad, B_pad, H_pad).
    x_tm = jnp.transpose(x.astype(f32), (1, 0, 2))
    x_tm = jnp.pad(x_tm, ((0, T_pad - T), (0, B_pad - B), (0, H_pad - H)))

    # Pack per-layer weights: pre-transposed for right-matmul, each gate (r, z, n)
    # zero-padded into its own 128-lane tile.  Zero-padded lanes of gi/gh keep the
    # padded hidden lanes at exactly 0 (sigmoid(0)=.5, tanh(0)=0, .5*0+.5*0=0).
    w_ih_p = np.zeros((L, H_pad, 3 * H_pad), np.float32)
    w_hh_p = np.zeros((L, H_pad, 3 * H_pad), np.float32)
    b_ih_p = np.zeros((L, 1, 3 * H_pad), np.float32)
    b_hh_p = np.zeros((L, 1, 3 * H_pad), np.float32)
    for l in range(L):
        wih = np.asarray(params["w_ih"][l])          # (3H, H)  GRU(hidden_dim, hidden_dim)
        whh = np.asarray(params["w_hh"][l])          # (3H, H)
        bih = np.asarray(params["b_ih"][l])          # (3H,)
        bhh = np.asarray(params["b_hh"][l])          # (3H,)
        for g in range(3):
            w_ih_p[l, :H, g * H_pad:g * H_pad + H] = wih[g * H:(g + 1) * H, :].T
            w_hh_p[l, :H, g * H_pad:g * H_pad + H] = whh[g * H:(g + 1) * H, :].T
            b_ih_p[l, 0, g * H_pad:g * H_pad + H] = bih[g * H:(g + 1) * H]
            b_hh_p[l, 0, g * H_pad:g * H_pad + H] = bhh[g * H:(g + 1) * H]
    w_fc_p = np.zeros((H_pad, OUT_pad), np.float32)
    w_fc_p[:H, :D_out] = np.asarray(params["w_fc"]).T
    b_fc_p = np.zeros((1, OUT_pad), np.float32)
    b_fc_p[0, :D_out] = np.asarray(params["b_fc"])

    out_tm = pl.pallas_call(
        make_recovery_kernel(L, t_chunk, b_tile, H_pad, OUT_pad),
        out_shape=jax.ShapeDtypeStruct((T_pad, B_pad, OUT_pad), jnp.float32),
        grid=(n_bt, n_tc),
        in_specs=[
            pl.BlockSpec((t_chunk, b_tile, H_pad), lambda b, t: (t, b, 0)),
            pl.BlockSpec((L, H_pad, 3 * H_pad), lambda b, t: (0, 0, 0)),
            pl.BlockSpec((L, H_pad, 3 * H_pad), lambda b, t: (0, 0, 0)),
            pl.BlockSpec((L, 1, 3 * H_pad), lambda b, t: (0, 0, 0)),
            pl.BlockSpec((L, 1, 3 * H_pad), lambda b, t: (0, 0, 0)),
            pl.BlockSpec((H_pad, OUT_pad), lambda b, t: (0, 0)),
            pl.BlockSpec((1, OUT_pad), lambda b, t: (0, 0)),
        ],
        out_specs=pl.BlockSpec((t_chunk, b_tile, OUT_pad), lambda b, t: (t, b, 0)),
        scratch_shapes=[pltpu.VMEM((L, b_tile, H_pad), jnp.float32)],
        compiler_params=pltpu.CompilerParams(
            dimension_semantics=("parallel", "arbitrary"),
        ),
    )(x_tm, jnp.asarray(w_ih_p), jnp.asarray(w_hh_p), jnp.asarray(b_ih_p),
      jnp.asarray(b_hh_p), jnp.asarray(w_fc_p), jnp.asarray(b_fc_p))

    # Un-pad and return batch-first (B, T, input_dim).
    return jnp.transpose(out_tm[:T, :B, :D_out], (1, 0, 2))


def recovery_reference(x, params):
    """Pure-JAX reference mirroring the PyTorch Recovery module (GRU path)."""
    B, T, H = x.shape
    L = params["num_layers"]

    def gru_layer(inp, wih, whh, bih, bhh):
        def step(h, x_t):
            gi = x_t @ wih.T + bih
            gh = h @ whh.T + bhh
            r = jax.nn.sigmoid(gi[:, :H] + gh[:, :H])
            z = jax.nn.sigmoid(gi[:, H:2 * H] + gh[:, H:2 * H])
            n = jnp.tanh(gi[:, 2 * H:] + r * gh[:, 2 * H:])
            h = (1.0 - z) * n + z * h
            return h, h

        _, ys = jax.lax.scan(step, jnp.zeros((B, H), jnp.float32),
                             jnp.transpose(inp, (1, 0, 2)))
        return jnp.transpose(ys, (1, 0, 2))

    h = x.astype(jnp.float32)
    for l in range(L):
        h = gru_layer(h, params["w_ih"][l], params["w_hh"][l],
                      params["b_ih"][l], params["b_hh"][l])
    return h @ params["w_fc"].T + params["b_fc"]


def init_params(key, input_dim, hidden_dim, num_layers):
    """Mimics Recovery's init: xavier_uniform weights, bias_ih=1, bias_hh=0, fc bias=0."""
    H = hidden_dim

    def xavier(k, shape):
        bound = float(np.sqrt(6.0 / (shape[0] + shape[1])))
        return jax.random.uniform(k, shape, jnp.float32, -bound, bound)

    params = {"hidden_dim": H, "input_dim": input_dim, "num_layers": num_layers,
              "w_ih": [], "w_hh": [], "b_ih": [], "b_hh": []}
    for _ in range(num_layers):
        key, k1, k2 = jax.random.split(key, 3)
        params["w_ih"].append(xavier(k1, (3 * H, H)))   # GRU(hidden_dim, hidden_dim)
        params["w_hh"].append(xavier(k2, (3 * H, H)))
        params["b_ih"].append(jnp.ones((3 * H,), jnp.float32))
        params["b_hh"].append(jnp.zeros((3 * H,), jnp.float32))
    key, k1 = jax.random.split(key)
    params["w_fc"] = xavier(k1, (input_dim, H))          # Linear(hidden_dim, input_dim)
    params["b_fc"] = jnp.zeros((input_dim,), jnp.float32)
    return params


if __name__ == "__main__":
    # Small config consistent with the module (module='gru'):
    # x feature dim == hidden_dim (Recovery takes latent codes), fc maps to input_dim.
    B, T = 2, 8
    H, D_out, L = 32, 4, 2     # hidden_dim, input_dim, num_layers

    key = jax.random.PRNGKey(0)
    key, kx = jax.random.split(key)
    x = jax.random.normal(kx, (B, T, H), jnp.float32)

    params = init_params(key, input_dim=D_out, hidden_dim=H, num_layers=L)

    out = jax.block_until_ready(recovery_forward(x, params))
    ref = jax.block_until_ready(recovery_reference(x, params))

    assert out.shape == (B, T, D_out), out.shape
    np.testing.assert_allclose(np.asarray(out), np.asarray(ref), rtol=1e-4, atol=1e-4)

    print("KERNEL_OK")
</pallas_src>

<mosaic_0001>
module attributes {stable_mosaic.version = 11 : i64} {
  func.func @kernel(%arg0: i32, %arg1: i32, %arg2: memref<8x8x128xf32, #tpu.memory_space<vmem>>, %arg3: memref<2x128x384xf32, #tpu.memory_space<vmem>>, %arg4: memref<2x128x384xf32, #tpu.memory_space<vmem>>, %arg5: memref<2x1x384xf32, #tpu.memory_space<vmem>>, %arg6: memref<2x1x384xf32, #tpu.memory_space<vmem>>, %arg7: memref<128x128xf32, #tpu.memory_space<vmem>>, %arg8: memref<1x128xf32, #tpu.memory_space<vmem>>, %arg9: memref<8x8x128xf32, #tpu.memory_space<vmem>>, %arg10: memref<2x8x128xf32, #tpu.memory_space<vmem>>) attributes {dimension_semantics = [#tpu.dimension_semantics<parallel>, #tpu.dimension_semantics<arbitrary>], iteration_bounds = array<i64: 1, 1>, scalar_prefetch = 0 : i64, scratch_operands = 1 : i64, tpu.core_type = #tpu.core_type<tc>, window_params = [{transform_indices = @transform_0, window_bounds = array<i64: 8, 8, 128>}, {pipeline_mode = #tpu.pipeline_mode<synchronous>, transform_indices = @transform_1, window_bounds = array<i64: 2, 128, 384>}, {pipeline_mode = #tpu.pipeline_mode<synchronous>, transform_indices = @transform_2, window_bounds = array<i64: 2, 128, 384>}, {pipeline_mode = #tpu.pipeline_mode<synchronous>, transform_indices = @transform_3, window_bounds = array<i64: 2, 1, 384>}, {pipeline_mode = #tpu.pipeline_mode<synchronous>, transform_indices = @transform_4, window_bounds = array<i64: 2, 1, 384>}, {pipeline_mode = #tpu.pipeline_mode<synchronous>, transform_indices = @transform_5, window_bounds = array<i64: 128, 128>}, {pipeline_mode = #tpu.pipeline_mode<synchronous>, transform_indices = @transform_6, window_bounds = array<i64: 1, 128>}, {transform_indices = @transform_7, window_bounds = array<i64: 8, 8, 128>}]} {
    %c0_i32 = arith.constant 0 : i32
    %0 = arith.cmpi eq, %arg1, %c0_i32 : i32
    %1 = arith.extui %0 : i1 to i32
    %c0_i32_0 = arith.constant 0 : i32
    %2 = arith.cmpi ne, %1, %c0_i32_0 : i32
    scf.if %2 {
      %cst_328 = arith.constant 0.000000e+00 : f32
      %692 = vector.broadcast %cst_328 : f32 to vector<2x8x128xf32>
      %c0_329 = arith.constant 0 : index
      %c0_330 = arith.constant 0 : index
      %c0_331 = arith.constant 0 : index
      %693 = vector.load %arg10[%c0_329, %c0_330, %c0_331] : memref<2x8x128xf32, #tpu.memory_space<vmem>>, vector<2x8x128xf32>
      tpu.vector_store %arg10[%c0_329, %c0_330, %c0_331], %692 {strides = array<i32>} : memref<2x8x128xf32, #tpu.memory_space<vmem>>, vector<2x8x128xf32>,
    } else {
    }
    %c0 = arith.constant 0 : index
    %c0_1 = arith.constant 0 : index
    %c0_2 = arith.constant 0 : index
    %3 = vector.load %arg2[%c0, %c0_1, %c0_2] : memref<8x8x128xf32, #tpu.memory_space<vmem>>, vector<8x8x128xf32>
    %4 = vector.shape_cast %3 : vector<8x8x128xf32> to vector<64x128xf32>
    %c0_3 = arith.constant 0 : index
    %c0_4 = arith.constant 0 : index
    %c0_5 = arith.constant 0 : index
    %5 = vector.load %arg3[%c0_3, %c0_4, %c0_5] : memref<2x128x384xf32, #tpu.memory_space<vmem>>, vector<1x128x384xf32>
    %6 = vector.shape_cast %5 : vector<1x128x384xf32> to vector<128x384xf32>
    %cst = arith.constant dense<0.000000e+00> : vector<64x384xf32>
    %7 = tpu.matmul %4, %6, %cst {dimension_numbers = #tpu.dot_dimension_numbers<[1], [0], [0], [1], [0, 0, 1, 1], [], []>} : vector<64x128xf32>, vector<128x384xf32>, vector<64x384xf32> -> vector<64x384xf32>
    %c0_6 = arith.constant 0 : index
    %c0_7 = arith.constant 0 : index
    %c0_8 = arith.constant 0 : index
    %8 = vector.load %arg5[%c0_6, %c0_7, %c0_8] : memref<2x1x384xf32, #tpu.memory_space<vmem>>, vector<1x1x384xf32>
    %9 = vector.shape_cast %8 : vector<1x1x384xf32> to vector<1x384xf32>
    %10 = vector.broadcast %9 : vector<1x384xf32> to vector<64x384xf32>
    %11 = arith.addf %7, %10 : vector<64x384xf32>
    %12 = vector.extract_strided_slice %11 {offsets = [0, 0], sizes = [8, 384], strides = [1, 1]} : vector<64x384xf32> to vector<8x384xf32>
    %c0_9 = arith.constant 0 : index
    %c0_10 = arith.constant 0 : index
    %c0_11 = arith.constant 0 : index
    %13 = vector.load %arg10[%c0_9, %c0_10, %c0_11] : memref<2x8x128xf32, #tpu.memory_space<vmem>>, vector<1x8x128xf32>
    %14 = vector.shape_cast %13 : vector<1x8x128xf32> to vector<8x128xf32>
    %c0_12 = arith.constant 0 : index
    %c0_13 = arith.constant 0 : index
    %c0_14 = arith.constant 0 : index
    %15 = vector.load %arg4[%c0_12, %c0_13, %c0_14] : memref<2x128x384xf32, #tpu.memory_space<vmem>>, vector<1x128x384xf32>
    %16 = vector.shape_cast %15 : vector<1x128x384xf32> to vector<128x384xf32>
    %cst_15 = arith.constant dense<0.000000e+00> : vector<8x384xf32>
    %17 = tpu.matmul %14, %16, %cst_15 {dimension_numbers = #tpu.dot_dimension_numbers<[1], [0], [0], [1], [0, 0, 1, 1], [], []>} : vector<8x128xf32>, vector<128x384xf32>, vector<8x384xf32> -> vector<8x384xf32>
    %c0_16 = arith.constant 0 : index
    %c0_17 = arith.constant 0 : index
    %c0_18 = arith.constant 0 : index
    %18 = vector.load %arg6[%c0_16, %c0_17, %c0_18] : memref<2x1x384xf32, #tpu.memory_space<vmem>>, vector<1x1x384xf32>
    %19 = vector.shape_cast %18 : vector<1x1x384xf32> to vector<1x384xf32>
    %20 = vector.broadcast %19 : vector<1x384xf32> to vector<8x384xf32>
    %21 = arith.addf %17, %20 : vector<8x384xf32>
    %22 = vector.extract_strided_slice %12 {offsets = [0, 0], sizes = [8, 128], strides = [1, 1]} : vector<8x384xf32> to vector<8x128xf32>
    %23 = vector.extract_strided_slice %21 {offsets = [0, 0], sizes = [8, 128], strides = [1, 1]} : vector<8x384xf32> to vector<8x128xf32>
    %24 = arith.addf %22, %23 : vector<8x128xf32>
    %25 = arith.negf %24 : vector<8x128xf32>
    %26 = math.exp %25 : vector<8x128xf32>
    %cst_19 = arith.constant 1.000000e+00 : f32
    %27 = vector.broadcast %cst_19 : f32 to vector<8x128xf32>
    %28 = arith.addf %27, %26 : vector<8x128xf32>
    %29 = arith.divf %27, %28 : vector<8x128xf32>
    %30 = vector.extract_strided_slice %12 {offsets = [0, 128], sizes = [8, 128], strides = [1, 1]} : vector<8x384xf32> to vector<8x128xf32>
    %31 = vector.extract_strided_slice %21 {offsets = [0, 128], sizes = [8, 128], strides = [1, 1]} : vector<8x384xf32> to vector<8x128xf32>
    %32 = arith.addf %30, %31 : vector<8x128xf32>
    %33 = arith.negf %32 : vector<8x128xf32>
    %34 = math.exp %33 : vector<8x128xf32>
    %cst_20 = arith.constant 1.000000e+00 : f32
    %35 = vector.broadcast %cst_20 : f32 to vector<8x128xf32>
    %36 = arith.addf %35, %34 : vector<8x128xf32>
    %37 = arith.divf %35, %36 : vector<8x128xf32>
    %38 = vector.extract_strided_slice %12 {offsets = [0, 256], sizes = [8, 128], strides = [1, 1]} : vector<8x384xf32> to vector<8x128xf32>
    %39 = vector.extract_strided_slice %21 {offsets = [0, 256], sizes = [8, 128], strides = [1, 1]} : vector<8x384xf32> to vector<8x128xf32>
    %40 = arith.mulf %29, %39 : vector<8x128xf32>
    %41 = arith.addf %38, %40 : vector<8x128xf32>
    %42 = math.tanh %41 : vector<8x128xf32>
    %cst_21 = arith.constant 1.000000e+00 : f32
    %43 = vector.broadcast %cst_21 : f32 to vector<8x128xf32>
    %44 = arith.subf %43, %37 : vector<8x128xf32>
    %45 = arith.mulf %44, %42 : vector<8x128xf32>
    %46 = arith.mulf %37, %14 : vector<8x128xf32>
    %47 = arith.addf %45, %46 : vector<8x128xf32>
    %c0_22 = arith.constant 0 : index
    %c0_23 = arith.constant 0 : index
    %c0_24 = arith.constant 0 : index
    %48 = vector.load %arg10[%c0_22, %c0_23, %c0_24] : memref<2x8x128xf32, #tpu.memory_space<vmem>>, vector<1x8x128xf32>
    %49 = vector.shape_cast %48 : vector<1x8x128xf32> to vector<8x128xf32>
    %50 = vector.shape_cast %47 : vector<8x128xf32> to vector<1x8x128xf32>
    tpu.vector_store %arg10[%c0_22, %c0_23, %c0_24], %50 {strides = array<i32>} : memref<2x8x128xf32, #tpu.memory_space<vmem>>, vector<1x8x128xf32>,
    %c1 = arith.constant 1 : index
    %c0_25 = arith.constant 0 : index
    %c0_26 = arith.constant 0 : index
    %51 = vector.load %arg10[%c1, %c0_25, %c0_26] : memref<2x8x128xf32, #tpu.memory_space<vmem>>, vector<1x8x128xf32>
    %52 = vector.shape_cast %51 : vector<1x8x128xf32> to vector<8x128xf32>
    %c1_27 = arith.constant 1 : index
    %c0_28 = arith.constant 0 : index
    %c0_29 = arith.constant 0 : index
    %53 = vector.load %arg3[%c1_27, %c0_28, %c0_29] : memref<2x128x384xf32, #tpu.memory_space<vmem>>, vector<1x128x384xf32>
    %54 = vector.shape_cast %53 : vector<1x128x384xf32> to vector<128x384xf32>
    %cst_30 = arith.constant dense<0.000000e+00> : vector<8x384xf32>
    %55 = tpu.matmul %47, %54, %cst_30 {dimension_numbers = #tpu.dot_dimension_numbers<[1], [0], [0], [1], [0, 0, 1, 1], [], []>} : vector<8x128xf32>, vector<128x384xf32>, vector<8x384xf32> -> vector<8x384xf32>
    %c1_31 = arith.constant 1 : index
    %c0_32 = arith.constant 0 : index
    %c0_33 = arith.constant 0 : index
    %56 = vector.load %arg5[%c1_31, %c0_32, %c0_33] : memref<2x1x384xf32, #tpu.memory_space<vmem>>, vector<1x1x384xf32>
    %57 = vector.shape_cast %56 : vector<1x1x384xf32> to vector<1x384xf32>
    %58 = vector.broadcast %57 : vector<1x384xf32> to vector<8x384xf32>
    %59 = arith.addf %55, %58 : vector<8x384xf32>
    %c1_34 = arith.constant 1 : index
    %c0_35 = arith.constant 0 : index
    %c0_36 = arith.constant 0 : index
    %60 = vector.load %arg4[%c1_34, %c0_35, %c0_36] : memref<2x128x384xf32, #tpu.memory_space<vmem>>, vector<1x128x384xf32>
    %61 = vector.shape_cast %60 : vector<1x128x384xf32> to vector<128x384xf32>
    %cst_37 = arith.constant dense<0.000000e+00> : vector<8x384xf32>
    %62 = tpu.matmul %52, %61, %cst_37 {dimension_numbers = #tpu.dot_dimension_numbers<[1], [0], [0], [1], [0, 0, 1, 1], [], []>} : vector<8x128xf32>, vector<128x384xf32>, vector<8x384xf32> -> vector<8x384xf32>
    %c1_38 = arith.constant 1 : index
    %c0_39 = arith.constant 0 : index
    %c0_40 = arith.constant 0 : index
    %63 = vector.load %arg6[%c1_38, %c0_39, %c0_40] : memref<2x1x384xf32, #tpu.memory_space<vmem>>, vector<1x1x384xf32>
    %64 = vector.shape_cast %63 : vector<1x1x384xf32> to vector<1x384xf32>
    %65 = vector.broadcast %64 : vector<1x384xf32> to vector<8x384xf32>
    %66 = arith.addf %62, %65 : vector<8x384xf32>
    %67 = vector.extract_strided_slice %59 {offsets = [0, 0], sizes = [8, 128], strides = [1, 1]} : vector<8x384xf32> to vector<8x128xf32>
    %68 = vector.extract_strided_slice %66 {offsets = [0, 0], sizes = [8, 128], strides = [1, 1]} : vector<8x384xf32> to vector<8x128xf32>
    %69 = arith.addf %67, %68 : vector<8x128xf32>
    %70 = arith.negf %69 : vector<8x128xf32>
    %71 = math.exp %70 : vector<8x128xf32>
    %cst_41 = arith.constant 1.000000e+00 : f32
    %72 = vector.broadcast %cst_41 : f32 to vector<8x128xf32>
    %73 = arith.addf %72, %71 : vector<8x128xf32>
    %74 = arith.divf %72, %73 : vector<8x128xf32>
    %75 = vector.extract_strided_slice %59 {offsets = [0, 128], sizes = [8, 128], strides = [1, 1]} : vector<8x384xf32> to vector<8x128xf32>
    %76 = vector.extract_strided_slice %66 {offsets = [0, 128], sizes = [8, 128], strides = [1, 1]} : vector<8x384xf32> to vector<8x128xf32>
    %77 = arith.addf %75, %76 : vector<8x128xf32>
    %78 = arith.negf %77 : vector<8x128xf32>
    %79 = math.exp %78 : vector<8x128xf32>
    %cst_42 = arith.constant 1.000000e+00 : f32
    %80 = vector.broadcast %cst_42 : f32 to vector<8x128xf32>
    %81 = arith.addf %80, %79 : vector<8x128xf32>
    %82 = arith.divf %80, %81 : vector<8x128xf32>
    %83 = vector.extract_strided_slice %59 {offsets = [0, 256], sizes = [8, 128], strides = [1, 1]} : vector<8x384xf32> to vector<8x128xf32>
    %84 = vector.extract_strided_slice %66 {offsets = [0, 256], sizes = [8, 128], strides = [1, 1]} : vector<8x384xf32> to vector<8x128xf32>
    %85 = arith.mulf %74, %84 : vector<8x128xf32>
    %86 = arith.addf %83, %85 : vector<8x128xf32>
    %87 = math.tanh %86 : vector<8x128xf32>
    %cst_43 = arith.constant 1.000000e+00 : f32
    %88 = vector.broadcast %cst_43 : f32 to vector<8x128xf32>
    %89 = arith.subf %88, %82 : vector<8x128xf32>
    %90 = arith.mulf %89, %87 : vector<8x128xf32>
    %91 = arith.mulf %82, %52 : vector<8x128xf32>
    %92 = arith.addf %90, %91 : vector<8x128xf32>
    %c1_44 = arith.constant 1 : index
    %c0_45 = arith.constant 0 : index
    %c0_46 = arith.constant 0 : index
    %93 = vector.load %arg10[%c1_44, %c0_45, %c0_46] : memref<2x8x128xf32, #tpu.memory_space<vmem>>, vector<1x8x128xf32>
    %94 = vector.shape_cast %93 : vector<1x8x128xf32> to vector<8x128xf32>
    %95 = vector.shape_cast %92 : vector<8x128xf32> to vector<1x8x128xf32>
    tpu.vector_store %arg10[%c1_44, %c0_45, %c0_46], %95 {strides = array<i32>} : memref<2x8x128xf32, #tpu.memory_space<vmem>>, vector<1x8x128xf32>,
    %96 = vector.extract_strided_slice %11 {offsets = [8, 0], sizes = [8, 384], strides = [1, 1]} : vector<64x384xf32> to vector<8x384xf32>
    %c0_47 = arith.constant 0 : index
    %c0_48 = arith.constant 0 : index
    %c0_49 = arith.constant 0 : index
    %97 = vector.load %arg10[%c0_47, %c0_48, %c0_49] : memref<2x8x128xf32, #tpu.memory_space<vmem>>, vector<1x8x128xf32>
    %98 = vector.shape_cast %97 : vector<1x8x128xf32> to vector<8x128xf32>
    %c0_50 = arith.constant 0 : index
    %c0_51 = arith.constant 0 : index
    %c0_52 = arith.constant 0 : index
    %99 = vector.load %arg4[%c0_50, %c0_51, %c0_52] : memref<2x128x384xf32, #tpu.memory_space<vmem>>, vector<1x128x384xf32>
    %100 = vector.shape_cast %99 : vector<1x128x384xf32> to vector<128x384xf32>
    %cst_53 = arith.constant dense<0.000000e+00> : vector<8x384xf32>
    %101 = tpu.matmul %98, %100, %cst_53 {dimension_numbers = #tpu.dot_dimension_numbers<[1], [0], [0], [1], [0, 0, 1, 1], [], []>} : vector<8x128xf32>, vector<128x384xf32>, vector<8x384xf32> -> vector<8x384xf32>
    %c0_54 = arith.constant 0 : index
    %c0_55 = arith.constant 0 : index
    %c0_56 = arith.constant 0 : index
    %102 = vector.load %arg6[%c0_54, %c0_55, %c0_56] : memref<2x1x384xf32, #tpu.memory_space<vmem>>, vector<1x1x384xf32>
    %103 = vector.shape_cast %102 : vector<1x1x384xf32> to vector<1x384xf32>
    %104 = vector.broadcast %103 : vector<1x384xf32> to vector<8x384xf32>
    %105 = arith.addf %101, %104 : vector<8x384xf32>
    %106 = vector.extract_strided_slice %96 {offsets = [0, 0], sizes = [8, 128], strides = [1, 1]} : vector<8x384xf32> to vector<8x128xf32>
    %107 = vector.extract_strided_slice %105 {offsets = [0, 0], sizes = [8, 128], strides = [1, 1]} : vector<8x384xf32> to vector<8x128xf32>
    %108 = arith.addf %106, %107 : vector<8x128xf32>
    %109 = arith.negf %108 : vector<8x128xf32>
    %110 = math.exp %109 : vector<8x128xf32>
    %cst_57 = arith.constant 1.000000e+00 : f32
    %111 = vector.broadcast %cst_57 : f32 to vector<8x128xf32>
    %112 = arith.addf %111, %110 : vector<8x128xf32>
    %113 = arith.divf %111, %112 : vector<8x128xf32>
    %114 = vector.extract_strided_slice %96 {offsets = [0, 128], sizes = [8, 128], strides = [1, 1]} : vector<8x384xf32> to vector<8x128xf32>
    %115 = vector.extract_strided_slice %105 {offsets = [0, 128], sizes = [8, 128], strides = [1, 1]} : vector<8x384xf32> to vector<8x128xf32>
    %116 = arith.addf %114, %115 : vector<8x128xf32>
    %117 = arith.negf %116 : vector<8x128xf32>
    %118 = math.exp %117 : vector<8x128xf32>
    %cst_58 = arith.constant 1.000000e+00 : f32
    %119 = vector.broadcast %cst_58 : f32 to vector<8x128xf32>
    %120 = arith.addf %119, %118 : vector<8x128xf32>
    %121 = arith.divf %119, %120 : vector<8x128xf32>
    %122 = vector.extract_strided_slice %96 {offsets = [0, 256], sizes = [8, 128], strides = [1, 1]} : vector<8x384xf32> to vector<8x128xf32>
    %123 = vector.extract_strided_slice %105 {offsets = [0, 256], sizes = [8, 128], strides = [1, 1]} : vector<8x384xf32> to vector<8x128xf32>
    %124 = arith.mulf %113, %123 : vector<8x128xf32>
    %125 = arith.addf %122, %124 : vector<8x128xf32>
    %126 = math.tanh %125 : vector<8x128xf32>
    %cst_59 = arith.constant 1.000000e+00 : f32
    %127 = vector.broadcast %cst_59 : f32 to vector<8x128xf32>
    %128 = arith.subf %127, %121 : vector<8x128xf32>
    %129 = arith.mulf %128, %126 : vector<8x128xf32>
    %130 = arith.mulf %121, %98 : vector<8x128xf32>
    %131 = arith.addf %129, %130 : vector<8x128xf32>
    %c0_60 = arith.constant 0 : index
    %c0_61 = arith.constant 0 : index
    %c0_62 = arith.constant 0 : index
    %132 = vector.load %arg10[%c0_60, %c0_61, %c0_62] : memref<2x8x128xf32, #tpu.memory_space<vmem>>, vector<1x8x128xf32>
    %133 = vector.shape_cast %132 : vector<1x8x128xf32> to vector<8x128xf32>
    %134 = vector.shape_cast %131 : vector<8x128xf32> to vector<1x8x128xf32>
    tpu.vector_store %arg10[%c0_60, %c0_61, %c0_62], %134 {strides = array<i32>} : memref<2x8x128xf32, #tpu.memory_space<vmem>>, vector<1x8x128xf32>,
    %c1_63 = arith.constant 1 : index
    %c0_64 = arith.constant 0 : index
    %c0_65 = arith.constant 0 : index
    %135 = vector.load %arg10[%c1_63, %c0_64, %c0_65] : memref<2x8x128xf32, #tpu.memory_space<vmem>>, vector<1x8x128xf32>
    %136 = vector.shape_cast %135 : vector<1x8x128xf32> to vector<8x128xf32>
    %c1_66 = arith.constant 1 : index
    %c0_67 = arith.constant 0 : index
    %c0_68 = arith.constant 0 : index
    %137 = vector.load %arg3[%c1_66, %c0_67, %c0_68] : memref<2x128x384xf32, #tpu.memory_space<vmem>>, vector<1x128x384xf32>
    %138 = vector.shape_cast %137 : vector<1x128x384xf32> to vector<128x384xf32>
    %cst_69 = arith.constant dense<0.000000e+00> : vector<8x384xf32>
    %139 = tpu.matmul %131, %138, %cst_69 {dimension_numbers = #tpu.dot_dimension_numbers<[1], [0], [0], [1], [0, 0, 1, 1], [], []>} : vector<8x128xf32>, vector<128x384xf32>, vector<8x384xf32> -> vector<8x384xf32>
    %c1_70 = arith.constant 1 : index
    %c0_71 = arith.constant 0 : index
    %c0_72 = arith.constant 0 : index
    %140 = vector.load %arg5[%c1_70, %c0_71, %c0_72] : memref<2x1x384xf32, #tpu.memory_space<vmem>>, vector<1x1x384xf32>
    %141 = vector.shape_cast %140 : vector<1x1x384xf32> to vector<1x384xf32>
    %142 = vector.broadcast %141 : vector<1x384xf32> to vector<8x384xf32>
    %143 = arith.addf %139, %142 : vector<8x384xf32>
    %c1_73 = arith.constant 1 : index
    %c0_74 = arith.constant 0 : index
    %c0_75 = arith.constant 0 : index
    %144 = vector.load %arg4[%c1_73, %c0_74, %c0_75] : memref<2x128x384xf32, #tpu.memory_space<vmem>>, vector<1x128x384xf32>
    %145 = vector.shape_cast %144 : vector<1x128x384xf32> to vector<128x384xf32>
    %cst_76 = arith.constant dense<0.000000e+00> : vector<8x384xf32>
    %146 = tpu.matmul %136, %145, %cst_76 {dimension_numbers = #tpu.dot_dimension_numbers<[1], [0], [0], [1], [0, 0, 1, 1], [], []>} : vector<8x128xf32>, vector<128x384xf32>, vector<8x384xf32> -> vector<8x384xf32>
    %c1_77 = arith.constant 1 : index
    %c0_78 = arith.constant 0 : index
    %c0_79 = arith.constant 0 : index
    %147 = vector.load %arg6[%c1_77, %c0_78, %c0_79] : memref<2x1x384xf32, #tpu.memory_space<vmem>>, vector<1x1x384xf32>
    %148 = vector.shape_cast %147 : vector<1x1x384xf32> to vector<1x384xf32>
    %149 = vector.broadcast %148 : vector<1x384xf32> to vector<8x384xf32>
    %150 = arith.addf %146, %149 : vector<8x384xf32>
    %151 = vector.extract_strided_slice %143 {offsets = [0, 0], sizes = [8, 128], strides = [1, 1]} : vector<8x384xf32> to vector<8x128xf32>
    %152 = vector.extract_strided_slice %150 {offsets = [0, 0], sizes = [8, 128], strides = [1, 1]} : vector<8x384xf32> to vector<8x128xf32>
    %153 = arith.addf %151, %152 : vector<8x128xf32>
    %154 = arith.negf %153 : vector<8x128xf32>
    %155 = math.exp %154 : vector<8x128xf32>
    %cst_80 = arith.constant 1.000000e+00 : f32
    %156 = vector.broadcast %cst_80 : f32 to vector<8x128xf32>
    %157 = arith.addf %156, %155 : vector<8x128xf32>
    %158 = arith.divf %156, %157 : vector<8x128xf32>
    %159 = vector.extract_strided_slice %143 {offsets = [0, 128], sizes = [8, 128], strides = [1, 1]} : vector<8x384xf32> to vector<8x128xf32>
    %160 = vector.extract_strided_slice %150 {offsets = [0, 128], sizes = [8, 128], strides = [1, 1]} : vector<8x384xf32> to vector<8x128xf32>
    %161 = arith.addf %159, %160 : vector<8x128xf32>
    %162 = arith.negf %161 : vector<8x128xf32>
    %163 = math.exp %162 : vector<8x128xf32>
    %cst_81 = arith.constant 1.000000e+00 : f32
    %164 = vector.broadcast %cst_81 : f32 to vector<8x128xf32>
    %165 = arith.addf %164, %163 : vector<8x128xf32>
    %166 = arith.divf %164, %165 : vector<8x128xf32>
    %167 = vector.extract_strided_slice %143 {offsets = [0, 256], sizes = [8, 128], strides = [1, 1]} : vector<8x384xf32> to vector<8x128xf32>
    %168 = vector.extract_strided_slice %150 {offsets = [0, 256], sizes = [8, 128], strides = [1, 1]} : vector<8x384xf32> to vector<8x128xf32>
    %169 = arith.mulf %158, %168 : vector<8x128xf32>
    %170 = arith.addf %167, %169 : vector<8x128xf32>
    %171 = math.tanh %170 : vector<8x128xf32>
    %cst_82 = arith.constant 1.000000e+00 : f32
    %172 = vector.broadcast %cst_82 : f32 to vector<8x128xf32>
    %173 = arith.subf %172, %166 : vector<8x128xf32>
    %174 = arith.mulf %173, %171 : vector<8x128xf32>
    %175 = arith.mulf %166, %136 : vector<8x128xf32>
    %176 = arith.addf %174, %175 : vector<8x128xf32>
    %c1_83 = arith.constant 1 : index
    %c0_84 = arith.constant 0 : index
    %c0_85 = arith.constant 0 : index
    %177 = vector.load %arg10[%c1_83, %c0_84, %c0_85] : memref<2x8x128xf32, #tpu.memory_space<vmem>>, vector<1x8x128xf32>
    %178 = vector.shape_cast %177 : vector<1x8x128xf32> to vector<8x128xf32>
    %179 = vector.shape_cast %176 : vector<8x128xf32> to vector<1x8x128xf32>
    tpu.vector_store %arg10[%c1_83, %c0_84, %c0_85], %179 {strides = array<i32>} : memref<2x8x128xf32, #tpu.memory_space<vmem>>, vector<1x8x128xf32>,
    %180 = vector.extract_strided_slice %11 {offsets = [16, 0], sizes = [8, 384], strides = [1, 1]} : vector<64x384xf32> to vector<8x384xf32>
    %c0_86 = arith.constant 0 : index
    %c0_87 = arith.constant 0 : index
    %c0_88 = arith.constant 0 : index
    %181 = vector.load %arg10[%c0_86, %c0_87, %c0_88] : memref<2x8x128xf32, #tpu.memory_space<vmem>>, vector<1x8x128xf32>
    %182 = vector.shape_cast %181 : vector<1x8x128xf32> to vector<8x128xf32>
    %c0_89 = arith.constant 0 : index
    %c0_90 = arith.constant 0 : index
    %c0_91 = arith.constant 0 : index
    %183 = vector.load %arg4[%c0_89, %c0_90, %c0_91] : memref<2x128x384xf32, #tpu.memory_space<vmem>>, vector<1x128x384xf32>
    %184 = vector.shape_cast %183 : vector<1x128x384xf32> to vector<128x384xf32>
    %cst_92 = arith.constant dense<0.000000e+00> : vector<8x384xf32>
    %185 = tpu.matmul %182, %184, %cst_92 {dimension_numbers = #tpu.dot_dimension_numbers<[1], [0], [0], [1], [0, 0, 1, 1], [], []>} : vector<8x128xf32>, vector<128x384xf32>, vector<8x384xf32> -> vector<8x384xf32>
    %c0_93 = arith.constant 0 : index
    %c0_94 = arith.constant 0 : index
    %c0_95 = arith.constant 0 : index
    %186 = vector.load %arg6[%c0_93, %c0_94, %c0_95] : memref<2x1x384xf32, #tpu.memory_space<vmem>>, vector<1x1x384xf32>
    %187 = vector.shape_cast %186 : vector<1x1x384xf32> to vector<1x384xf32>
    %188 = vector.broadcast %187 : vector<1x384xf32> to vector<8x384xf32>
    %189 = arith.addf %185, %188 : vector<8x384xf32>
    %190 = vector.extract_strided_slice %180 {offsets = [0, 0], sizes = [8, 128], strides = [1, 1]} : vector<8x384xf32> to vector<8x128xf32>
    %191 = vector.extract_strided_slice %189 {offsets = [0, 0], sizes = [8, 128], strides = [1, 1]} : vector<8x384xf32> to vector<8x128xf32>
    %192 = arith.addf %190, %191 : vector<8x128xf32>
    %193 = arith.negf %192 : vector<8x128xf32>
    %194 = math.exp %193 : vector<8x128xf32>
    %cst_96 = arith.constant 1.000000e+00 : f32
    %195 = vector.broadcast %cst_96 : f32 to vector<8x128xf32>
    %196 = arith.addf %195, %194 : vector<8x128xf32>
    %197 = arith.divf %195, %196 : vector<8x128xf32>
    %198 = vector.extract_strided_slice %180 {offsets = [0, 128], sizes = [8, 128], strides = [1, 1]} : vector<8x384xf32> to vector<8x128xf32>
    %199 = vector.extract_strided_slice %189 {offsets = [0, 128], sizes = [8, 128], strides = [1, 1]} : vector<8x384xf32> to vector<8x128xf32>
    %200 = arith.addf %198, %199 : vector<8x128xf32>
    %201 = arith.negf %200 : vector<8x128xf32>
    %202 = math.exp %201 : vector<8x128xf32>
    %cst_97 = arith.constant 1.000000e+00 : f32
    %203 = vector.broadcast %cst_97 : f32 to vector<8x128xf32>
    %204 = arith.addf %203, %202 : vector<8x128xf32>
    %205 = arith.divf %203, %204 : vector<8x128xf32>
    %206 = vector.extract_strided_slice %180 {offsets = [0, 256], sizes = [8, 128], strides = [1, 1]} : vector<8x384xf32> to vector<8x128xf32>
    %207 = vector.extract_strided_slice %189 {offsets = [0, 256], sizes = [8, 128], strides = [1, 1]} : vector<8x384xf32> to vector<8x128xf32>
    %208 = arith.mulf %197, %207 : vector<8x128xf32>
    %209 = arith.addf %206, %208 : vector<8x128xf32>
    %210 = math.tanh %209 : vector<8x128xf32>
    %cst_98 = arith.constant 1.000000e+00 : f32
    %211 = vector.broadcast %cst_98 : f32 to vector<8x128xf32>
    %212 = arith.subf %211, %205 : vector<8x128xf32>
    %213 = arith.mulf %212, %210 : vector<8x128xf32>
    %214 = arith.mulf %205, %182 : vector<8x128xf32>
    %215 = arith.addf %213, %214 : vector<8x128xf32>
    %c0_99 = arith.constant 0 : index
    %c0_100 = arith.constant 0 : index
    %c0_101 = arith.constant 0 : index
    %216 = vector.load %arg10[%c0_99, %c0_100, %c0_101] : memref<2x8x128xf32, #tpu.memory_space<vmem>>, vector<1x8x128xf32>
    %217 = vector.shape_cast %216 : vector<1x8x128xf32> to vector<8x128xf32>
    %218 = vector.shape_cast %215 : vector<8x128xf32> to vector<1x8x128xf32>
    tpu.vector_store %arg10[%c0_99, %c0_100, %c0_101], %218 {strides = array<i32>} : memref<2x8x128xf32, #tpu.memory_space<vmem>>, vector<1x8x128xf32>,
    %c1_102 = arith.constant 1 : index
    %c0_103 = arith.constant 0 : index
    %c0_104 = arith.constant 0 : index
    %219 = vector.load %arg10[%c1_102, %c0_103, %c0_104] : memref<2x8x128xf32, #tpu.memory_space<vmem>>, vector<1x8x128xf32>
    %220 = vector.shape_cast %219 : vector<1x8x128xf32> to vector<8x128xf32>
    %c1_105 = arith.constant 1 : index
    %c0_106 = arith.constant 0 : index
    %c0_107 = arith.constant 0 : index
    %221 = vector.load %arg3[%c1_105, %c0_106, %c0_107] : memref<2x128x384xf32, #tpu.memory_space<vmem>>, vector<1x128x384xf32>
    %222 = vector.shape_cast %221 : vector<1x128x384xf32> to vector<128x384xf32>
    %cst_108 = arith.constant dense<0.000000e+00> : vector<8x384xf32>
    %223 = tpu.matmul %215, %222, %cst_108 {dimension_numbers = #tpu.dot_dimension_numbers<[1], [0], [0], [1], [0, 0, 1, 1], [], []>} : vector<8x128xf32>, vector<128x384xf32>, vector<8x384xf32> -> vector<8x384xf32>
    %c1_109 = arith.constant 1 : index
    %c0_110 = arith.constant 0 : index
    %c0_111 = arith.constant 0 : index
    %224 = vector.load %arg5[%c1_109, %c0_110, %c0_111] : memref<2x1x384xf32, #tpu.memory_space<vmem>>, vector<1x1x384xf32>
    %225 = vector.shape_cast %224 : vector<1x1x384xf32> to vector<1x384xf32>
    %226 = vector.broadcast %225 : vector<1x384xf32> to vector<8x384xf32>
    %227 = arith.addf %223, %226 : vector<8x384xf32>
    %c1_112 = arith.constant 1 : index
    %c0_113 = arith.constant 0 : index
    %c0_114 = arith.constant 0 : index
    %228 = vector.load %arg4[%c1_112, %c0_113, %c0_114] : memref<2x128x384xf32, #tpu.memory_space<vmem>>, vector<1x128x384xf32>
    %229 = vector.shape_cast %228 : vector<1x128x384xf32> to vector<128x384xf32>
    %cst_115 = arith.constant dense<0.000000e+00> : vector<8x384xf32>
    %230 = tpu.matmul %220, %229, %cst_115 {dimension_numbers = #tpu.dot_dimension_numbers<[1], [0], [0], [1], [0, 0, 1, 1], [], []>} : vector<8x128xf32>, vector<128x384xf32>, vector<8x384xf32> -> vector<8x384xf32>
    %c1_116 = arith.constant 1 : index
    %c0_117 = arith.constant 0 : index
    %c0_118 = arith.constant 0 : index
    %231 = vector.load %arg6[%c1_116, %c0_117, %c0_118] : memref<2x1x384xf32, #tpu.memory_space<vmem>>, vector<1x1x384xf32>
    %232 = vector.shape_cast %231 : vector<1x1x384xf32> to vector<1x384xf32>
    %233 = vector.broadcast %232 : vector<1x384xf32> to vector<8x384xf32>
    %234 = arith.addf %230, %233 : vector<8x384xf32>
    %235 = vector.extract_strided_slice %227 {offsets = [0, 0], sizes = [8, 128], strides = [1, 1]} : vector<8x384xf32> to vector<8x128xf32>
    %236 = vector.extract_strided_slice %234 {offsets = [0, 0], sizes = [8, 128], strides = [1, 1]} : vector<8x384xf32> to vector<8x128xf32>
    %237 = arith.addf %235, %236 : vector<8x128xf32>
    %238 = arith.negf %237 : vector<8x128xf32>
    %239 = math.exp %238 : vector<8x128xf32>
    %cst_119 = arith.constant 1.000000e+00 : f32
    %240 = vector.broadcast %cst_119 : f32 to vector<8x128xf32>
    %241 = arith.addf %240, %239 : vector<8x128xf32>
    %242 = arith.divf %240, %241 : vector<8x128xf32>
    %243 = vector.extract_strided_slice %227 {offsets = [0, 128], sizes = [8, 128], strides = [1, 1]} : vector<8x384xf32> to vector<8x128xf32>
    %244 = vector.extract_strided_slice %234 {offsets = [0, 128], sizes = [8, 128], strides = [1, 1]} : vector<8x384xf32> to vector<8x128xf32>
    %245 = arith.addf %243, %244 : vector<8x128xf32>
    %246 = arith.negf %245 : vector<8x128xf32>
    %247 = math.exp %246 : vector<8x128xf32>
    %cst_120 = arith.constant 1.000000e+00 : f32
    %248 = vector.broadcast %cst_120 : f32 to vector<8x128xf32>
    %249 = arith.addf %248, %247 : vector<8x128xf32>
    %250 = arith.divf %248, %249 : vector<8x128xf32>
    %251 = vector.extract_strided_slice %227 {offsets = [0, 256], sizes = [8, 128], strides = [1, 1]} : vector<8x384xf32> to vector<8x128xf32>
    %252 = vector.extract_strided_slice %234 {offsets = [0, 256], sizes = [8, 128], strides = [1, 1]} : vector<8x384xf32> to vector<8x128xf32>
    %253 = arith.mulf %242, %252 : vector<8x128xf32>
    %254 = arith.addf %251, %253 : vector<8x128xf32>
    %255 = math.tanh %254 : vector<8x128xf32>
    %cst_121 = arith.constant 1.000000e+00 : f32
    %256 = vector.broadcast %cst_121 : f32 to vector<8x128xf32>
    %257 = arith.subf %256, %250 : vector<8x128xf32>
    %258 = arith.mulf %257, %255 : vector<8x128xf32>
    %259 = arith.mulf %250, %220 : vector<8x128xf32>
    %260 = arith.addf %258, %259 : vector<8x128xf32>
    %c1_122 = arith.constant 1 : index
    %c0_123 = arith.constant 0 : index
    %c0_124 = arith.constant 0 : index
    %261 = vector.load %arg10[%c1_122, %c0_123, %c0_124] : memref<2x8x128xf32, #tpu.memory_space<vmem>>, vector<1x8x128xf32>
    %262 = vector.shape_cast %261 : vector<1x8x128xf32> to vector<8x128xf32>
    %263 = vector.shape_cast %260 : vector<8x128xf32> to vector<1x8x128xf32>
    tpu.vector_store %arg10[%c1_122, %c0_123, %c0_124], %263 {strides = array<i32>} : memref<2x8x128xf32, #tpu.memory_space<vmem>>, vector<1x8x128xf32>,
    %264 = vector.extract_strided_slice %11 {offsets = [24, 0], sizes = [8, 384], strides = [1, 1]} : vector<64x384xf32> to vector<8x384xf32>
    %c0_125 = arith.constant 0 : index
    %c0_126 = arith.constant 0 : index
    %c0_127 = arith.constant 0 : index
    %265 = vector.load %arg10[%c0_125, %c0_126, %c0_127] : memref<2x8x128xf32, #tpu.memory_space<vmem>>, vector<1x8x128xf32>
    %266 = vector.shape_cast %265 : vector<1x8x128xf32> to vector<8x128xf32>
    %c0_128 = arith.constant 0 : index
    %c0_129 = arith.constant 0 : index
    %c0_130 = arith.constant 0 : index
    %267 = vector.load %arg4[%c0_128, %c0_129, %c0_130] : memref<2x128x384xf32, #tpu.memory_space<vmem>>, vector<1x128x384xf32>
    %268 = vector.shape_cast %267 : vector<1x128x384xf32> to vector<128x384xf32>
    %cst_131 = arith.constant dense<0.000000e+00> : vector<8x384xf32>
    %269 = tpu.matmul %266, %268, %cst_131 {dimension_numbers = #tpu.dot_dimension_numbers<[1], [0], [0], [1], [0, 0, 1, 1], [], []>} : vector<8x128xf32>, vector<128x384xf32>, vector<8x384xf32> -> vector<8x384xf32>
    %c0_132 = arith.constant 0 : index
    %c0_133 = arith.constant 0 : index
    %c0_134 = arith.constant 0 : index
    %270 = vector.load %arg6[%c0_132, %c0_133, %c0_134] : memref<2x1x384xf32, #tpu.memory_space<vmem>>, vector<1x1x384xf32>
    %271 = vector.shape_cast %270 : vector<1x1x384xf32> to vector<1x384xf32>
    %272 = vector.broadcast %271 : vector<1x384xf32> to vector<8x384xf32>
    %273 = arith.addf %269, %272 : vector<8x384xf32>
    %274 = vector.extract_strided_slice %264 {offsets = [0, 0], sizes = [8, 128], strides = [1, 1]} : vector<8x384xf32> to vector<8x128xf32>
    %275 = vector.extract_strided_slice %273 {offsets = [0, 0], sizes = [8, 128], strides = [1, 1]} : vector<8x384xf32> to vector<8x128xf32>
    %276 = arith.addf %274, %275 : vector<8x128xf32>
    %277 = arith.negf %276 : vector<8x128xf32>
    %278 = math.exp %277 : vector<8x128xf32>
    %cst_135 = arith.constant 1.000000e+00 : f32
    %279 = vector.broadcast %cst_135 : f32 to vector<8x128xf32>
    %280 = arith.addf %279, %278 : vector<8x128xf32>
    %281 = arith.divf %279, %280 : vector<8x128xf32>
    %282 = vector.extract_strided_slice %264 {offsets = [0, 128], sizes = [8, 128], strides = [1, 1]} : vector<8x384xf32> to vector<8x128xf32>
    %283 = vector.extract_strided_slice %273 {offsets = [0, 128], sizes = [8, 128], strides = [1, 1]} : vector<8x384xf32> to vector<8x128xf32>
    %284 = arith.addf %282, %283 : vector<8x128xf32>
    %285 = arith.negf %284 : vector<8x128xf32>
    %286 = math.exp %285 : vector<8x128xf32>
    %cst_136 = arith.constant 1.000000e+00 : f32
    %287 = vector.broadcast %cst_136 : f32 to vector<8x128xf32>
    %288 = arith.addf %287, %286 : vector<8x128xf32>
    %289 = arith.divf %287, %288 : vector<8x128xf32>
    %290 = vector.extract_strided_slice %264 {offsets = [0, 256], sizes = [8, 128], strides = [1, 1]} : vector<8x384xf32> to vector<8x128xf32>
    %291 = vector.extract_strided_slice %273 {offsets = [0, 256], sizes = [8, 128], strides = [1, 1]} : vector<8x384xf32> to vector<8x128xf32>
    %292 = arith.mulf %281, %291 : vector<8x128xf32>
    %293 = arith.addf %290, %292 : vector<8x128xf32>
    %294 = math.tanh %293 : vector<8x128xf32>
    %cst_137 = arith.constant 1.000000e+00 : f32
    %295 = vector.broadcast %cst_137 : f32 to vector<8x128xf32>
    %296 = arith.subf %295, %289 : vector<8x128xf32>
    %297 = arith.mulf %296, %294 : vector<8x128xf32>
    %298 = arith.mulf %289, %266 : vector<8x128xf32>
    %299 = arith.addf %297, %298 : vector<8x128xf32>
    %c0_138 = arith.constant 0 : index
    %c0_139 = arith.constant 0 : index
    %c0_140 = arith.constant 0 : index
    %300 = vector.load %arg10[%c0_138, %c0_139, %c0_140] : memref<2x8x128xf32, #tpu.memory_space<vmem>>, vector<1x8x128xf32>
    %301 = vector.shape_cast %300 : vector<1x8x128xf32> to vector<8x128xf32>
    %302 = vector.shape_cast %299 : vector<8x128xf32> to vector<1x8x128xf32>
    tpu.vector_store %arg10[%c0_138, %c0_139, %c0_140], %302 {strides = array<i32>} : memref<2x8x128xf32, #tpu.memory_space<vmem>>, vector<1x8x128xf32>,
    %c1_141 = arith.constant 1 : index
    %c0_142 = arith.constant 0 : index
    %c0_143 = arith.constant 0 : index
    %303 = vector.load %arg10[%c1_141, %c0_142, %c0_143] : memref<2x8x128xf32, #tpu.memory_space<vmem>>, vector<1x8x128xf32>
    %304 = vector.shape_cast %303 : vector<1x8x128xf32> to vector<8x128xf32>
    %c1_144 = arith.constant 1 : index
    %c0_145 = arith.constant 0 : index
    %c0_146 = arith.constant 0 : index
    %305 = vector.load %arg3[%c1_144, %c0_145, %c0_146] : memref<2x128x384xf32, #tpu.memory_space<vmem>>, vector<1x128x384xf32>
    %306 = vector.shape_cast %305 : vector<1x128x384xf32> to vector<128x384xf32>
    %cst_147 = arith.constant dense<0.000000e+00> : vector<8x384xf32>
    %307 = tpu.matmul %299, %306, %cst_147 {dimension_numbers = #tpu.dot_dimension_numbers<[1], [0], [0], [1], [0, 0, 1, 1], [], []>} : vector<8x128xf32>, vector<128x384xf32>, vector<8x384xf32> -> vector<8x384xf32>
    %c1_148 = arith.constant 1 : index
    %c0_149 = arith.constant 0 : index
    %c0_150 = arith.constant 0 : index
    %308 = vector.load %arg5[%c1_148, %c0_149, %c0_150] : memref<2x1x384xf32, #tpu.memory_space<vmem>>, vector<1x1x384xf32>
    %309 = vector.shape_cast %308 : vector<1x1x384xf32> to vector<1x384xf32>
    %310 = vector.broadcast %309 : vector<1x384xf32> to vector<8x384xf32>
    %311 = arith.addf %307, %310 : vector<8x384xf32>
    %c1_151 = arith.constant 1 : index
    %c0_152 = arith.constant 0 : index
    %c0_153 = arith.constant 0 : index
    %312 = vector.load %arg4[%c1_151, %c0_152, %c0_153] : memref<2x128x384xf32, #tpu.memory_space<vmem>>, vector<1x128x384xf32>
    %313 = vector.shape_cast %312 : vector<1x128x384xf32> to vector<128x384xf32>
    %cst_154 = arith.constant dense<0.000000e+00> : vector<8x384xf32>
    %314 = tpu.matmul %304, %313, %cst_154 {dimension_numbers = #tpu.dot_dimension_numbers<[1], [0], [0], [1], [0, 0, 1, 1], [], []>} : vector<8x128xf32>, vector<128x384xf32>, vector<8x384xf32> -> vector<8x384xf32>
    %c1_155 = arith.constant 1 : index
    %c0_156 = arith.constant 0 : index
    %c0_157 = arith.constant 0 : index
    %315 = vector.load %arg6[%c1_155, %c0_156, %c0_157] : memref<2x1x384xf32, #tpu.memory_space<vmem>>, vector<1x1x384xf32>
    %316 = vector.shape_cast %315 : vector<1x1x384xf32> to vector<1x384xf32>
    %317 = vector.broadcast %316 : vector<1x384xf32> to vector<8x384xf32>
    %318 = arith.addf %314, %317 : vector<8x384xf32>
    %319 = vector.extract_strided_slice %311 {offsets = [0, 0], sizes = [8, 128], strides = [1, 1]} : vector<8x384xf32> to vector<8x128xf32>
    %320 = vector.extract_strided_slice %318 {offsets = [0, 0], sizes = [8, 128], strides = [1, 1]} : vector<8x384xf32> to vector<8x128xf32>
    %321 = arith.addf %319, %320 : vector<8x128xf32>
    %322 = arith.negf %321 : vector<8x128xf32>
    %323 = math.exp %322 : vector<8x128xf32>
    %cst_158 = arith.constant 1.000000e+00 : f32
    %324 = vector.broadcast %cst_158 : f32 to vector<8x128xf32>
    %325 = arith.addf %324, %323 : vector<8x128xf32>
    %326 = arith.divf %324, %325 : vector<8x128xf32>
    %327 = vector.extract_strided_slice %311 {offsets = [0, 128], sizes = [8, 128], strides = [1, 1]} : vector<8x384xf32> to vector<8x128xf32>
    %328 = vector.extract_strided_slice %318 {offsets = [0, 128], sizes = [8, 128], strides = [1, 1]} : vector<8x384xf32> to vector<8x128xf32>
    %329 = arith.addf %327, %328 : vector<8x128xf32>
    %330 = arith.negf %329 : vector<8x128xf32>
    %331 = math.exp %330 : vector<8x128xf32>
    %cst_159 = arith.constant 1.000000e+00 : f32
    %332 = vector.broadcast %cst_159 : f32 to vector<8x128xf32>
    %333 = arith.addf %332, %331 : vector<8x128xf32>
    %334 = arith.divf %332, %333 : vector<8x128xf32>
    %335 = vector.extract_strided_slice %311 {offsets = [0, 256], sizes = [8, 128], strides = [1, 1]} : vector<8x384xf32> to vector<8x128xf32>
    %336 = vector.extract_strided_slice %318 {offsets = [0, 256], sizes = [8, 128], strides = [1, 1]} : vector<8x384xf32> to vector<8x128xf32>
    %337 = arith.mulf %326, %336 : vector<8x128xf32>
    %338 = arith.addf %335, %337 : vector<8x128xf32>
    %339 = math.tanh %338 : vector<8x128xf32>
    %cst_160 = arith.constant 1.000000e+00 : f32
    %340 = vector.broadcast %cst_160 : f32 to vector<8x128xf32>
    %341 = arith.subf %340, %334 : vector<8x128xf32>
    %342 = arith.mulf %341, %339 : vector<8x128xf32>
    %343 = arith.mulf %334, %304 : vector<8x128xf32>
    %344 = arith.addf %342, %343 : vector<8x128xf32>
    %c1_161 = arith.constant 1 : index
    %c0_162 = arith.constant 0 : index
    %c0_163 = arith.constant 0 : index
    %345 = vector.load %arg10[%c1_161, %c0_162, %c0_163] : memref<2x8x128xf32, #tpu.memory_space<vmem>>, vector<1x8x128xf32>
    %346 = vector.shape_cast %345 : vector<1x8x128xf32> to vector<8x128xf32>
    %347 = vector.shape_cast %344 : vector<8x128xf32> to vector<1x8x128xf32>
    tpu.vector_store %arg10[%c1_161, %c0_162, %c0_163], %347 {strides = array<i32>} : memref<2x8x128xf32, #tpu.memory_space<vmem>>, vector<1x8x128xf32>,
    %348 = vector.extract_strided_slice %11 {offsets = [32, 0], sizes = [8, 384], strides = [1, 1]} : vector<64x384xf32> to vector<8x384xf32>
    %c0_164 = arith.constant 0 : index
    %c0_165 = arith.constant 0 : index
    %c0_166 = arith.constant 0 : index
    %349 = vector.load %arg10[%c0_164, %c0_165, %c0_166] : memref<2x8x128xf32, #tpu.memory_space<vmem>>, vector<1x8x128xf32>
    %350 = vector.shape_cast %349 : vector<1x8x128xf32> to vector<8x128xf32>
    %c0_167 = arith.constant 0 : index
    %c0_168 = arith.constant 0 : index
    %c0_169 = arith.constant 0 : index
    %351 = vector.load %arg4[%c0_167, %c0_168, %c0_169] : memref<2x128x384xf32, #tpu.memory_space<vmem>>, vector<1x128x384xf32>
    %352 = vector.shape_cast %351 : vector<1x128x384xf32> to vector<128x384xf32>
    %cst_170 = arith.constant dense<0.000000e+00> : vector<8x384xf32>
    %353 = tpu.matmul %350, %352, %cst_170 {dimension_numbers = #tpu.dot_dimension_numbers<[1], [0], [0], [1], [0, 0, 1, 1], [], []>} : vector<8x128xf32>, vector<128x384xf32>, vector<8x384xf32> -> vector<8x384xf32>
    %c0_171 = arith.constant 0 : index
    %c0_172 = arith.constant 0 : index
    %c0_173 = arith.constant 0 : index
    %354 = vector.load %arg6[%c0_171, %c0_172, %c0_173] : memref<2x1x384xf32, #tpu.memory_space<vmem>>, vector<1x1x384xf32>
    %355 = vector.shape_cast %354 : vector<1x1x384xf32> to vector<1x384xf32>
    %356 = vector.broadcast %355 : vector<1x384xf32> to vector<8x384xf32>
    %357 = arith.addf %353, %356 : vector<8x384xf32>
    %358 = vector.extract_strided_slice %348 {offsets = [0, 0], sizes = [8, 128], strides = [1, 1]} : vector<8x384xf32> to vector<8x128xf32>
    %359 = vector.extract_strided_slice %357 {offsets = [0, 0], sizes = [8, 128], strides = [1, 1]} : vector<8x384xf32> to vector<8x128xf32>
    %360 = arith.addf %358, %359 : vector<8x128xf32>
    %361 = arith.negf %360 : vector<8x128xf32>
    %362 = math.exp %361 : vector<8x128xf32>
    %cst_174 = arith.constant 1.000000e+00 : f32
    %363 = vector.broadcast %cst_174 : f32 to vector<8x128xf32>
    %364 = arith.addf %363, %362 : vector<8x128xf32>
    %365 = arith.divf %363, %364 : vector<8x128xf32>
    %366 = vector.extract_strided_slice %348 {offsets = [0, 128], sizes = [8, 128], strides = [1, 1]} : vector<8x384xf32> to vector<8x128xf32>
    %367 = vector.extract_strided_slice %357 {offsets = [0, 128], sizes = [8, 128], strides = [1, 1]} : vector<8x384xf32> to vector<8x128xf32>
    %368 = arith.addf %366, %367 : vector<8x128xf32>
    %369 = arith.negf %368 : vector<8x128xf32>
    %370 = math.exp %369 : vector<8x128xf32>
    %cst_175 = arith.constant 1.000000e+00 : f32
    %371 = vector.broadcast %cst_175 : f32 to vector<8x128xf32>
    %372 = arith.addf %371, %370 : vector<8x128xf32>
    %373 = arith.divf %371, %372 : vector<8x128xf32>
    %374 = vector.extract_strided_slice %348 {offsets = [0, 256], sizes = [8, 128], strides = [1, 1]} : vector<8x384xf32> to vector<8x128xf32>
    %375 = vector.extract_strided_slice %357 {offsets = [0, 256], sizes = [8, 128], strides = [1, 1]} : vector<8x384xf32> to vector<8x128xf32>
    %376 = arith.mulf %365, %375 : vector<8x128xf32>
    %377 = arith.addf %374, %376 : vector<8x128xf32>
    %378 = math.tanh %377 : vector<8x128xf32>
    %cst_176 = arith.constant 1.000000e+00 : f32
    %379 = vector.broadcast %cst_176 : f32 to vector<8x128xf32>
    %380 = arith.subf %379, %373 : vector<8x128xf32>
    %381 = arith.mulf %380, %378 : vector<8x128xf32>
    %382 = arith.mulf %373, %350 : vector<8x128xf32>
    %383 = arith.addf %381, %382 : vector<8x128xf32>
    %c0_177 = arith.constant 0 : index
    %c0_178 = arith.constant 0 : index
    %c0_179 = arith.constant 0 : index
    %384 = vector.load %arg10[%c0_177, %c0_178, %c0_179] : memref<2x8x128xf32, #tpu.memory_space<vmem>>, vector<1x8x128xf32>
    %385 = vector.shape_cast %384 : vector<1x8x128xf32> to vector<8x128xf32>
    %386 = vector.shape_cast %383 : vector<8x128xf32> to vector<1x8x128xf32>
    tpu.vector_store %arg10[%c0_177, %c0_178, %c0_179], %386 {strides = array<i32>} : memref<2x8x128xf32, #tpu.memory_space<vmem>>, vector<1x8x128xf32>,
    %c1_180 = arith.constant 1 : index
    %c0_181 = arith.constant 0 : index
    %c0_182 = arith.constant 0 : index
    %387 = vector.load %arg10[%c1_180, %c0_181, %c0_182] : memref<2x8x128xf32, #tpu.memory_space<vmem>>, vector<1x8x128xf32>
    %388 = vector.shape_cast %387 : vector<1x8x128xf32> to vector<8x128xf32>
    %c1_183 = arith.constant 1 : index
    %c0_184 = arith.constant 0 : index
    %c0_185 = arith.constant 0 : index
    %389 = vector.load %arg3[%c1_183, %c0_184, %c0_185] : memref<2x128x384xf32, #tpu.memory_space<vmem>>, vector<1x128x384xf32>
    %390 = vector.shape_cast %389 : vector<1x128x384xf32> to vector<128x384xf32>
    %cst_186 = arith.constant dense<0.000000e+00> : vector<8x384xf32>
    %391 = tpu.matmul %383, %390, %cst_186 {dimension_numbers = #tpu.dot_dimension_numbers<[1], [0], [0], [1], [0, 0, 1, 1], [], []>} : vector<8x128xf32>, vector<128x384xf32>, vector<8x384xf32> -> vector<8x384xf32>
    %c1_187 = arith.constant 1 : index
    %c0_188 = arith.constant 0 : index
    %c0_189 = arith.constant 0 : index
    %392 = vector.load %arg5[%c1_187, %c0_188, %c0_189] : memref<2x1x384xf32, #tpu.memory_space<vmem>>, vector<1x1x384xf32>
    %393 = vector.shape_cast %392 : vector<1x1x384xf32> to vector<1x384xf32>
    %394 = vector.broadcast %393 : vector<1x384xf32> to vector<8x384xf32>
    %395 = arith.addf %391, %394 : vector<8x384xf32>
    %c1_190 = arith.constant 1 : index
    %c0_191 = arith.constant 0 : index
    %c0_192 = arith.constant 0 : index
    %396 = vector.load %arg4[%c1_190, %c0_191, %c0_192] : memref<2x128x384xf32, #tpu.memory_space<vmem>>, vector<1x128x384xf32>
    %397 = vector.shape_cast %396 : vector<1x128x384xf32> to vector<128x384xf32>
    %cst_193 = arith.constant dense<0.000000e+00> : vector<8x384xf32>
    %398 = tpu.matmul %388, %397, %cst_193 {dimension_numbers = #tpu.dot_dimension_numbers<[1], [0], [0], [1], [0, 0, 1, 1], [], []>} : vector<8x128xf32>, vector<128x384xf32>, vector<8x384xf32> -> vector<8x384xf32>
    %c1_194 = arith.constant 1 : index
    %c0_195 = arith.constant 0 : index
    %c0_196 = arith.constant 0 : index
    %399 = vector.load %arg6[%c1_194, %c0_195, %c0_196] : memref<2x1x384xf32, #tpu.memory_space<vmem>>, vector<1x1x384xf32>
    %400 = vector.shape_cast %399 : vector<1x1x384xf32> to vector<1x384xf32>
    %401 = vector.broadcast %400 : vector<1x384xf32> to vector<8x384xf32>
    %402 = arith.addf %398, %401 : vector<8x384xf32>
    %403 = vector.extract_strided_slice %395 {offsets = [0, 0], sizes = [8, 128], strides = [1, 1]} : vector<8x384xf32> to vector<8x128xf32>
    %404 = vector.extract_strided_slice %402 {offsets = [0, 0], sizes = [8, 128], strides = [1, 1]} : vector<8x384xf32> to vector<8x128xf32>
    %405 = arith.addf %403, %404 : vector<8x128xf32>
    %406 = arith.negf %405 : vector<8x128xf32>
    %407 = math.exp %406 : vector<8x128xf32>
    %cst_197 = arith.constant 1.000000e+00 : f32
    %408 = vector.broadcast %cst_197 : f32 to vector<8x128xf32>
    %409 = arith.addf %408, %407 : vector<8x128xf32>
    %410 = arith.divf %408, %409 : vector<8x128xf32>
    %411 = vector.extract_strided_slice %395 {offsets = [0, 128], sizes = [8, 128], strides = [1, 1]} : vector<8x384xf32> to vector<8x128xf32>
    %412 = vector.extract_strided_slice %402 {offsets = [0, 128], sizes = [8, 128], strides = [1, 1]} : vector<8x384xf32> to vector<8x128xf32>
    %413 = arith.addf %411, %412 : vector<8x128xf32>
    %414 = arith.negf %413 : vector<8x128xf32>
    %415 = math.exp %414 : vector<8x128xf32>
    %cst_198 = arith.constant 1.000000e+00 : f32
    %416 = vector.broadcast %cst_198 : f32 to vector<8x128xf32>
    %417 = arith.addf %416, %415 : vector<8x128xf32>
    %418 = arith.divf %416, %417 : vector<8x128xf32>
    %419 = vector.extract_strided_slice %395 {offsets = [0, 256], sizes = [8, 128], strides = [1, 1]} : vector<8x384xf32> to vector<8x128xf32>
    %420 = vector.extract_strided_slice %402 {offsets = [0, 256], sizes = [8, 128], strides = [1, 1]} : vector<8x384xf32> to vector<8x128xf32>
    %421 = arith.mulf %410, %420 : vector<8x128xf32>
    %422 = arith.addf %419, %421 : vector<8x128xf32>
    %423 = math.tanh %422 : vector<8x128xf32>
    %cst_199 = arith.constant 1.000000e+00 : f32
    %424 = vector.broadcast %cst_199 : f32 to vector<8x128xf32>
    %425 = arith.subf %424, %418 : vector<8x128xf32>
    %426 = arith.mulf %425, %423 : vector<8x128xf32>
    %427 = arith.mulf %418, %388 : vector<8x128xf32>
    %428 = arith.addf %426, %427 : vector<8x128xf32>
    %c1_200 = arith.constant 1 : index
    %c0_201 = arith.constant 0 : index
    %c0_202 = arith.constant 0 : index
    %429 = vector.load %arg10[%c1_200, %c0_201, %c0_202] : memref<2x8x128xf32, #tpu.memory_space<vmem>>, vector<1x8x128xf32>
    %430 = vector.shape_cast %429 : vector<1x8x128xf32> to vector<8x128xf32>
    %431 = vector.shape_cast %428 : vector<8x128xf32> to vector<1x8x128xf32>
    tpu.vector_store %arg10[%c1_200, %c0_201, %c0_202], %431 {strides = array<i32>} : memref<2x8x128xf32, #tpu.memory_space<vmem>>, vector<1x8x128xf32>,
    %432 = vector.extract_strided_slice %11 {offsets = [40, 0], sizes = [8, 384], strides = [1, 1]} : vector<64x384xf32> to vector<8x384xf32>
    %c0_203 = arith.constant 0 : index
    %c0_204 = arith.constant 0 : index
    %c0_205 = arith.constant 0 : index
    %433 = vector.load %arg10[%c0_203, %c0_204, %c0_205] : memref<2x8x128xf32, #tpu.memory_space<vmem>>, vector<1x8x128xf32>
    %434 = vector.shape_cast %433 : vector<1x8x128xf32> to vector<8x128xf32>
    %c0_206 = arith.constant 0 : index
    %c0_207 = arith.constant 0 : index
    %c0_208 = arith.constant 0 : index
    %435 = vector.load %arg4[%c0_206, %c0_207, %c0_208] : memref<2x128x384xf32, #tpu.memory_space<vmem>>, vector<1x128x384xf32>
    %436 = vector.shape_cast %435 : vector<1x128x384xf32> to vector<128x384xf32>
    %cst_209 = arith.constant dense<0.000000e+00> : vector<8x384xf32>
    %437 = tpu.matmul %434, %436, %cst_209 {dimension_numbers = #tpu.dot_dimension_numbers<[1], [0], [0], [1], [0, 0, 1, 1], [], []>} : vector<8x128xf32>, vector<128x384xf32>, vector<8x384xf32> -> vector<8x384xf32>
    %c0_210 = arith.constant 0 : index
    %c0_211 = arith.constant 0 : index
    %c0_212 = arith.constant 0 : index
    %438 = vector.load %arg6[%c0_210, %c0_211, %c0_212] : memref<2x1x384xf32, #tpu.memory_space<vmem>>, vector<1x1x384xf32>
    %439 = vector.shape_cast %438 : vector<1x1x384xf32> to vector<1x384xf32>
    %440 = vector.broadcast %439 : vector<1x384xf32> to vector<8x384xf32>
    %441 = arith.addf %437, %440 : vector<8x384xf32>
    %442 = vector.extract_strided_slice %432 {offsets = [0, 0], sizes = [8, 128], strides = [1, 1]} : vector<8x384xf32> to vector<8x128xf32>
    %443 = vector.extract_strided_slice %441 {offsets = [0, 0], sizes = [8, 128], strides = [1, 1]} : vector<8x384xf32> to vector<8x128xf32>
    %444 = arith.addf %442, %443 : vector<8x128xf32>
    %445 = arith.negf %444 : vector<8x128xf32>
    %446 = math.exp %445 : vector<8x128xf32>
    %cst_213 = arith.constant 1.000000e+00 : f32
    %447 = vector.broadcast %cst_213 : f32 to vector<8x128xf32>
    %448 = arith.addf %447, %446 : vector<8x128xf32>
    %449 = arith.divf %447, %448 : vector<8x128xf32>
    %450 = vector.extract_strided_slice %432 {offsets = [0, 128], sizes = [8, 128], strides = [1, 1]} : vector<8x384xf32> to vector<8x128xf32>
    %451 = vector.extract_strided_slice %441 {offsets = [0, 128], sizes = [8, 128], strides = [1, 1]} : vector<8x384xf32> to vector<8x128xf32>
    %452 = arith.addf %450, %451 : vector<8x128xf32>
    %453 = arith.negf %452 : vector<8x128xf32>
    %454 = math.exp %453 : vector<8x128xf32>
    %cst_214 = arith.constant 1.000000e+00 : f32
    %455 = vector.broadcast %cst_214 : f32 to vector<8x128xf32>
    %456 = arith.addf %455, %454 : vector<8x128xf32>
    %457 = arith.divf %455, %456 : vector<8x128xf32>
    %458 = vector.extract_strided_slice %432 {offsets = [0, 256], sizes = [8, 128], strides = [1, 1]} : vector<8x384xf32> to vector<8x128xf32>
    %459 = vector.extract_strided_slice %441 {offsets = [0, 256], sizes = [8, 128], strides = [1, 1]} : vector<8x384xf32> to vector<8x128xf32>
    %460 = arith.mulf %449, %459 : vector<8x128xf32>
    %461 = arith.addf %458, %460 : vector<8x128xf32>
    %462 = math.tanh %461 : vector<8x128xf32>
    %cst_215 = arith.constant 1.000000e+00 : f32
    %463 = vector.broadcast %cst_215 : f32 to vector<8x128xf32>
    %464 = arith.subf %463, %457 : vector<8x128xf32>
    %465 = arith.mulf %464, %462 : vector<8x128xf32>
    %466 = arith.mulf %457, %434 : vector<8x128xf32>
    %467 = arith.addf %465, %466 : vector<8x128xf32>
    %c0_216 = arith.constant 0 : index
    %c0_217 = arith.constant 0 : index
    %c0_218 = arith.constant 0 : index
    %468 = vector.load %arg10[%c0_216, %c0_217, %c0_218] : memref<2x8x128xf32, #tpu.memory_space<vmem>>, vector<1x8x128xf32>
    %469 = vector.shape_cast %468 : vector<1x8x128xf32> to vector<8x128xf32>
    %470 = vector.shape_cast %467 : vector<8x128xf32> to vector<1x8x128xf32>
    tpu.vector_store %arg10[%c0_216, %c0_217, %c0_218], %470 {strides = array<i32>} : memref<2x8x128xf32, #tpu.memory_space<vmem>>, vector<1x8x128xf32>,
    %c1_219 = arith.constant 1 : index
    %c0_220 = arith.constant 0 : index
    %c0_221 = arith.constant 0 : index
    %471 = vector.load %arg10[%c1_219, %c0_220, %c0_221] : memref<2x8x128xf32, #tpu.memory_space<vmem>>, vector<1x8x128xf32>
    %472 = vector.shape_cast %471 : vector<1x8x128xf32> to vector<8x128xf32>
    %c1_222 = arith.constant 1 : index
    %c0_223 = arith.constant 0 : index
    %c0_224 = arith.constant 0 : index
    %473 = vector.load %arg3[%c1_222, %c0_223, %c0_224] : memref<2x128x384xf32, #tpu.memory_space<vmem>>, vector<1x128x384xf32>
    %474 = vector.shape_cast %473 : vector<1x128x384xf32> to vector<128x384xf32>
    %cst_225 = arith.constant dense<0.000000e+00> : vector<8x384xf32>
    %475 = tpu.matmul %467, %474, %cst_225 {dimension_numbers = #tpu.dot_dimension_numbers<[1], [0], [0], [1], [0, 0, 1, 1], [], []>} : vector<8x128xf32>, vector<128x384xf32>, vector<8x384xf32> -> vector<8x384xf32>
    %c1_226 = arith.constant 1 : index
    %c0_227 = arith.constant 0 : index
    %c0_228 = arith.constant 0 : index
    %476 = vector.load %arg5[%c1_226, %c0_227, %c0_228] : memref<2x1x384xf32, #tpu.memory_space<vmem>>, vector<1x1x384xf32>
    %477 = vector.shape_cast %476 : vector<1x1x384xf32> to vector<1x384xf32>
    %478 = vector.broadcast %477 : vector<1x384xf32> to vector<8x384xf32>
    %479 = arith.addf %475, %478 : vector<8x384xf32>
    %c1_229 = arith.constant 1 : index
    %c0_230 = arith.constant 0 : index
    %c0_231 = arith.constant 0 : index
    %480 = vector.load %arg4[%c1_229, %c0_230, %c0_231] : memref<2x128x384xf32, #tpu.memory_space<vmem>>, vector<1x128x384xf32>
    %481 = vector.shape_cast %480 : vector<1x128x384xf32> to vector<128x384xf32>
    %cst_232 = arith.constant dense<0.000000e+00> : vector<8x384xf32>
    %482 = tpu.matmul %472, %481, %cst_232 {dimension_numbers = #tpu.dot_dimension_numbers<[1], [0], [0], [1], [0, 0, 1, 1], [], []>} : vector<8x128xf32>, vector<128x384xf32>, vector<8x384xf32> -> vector<8x384xf32>
    %c1_233 = arith.constant 1 : index
    %c0_234 = arith.constant 0 : index
    %c0_235 = arith.constant 0 : index
    %483 = vector.load %arg6[%c1_233, %c0_234, %c0_235] : memref<2x1x384xf32, #tpu.memory_space<vmem>>, vector<1x1x384xf32>
    %484 = vector.shape_cast %483 : vector<1x1x384xf32> to vector<1x384xf32>
    %485 = vector.broadcast %484 : vector<1x384xf32> to vector<8x384xf32>
    %486 = arith.addf %482, %485 : vector<8x384xf32>
    %487 = vector.extract_strided_slice %479 {offsets = [0, 0], sizes = [8, 128], strides = [1, 1]} : vector<8x384xf32> to vector<8x128xf32>
    %488 = vector.extract_strided_slice %486 {offsets = [0, 0], sizes = [8, 128], strides = [1, 1]} : vector<8x384xf32> to vector<8x128xf32>
    %489 = arith.addf %487, %488 : vector<8x128xf32>
    %490 = arith.negf %489 : vector<8x128xf32>
    %491 = math.exp %490 : vector<8x128xf32>
    %cst_236 = arith.constant 1.000000e+00 : f32
    %492 = vector.broadcast %cst_236 : f32 to vector<8x128xf32>
    %493 = arith.addf %492, %491 : vector<8x128xf32>
    %494 = arith.divf %492, %493 : vector<8x128xf32>
    %495 = vector.extract_strided_slice %479 {offsets = [0, 128], sizes = [8, 128], strides = [1, 1]} : vector<8x384xf32> to vector<8x128xf32>
    %496 = vector.extract_strided_slice %486 {offsets = [0, 128], sizes = [8, 128], strides = [1, 1]} : vector<8x384xf32> to vector<8x128xf32>
    %497 = arith.addf %495, %496 : vector<8x128xf32>
    %498 = arith.negf %497 : vector<8x128xf32>
    %499 = math.exp %498 : vector<8x128xf32>
    %cst_237 = arith.constant 1.000000e+00 : f32
    %500 = vector.broadcast %cst_237 : f32 to vector<8x128xf32>
    %501 = arith.addf %500, %499 : vector<8x128xf32>
    %502 = arith.divf %500, %501 : vector<8x128xf32>
    %503 = vector.extract_strided_slice %479 {offsets = [0, 256], sizes = [8, 128], strides = [1, 1]} : vector<8x384xf32> to vector<8x128xf32>
    %504 = vector.extract_strided_slice %486 {offsets = [0, 256], sizes = [8, 128], strides = [1, 1]} : vector<8x384xf32> to vector<8x128xf32>
    %505 = arith.mulf %494, %504 : vector<8x128xf32>
    %506 = arith.addf %503, %505 : vector<8x128xf32>
    %507 = math.tanh %506 : vector<8x128xf32>
    %cst_238 = arith.constant 1.000000e+00 : f32
    %508 = vector.broadcast %cst_238 : f32 to vector<8x128xf32>
    %509 = arith.subf %508, %502 : vector<8x128xf32>
    %510 = arith.mulf %509, %507 : vector<8x128xf32>
    %511 = arith.mulf %502, %472 : vector<8x128xf32>
    %512 = arith.addf %510, %511 : vector<8x128xf32>
    %c1_239 = arith.constant 1 : index
    %c0_240 = arith.constant 0 : index
    %c0_241 = arith.constant 0 : index
    %513 = vector.load %arg10[%c1_239, %c0_240, %c0_241] : memref<2x8x128xf32, #tpu.memory_space<vmem>>, vector<1x8x128xf32>
    %514 = vector.shape_cast %513 : vector<1x8x128xf32> to vector<8x128xf32>
    %515 = vector.shape_cast %512 : vector<8x128xf32> to vector<1x8x128xf32>
    tpu.vector_store %arg10[%c1_239, %c0_240, %c0_241], %515 {strides = array<i32>} : memref<2x8x128xf32, #tpu.memory_space<vmem>>, vector<1x8x128xf32>,
    %516 = vector.extract_strided_slice %11 {offsets = [48, 0], sizes = [8, 384], strides = [1, 1]} : vector<64x384xf32> to vector<8x384xf32>
    %c0_242 = arith.constant 0 : index
    %c0_243 = arith.constant 0 : index
    %c0_244 = arith.constant 0 : index
    %517 = vector.load %arg10[%c0_242, %c0_243, %c0_244] : memref<2x8x128xf32, #tpu.memory_space<vmem>>, vector<1x8x128xf32>
    %518 = vector.shape_cast %517 : vector<1x8x128xf32> to vector<8x128xf32>
    %c0_245 = arith.constant 0 : index
    %c0_246 = arith.constant 0 : index
    %c0_247 = arith.constant 0 : index
    %519 = vector.load %arg4[%c0_245, %c0_246, %c0_247] : memref<2x128x384xf32, #tpu.memory_space<vmem>>, vector<1x128x384xf32>
    %520 = vector.shape_cast %519 : vector<1x128x384xf32> to vector<128x384xf32>
    %cst_248 = arith.constant dense<0.000000e+00> : vector<8x384xf32>
    %521 = tpu.matmul %518, %520, %cst_248 {dimension_numbers = #tpu.dot_dimension_numbers<[1], [0], [0], [1], [0, 0, 1, 1], [], []>} : vector<8x128xf32>, vector<128x384xf32>, vector<8x384xf32> -> vector<8x384xf32>
    %c0_249 = arith.constant 0 : index
    %c0_250 = arith.constant 0 : index
    %c0_251 = arith.constant 0 : index
    %522 = vector.load %arg6[%c0_249, %c0_250, %c0_251] : memref<2x1x384xf32, #tpu.memory_space<vmem>>, vector<1x1x384xf32>
    %523 = vector.shape_cast %522 : vector<1x1x384xf32> to vector<1x384xf32>
    %524 = vector.broadcast %523 : vector<1x384xf32> to vector<8x384xf32>
    %525 = arith.addf %521, %524 : vector<8x384xf32>
    %526 = vector.extract_strided_slice %516 {offsets = [0, 0], sizes = [8, 128], strides = [1, 1]} : vector<8x384xf32> to vector<8x128xf32>
    %527 = vector.extract_strided_slice %525 {offsets = [0, 0], sizes = [8, 128], strides = [1, 1]} : vector<8x384xf32> to vector<8x128xf32>
    %528 = arith.addf %526, %527 : vector<8x128xf32>
    %529 = arith.negf %528 : vector<8x128xf32>
    %530 = math.exp %529 : vector<8x128xf32>
    %cst_252 = arith.constant 1.000000e+00 : f32
    %531 = vector.broadcast %cst_252 : f32 to vector<8x128xf32>
    %532 = arith.addf %531, %530 : vector<8x128xf32>
    %533 = arith.divf %531, %532 : vector<8x128xf32>
    %534 = vector.extract_strided_slice %516 {offsets = [0, 128], sizes = [8, 128], strides = [1, 1]} : vector<8x384xf32> to vector<8x128xf32>
    %535 = vector.extract_strided_slice %525 {offsets = [0, 128], sizes = [8, 128], strides = [1, 1]} : vector<8x384xf32> to vector<8x128xf32>
    %536 = arith.addf %534, %535 : vector<8x128xf32>
    %537 = arith.negf %536 : vector<8x128xf32>
    %538 = math.exp %537 : vector<8x128xf32>
    %cst_253 = arith.constant 1.000000e+00 : f32
    %539 = vector.broadcast %cst_253 : f32 to vector<8x128xf32>
    %540 = arith.addf %539, %538 : vector<8x128xf32>
    %541 = arith.divf %539, %540 : vector<8x128xf32>
    %542 = vector.extract_strided_slice %516 {offsets = [0, 256], sizes = [8, 128], strides = [1, 1]} : vector<8x384xf32> to vector<8x128xf32>
    %543 = vector.extract_strided_slice %525 {offsets = [0, 256], sizes = [8, 128], strides = [1, 1]} : vector<8x384xf32> to vector<8x128xf32>
    %544 = arith.mulf %533, %543 : vector<8x128xf32>
    %545 = arith.addf %542, %544 : vector<8x128xf32>
    %546 = math.tanh %545 : vector<8x128xf32>
    %cst_254 = arith.constant 1.000000e+00 : f32
    %547 = vector.broadcast %cst_254 : f32 to vector<8x128xf32>
    %548 = arith.subf %547, %541 : vector<8x128xf32>
    %549 = arith.mulf %548, %546 : vector<8x128xf32>
    %550 = arith.mulf %541, %518 : vector<8x128xf32>
    %551 = arith.addf %549, %550 : vector<8x128xf32>
    %c0_255 = arith.constant 0 : index
    %c0_256 = arith.constant 0 : index
    %c0_257 = arith.constant 0 : index
    %552 = vector.load %arg10[%c0_255, %c0_256, %c0_257] : memref<2x8x128xf32, #tpu.memory_space<vmem>>, vector<1x8x128xf32>
    %553 = vector.shape_cast %552 : vector<1x8x128xf32> to vector<8x128xf32>
    %554 = vector.shape_cast %551 : vector<8x128xf32> to vector<1x8x128xf32>
    tpu.vector_store %arg10[%c0_255, %c0_256, %c0_257], %554 {strides = array<i32>} : memref<2x8x128xf32, #tpu.memory_space<vmem>>, vector<1x8x128xf32>,
    %c1_258 = arith.constant 1 : index
    %c0_259 = arith.constant 0 : index
    %c0_260 = arith.constant 0 : index
    %555 = vector.load %arg10[%c1_258, %c0_259, %c0_260] : memref<2x8x128xf32, #tpu.memory_space<vmem>>, vector<1x8x128xf32>
    %556 = vector.shape_cast %555 : vector<1x8x128xf32> to vector<8x128xf32>
    %c1_261 = arith.constant 1 : index
    %c0_262 = arith.constant 0 : index
    %c0_263 = arith.constant 0 : index
    %557 = vector.load %arg3[%c1_261, %c0_262, %c0_263] : memref<2x128x384xf32, #tpu.memory_space<vmem>>, vector<1x128x384xf32>
    %558 = vector.shape_cast %557 : vector<1x128x384xf32> to vector<128x384xf32>
    %cst_264 = arith.constant dense<0.000000e+00> : vector<8x384xf32>
    %559 = tpu.matmul %551, %558, %cst_264 {dimension_numbers = #tpu.dot_dimension_numbers<[1], [0], [0], [1], [0, 0, 1, 1], [], []>} : vector<8x128xf32>, vector<128x384xf32>, vector<8x384xf32> -> vector<8x384xf32>
    %c1_265 = arith.constant 1 : index
    %c0_266 = arith.constant 0 : index
    %c0_267 = arith.constant 0 : index
    %560 = vector.load %arg5[%c1_265, %c0_266, %c0_267] : memref<2x1x384xf32, #tpu.memory_space<vmem>>, vector<1x1x384xf32>
    %561 = vector.shape_cast %560 : vector<1x1x384xf32> to vector<1x384xf32>
    %562 = vector.broadcast %561 : vector<1x384xf32> to vector<8x384xf32>
    %563 = arith.addf %559, %562 : vector<8x384xf32>
    %c1_268 = arith.constant 1 : index
    %c0_269 = arith.constant 0 : index
    %c0_270 = arith.constant 0 : index
    %564 = vector.load %arg4[%c1_268, %c0_269, %c0_270] : memref<2x128x384xf32, #tpu.memory_space<vmem>>, vector<1x128x384xf32>
    %565 = vector.shape_cast %564 : vector<1x128x384xf32> to vector<128x384xf32>
    %cst_271 = arith.constant dense<0.000000e+00> : vector<8x384xf32>
    %566 = tpu.matmul %556, %565, %cst_271 {dimension_numbers = #tpu.dot_dimension_numbers<[1], [0], [0], [1], [0, 0, 1, 1], [], []>} : vector<8x128xf32>, vector<128x384xf32>, vector<8x384xf32> -> vector<8x384xf32>
    %c1_272 = arith.constant 1 : index
    %c0_273 = arith.constant 0 : index
    %c0_274 = arith.constant 0 : index
    %567 = vector.load %arg6[%c1_272, %c0_273, %c0_274] : memref<2x1x384xf32, #tpu.memory_space<vmem>>, vector<1x1x384xf32>
    %568 = vector.shape_cast %567 : vector<1x1x384xf32> to vector<1x384xf32>
    %569 = vector.broadcast %568 : vector<1x384xf32> to vector<8x384xf32>
    %570 = arith.addf %566, %569 : vector<8x384xf32>
    %571 = vector.extract_strided_slice %563 {offsets = [0, 0], sizes = [8, 128], strides = [1, 1]} : vector<8x384xf32> to vector<8x128xf32>
    %572 = vector.extract_strided_slice %570 {offsets = [0, 0], sizes = [8, 128], strides = [1, 1]} : vector<8x384xf32> to vector<8x128xf32>
    %573 = arith.addf %571, %572 : vector<8x128xf32>
    %574 = arith.negf %573 : vector<8x128xf32>
    %575 = math.exp %574 : vector<8x128xf32>
    %cst_275 = arith.constant 1.000000e+00 : f32
    %576 = vector.broadcast %cst_275 : f32 to vector<8x128xf32>
    %577 = arith.addf %576, %575 : vector<8x128xf32>
    %578 = arith.divf %576, %577 : vector<8x128xf32>
    %579 = vector.extract_strided_slice %563 {offsets = [0, 128], sizes = [8, 128], strides = [1, 1]} : vector<8x384xf32> to vector<8x128xf32>
    %580 = vector.extract_strided_slice %570 {offsets = [0, 128], sizes = [8, 128], strides = [1, 1]} : vector<8x384xf32> to vector<8x128xf32>
    %581 = arith.addf %579, %580 : vector<8x128xf32>
    %582 = arith.negf %581 : vector<8x128xf32>
    %583 = math.exp %582 : vector<8x128xf32>
    %cst_276 = arith.constant 1.000000e+00 : f32
    %584 = vector.broadcast %cst_276 : f32 to vector<8x128xf32>
    %585 = arith.addf %584, %583 : vector<8x128xf32>
    %586 = arith.divf %584, %585 : vector<8x128xf32>
    %587 = vector.extract_strided_slice %563 {offsets = [0, 256], sizes = [8, 128], strides = [1, 1]} : vector<8x384xf32> to vector<8x128xf32>
    %588 = vector.extract_strided_slice %570 {offsets = [0, 256], sizes = [8, 128], strides = [1, 1]} : vector<8x384xf32> to vector<8x128xf32>
    %589 = arith.mulf %578, %588 : vector<8x128xf32>
    %590 = arith.addf %587, %589 : vector<8x128xf32>
    %591 = math.tanh %590 : vector<8x128xf32>
    %cst_277 = arith.constant 1.000000e+00 : f32
    %592 = vector.broadcast %cst_277 : f32 to vector<8x128xf32>
    %593 = arith.subf %592, %586 : vector<8x128xf32>
    %594 = arith.mulf %593, %591 : vector<8x128xf32>
    %595 = arith.mulf %586, %556 : vector<8x128xf32>
    %596 = arith.addf %594, %595 : vector<8x128xf32>
    %c1_278 = arith.constant 1 : index
    %c0_279 = arith.constant 0 : index
    %c0_280 = arith.constant 0 : index
    %597 = vector.load %arg10[%c1_278, %c0_279, %c0_280] : memref<2x8x128xf32, #tpu.memory_space<vmem>>, vector<1x8x128xf32>
    %598 = vector.shape_cast %597 : vector<1x8x128xf32> to vector<8x128xf32>
    %599 = vector.shape_cast %596 : vector<8x128xf32> to vector<1x8x128xf32>
    tpu.vector_store %arg10[%c1_278, %c0_279, %c0_280], %599 {strides = array<i32>} : memref<2x8x128xf32, #tpu.memory_space<vmem>>, vector<1x8x128xf32>,
    %600 = vector.extract_strided_slice %11 {offsets = [56, 0], sizes = [8, 384], strides = [1, 1]} : vector<64x384xf32> to vector<8x384xf32>
    %c0_281 = arith.constant 0 : index
    %c0_282 = arith.constant 0 : index
    %c0_283 = arith.constant 0 : index
    %601 = vector.load %arg10[%c0_281, %c0_282, %c0_283] : memref<2x8x128xf32, #tpu.memory_space<vmem>>, vector<1x8x128xf32>
    %602 = vector.shape_cast %601 : vector<1x8x128xf32> to vector<8x128xf32>
    %c0_284 = arith.constant 0 : index
    %c0_285 = arith.constant 0 : index
    %c0_286 = arith.constant 0 : index
    %603 = vector.load %arg4[%c0_284, %c0_285, %c0_286] : memref<2x128x384xf32, #tpu.memory_space<vmem>>, vector<1x128x384xf32>
    %604 = vector.shape_cast %603 : vector<1x128x384xf32> to vector<128x384xf32>
    %cst_287 = arith.constant dense<0.000000e+00> : vector<8x384xf32>
    %605 = tpu.matmul %602, %604, %cst_287 {dimension_numbers = #tpu.dot_dimension_numbers<[1], [0], [0], [1], [0, 0, 1, 1], [], []>} : vector<8x128xf32>, vector<128x384xf32>, vector<8x384xf32> -> vector<8x384xf32>
    %c0_288 = arith.constant 0 : index
    %c0_289 = arith.constant 0 : index
    %c0_290 = arith.constant 0 : index
    %606 = vector.load %arg6[%c0_288, %c0_289, %c0_290] : memref<2x1x384xf32, #tpu.memory_space<vmem>>, vector<1x1x384xf32>
    %607 = vector.shape_cast %606 : vector<1x1x384xf32> to vector<1x384xf32>
    %608 = vector.broadcast %607 : vector<1x384xf32> to vector<8x384xf32>
    %609 = arith.addf %605, %608 : vector<8x384xf32>
    %610 = vector.extract_strided_slice %600 {offsets = [0, 0], sizes = [8, 128], strides = [1, 1]} : vector<8x384xf32> to vector<8x128xf32>
    %611 = vector.extract_strided_slice %609 {offsets = [0, 0], sizes = [8, 128], strides = [1, 1]} : vector<8x384xf32> to vector<8x128xf32>
    %612 = arith.addf %610, %611 : vector<8x128xf32>
    %613 = arith.negf %612 : vector<8x128xf32>
    %614 = math.exp %613 : vector<8x128xf32>
    %cst_291 = arith.constant 1.000000e+00 : f32
    %615 = vector.broadcast %cst_291 : f32 to vector<8x128xf32>
    %616 = arith.addf %615, %614 : vector<8x128xf32>
    %617 = arith.divf %615, %616 : vector<8x128xf32>
    %618 = vector.extract_strided_slice %600 {offsets = [0, 128], sizes = [8, 128], strides = [1, 1]} : vector<8x384xf32> to vector<8x128xf32>
    %619 = vector.extract_strided_slice %609 {offsets = [0, 128], sizes = [8, 128], strides = [1, 1]} : vector<8x384xf32> to vector<8x128xf32>
    %620 = arith.addf %618, %619 : vector<8x128xf32>
    %621 = arith.negf %620 : vector<8x128xf32>
    %622 = math.exp %621 : vector<8x128xf32>
    %cst_292 = arith.constant 1.000000e+00 : f32
    %623 = vector.broadcast %cst_292 : f32 to vector<8x128xf32>
    %624 = arith.addf %623, %622 : vector<8x128xf32>
    %625 = arith.divf %623, %624 : vector<8x128xf32>
    %626 = vector.extract_strided_slice %600 {offsets = [0, 256], sizes = [8, 128], strides = [1, 1]} : vector<8x384xf32> to vector<8x128xf32>
    %627 = vector.extract_strided_slice %609 {offsets = [0, 256], sizes = [8, 128], strides = [1, 1]} : vector<8x384xf32> to vector<8x128xf32>
    %628 = arith.mulf %617, %627 : vector<8x128xf32>
    %629 = arith.addf %626, %628 : vector<8x128xf32>
    %630 = math.tanh %629 : vector<8x128xf32>
    %cst_293 = arith.constant 1.000000e+00 : f32
    %631 = vector.broadcast %cst_293 : f32 to vector<8x128xf32>
    %632 = arith.subf %631, %625 : vector<8x128xf32>
    %633 = arith.mulf %632, %630 : vector<8x128xf32>
    %634 = arith.mulf %625, %602 : vector<8x128xf32>
    %635 = arith.addf %633, %634 : vector<8x128xf32>
    %c0_294 = arith.constant 0 : index
    %c0_295 = arith.constant 0 : index
    %c0_296 = arith.constant 0 : index
    %636 = vector.load %arg10[%c0_294, %c0_295, %c0_296] : memref<2x8x128xf32, #tpu.memory_space<vmem>>, vector<1x8x128xf32>
    %637 = vector.shape_cast %636 : vector<1x8x128xf32> to vector<8x128xf32>
    %638 = vector.shape_cast %635 : vector<8x128xf32> to vector<1x8x128xf32>
    tpu.vector_store %arg10[%c0_294, %c0_295, %c0_296], %638 {strides = array<i32>} : memref<2x8x128xf32, #tpu.memory_space<vmem>>, vector<1x8x128xf32>,
    %c1_297 = arith.constant 1 : index
    %c0_298 = arith.constant 0 : index
    %c0_299 = arith.constant 0 : index
    %639 = vector.load %arg10[%c1_297, %c0_298, %c0_299] : memref<2x8x128xf32, #tpu.memory_space<vmem>>, vector<1x8x128xf32>
    %640 = vector.shape_cast %639 : vector<1x8x128xf32> to vector<8x128xf32>
    %c1_300 = arith.constant 1 : index
    %c0_301 = arith.constant 0 : index
    %c0_302 = arith.constant 0 : index
    %641 = vector.load %arg3[%c1_300, %c0_301, %c0_302] : memref<2x128x384xf32, #tpu.memory_space<vmem>>, vector<1x128x384xf32>
    %642 = vector.shape_cast %641 : vector<1x128x384xf32> to vector<128x384xf32>
    %cst_303 = arith.constant dense<0.000000e+00> : vector<8x384xf32>
    %643 = tpu.matmul %635, %642, %cst_303 {dimension_numbers = #tpu.dot_dimension_numbers<[1], [0], [0], [1], [0, 0, 1, 1], [], []>} : vector<8x128xf32>, vector<128x384xf32>, vector<8x384xf32> -> vector<8x384xf32>
    %c1_304 = arith.constant 1 : index
    %c0_305 = arith.constant 0 : index
    %c0_306 = arith.constant 0 : index
    %644 = vector.load %arg5[%c1_304, %c0_305, %c0_306] : memref<2x1x384xf32, #tpu.memory_space<vmem>>, vector<1x1x384xf32>
    %645 = vector.shape_cast %644 : vector<1x1x384xf32> to vector<1x384xf32>
    %646 = vector.broadcast %645 : vector<1x384xf32> to vector<8x384xf32>
    %647 = arith.addf %643, %646 : vector<8x384xf32>
    %c1_307 = arith.constant 1 : index
    %c0_308 = arith.constant 0 : index
    %c0_309 = arith.constant 0 : index
    %648 = vector.load %arg4[%c1_307, %c0_308, %c0_309] : memref<2x128x384xf32, #tpu.memory_space<vmem>>, vector<1x128x384xf32>
    %649 = vector.shape_cast %648 : vector<1x128x384xf32> to vector<128x384xf32>
    %cst_310 = arith.constant dense<0.000000e+00> : vector<8x384xf32>
    %650 = tpu.matmul %640, %649, %cst_310 {dimension_numbers = #tpu.dot_dimension_numbers<[1], [0], [0], [1], [0, 0, 1, 1], [], []>} : vector<8x128xf32>, vector<128x384xf32>, vector<8x384xf32> -> vector<8x384xf32>
    %c1_311 = arith.constant 1 : index
    %c0_312 = arith.constant 0 : index
    %c0_313 = arith.constant 0 : index
    %651 = vector.load %arg6[%c1_311, %c0_312, %c0_313] : memref<2x1x384xf32, #tpu.memory_space<vmem>>, vector<1x1x384xf32>
    %652 = vector.shape_cast %651 : vector<1x1x384xf32> to vector<1x384xf32>
    %653 = vector.broadcast %652 : vector<1x384xf32> to vector<8x384xf32>
    %654 = arith.addf %650, %653 : vector<8x384xf32>
    %655 = vector.extract_strided_slice %647 {offsets = [0, 0], sizes = [8, 128], strides = [1, 1]} : vector<8x384xf32> to vector<8x128xf32>
    %656 = vector.extract_strided_slice %654 {offsets = [0, 0], sizes = [8, 128], strides = [1, 1]} : vector<8x384xf32> to vector<8x128xf32>
    %657 = arith.addf %655, %656 : vector<8x128xf32>
    %658 = arith.negf %657 : vector<8x128xf32>
    %659 = math.exp %658 : vector<8x128xf32>
    %cst_314 = arith.constant 1.000000e+00 : f32
    %660 = vector.broadcast %cst_314 : f32 to vector<8x128xf32>
    %661 = arith.addf %660, %659 : vector<8x128xf32>
    %662 = arith.divf %660, %661 : vector<8x128xf32>
    %663 = vector.extract_strided_slice %647 {offsets = [0, 128], sizes = [8, 128], strides = [1, 1]} : vector<8x384xf32> to vector<8x128xf32>
    %664 = vector.extract_strided_slice %654 {offsets = [0, 128], sizes = [8, 128], strides = [1, 1]} : vector<8x384xf32> to vector<8x128xf32>
    %665 = arith.addf %663, %664 : vector<8x128xf32>
    %666 = arith.negf %665 : vector<8x128xf32>
    %667 = math.exp %666 : vector<8x128xf32>
    %cst_315 = arith.constant 1.000000e+00 : f32
    %668 = vector.broadcast %cst_315 : f32 to vector<8x128xf32>
    %669 = arith.addf %668, %667 : vector<8x128xf32>
    %670 = arith.divf %668, %669 : vector<8x128xf32>
    %671 = vector.extract_strided_slice %647 {offsets = [0, 256], sizes = [8, 128], strides = [1, 1]} : vector<8x384xf32> to vector<8x128xf32>
    %672 = vector.extract_strided_slice %654 {offsets = [0, 256], sizes = [8, 128], strides = [1, 1]} : vector<8x384xf32> to vector<8x128xf32>
    %673 = arith.mulf %662, %672 : vector<8x128xf32>
    %674 = arith.addf %671, %673 : vector<8x128xf32>
    %675 = math.tanh %674 : vector<8x128xf32>
    %cst_316 = arith.constant 1.000000e+00 : f32
    %676 = vector.broadcast %cst_316 : f32 to vector<8x128xf32>
    %677 = arith.subf %676, %670 : vector<8x128xf32>
    %678 = arith.mulf %677, %675 : vector<8x128xf32>
    %679 = arith.mulf %670, %640 : vector<8x128xf32>
    %680 = arith.addf %678, %679 : vector<8x128xf32>
    %c1_317 = arith.constant 1 : index
    %c0_318 = arith.constant 0 : index
    %c0_319 = arith.constant 0 : index
    %681 = vector.load %arg10[%c1_317, %c0_318, %c0_319] : memref<2x8x128xf32, #tpu.memory_space<vmem>>, vector<1x8x128xf32>
    %682 = vector.shape_cast %681 : vector<1x8x128xf32> to vector<8x128xf32>
    %683 = vector.shape_cast %680 : vector<8x128xf32> to vector<1x8x128xf32>
    tpu.vector_store %arg10[%c1_317, %c0_318, %c0_319], %683 {strides = array<i32>} : memref<2x8x128xf32, #tpu.memory_space<vmem>>, vector<1x8x128xf32>,
    %684 = tpu.concatenate %92, %176, %260, %344, %428, %512, %596, %680 in 0 : vector<8x128xf32>, vector<8x128xf32>, vector<8x128xf32>, vector<8x128xf32>, vector<8x128xf32>, vector<8x128xf32>, vector<8x128xf32>, vector<8x128xf32> -> vector<64x128xf32>
    %c0_320 = arith.constant 0 : index
    %c0_321 = arith.constant 0 : index
    %685 = vector.load %arg7[%c0_320, %c0_321] : memref<128x128xf32, #tpu.memory_space<vmem>>, vector<128x128xf32>
    %cst_322 = arith.constant dense<0.000000e+00> : vector<64x128xf32>
    %686 = tpu.matmul %684, %685, %cst_322 {dimension_numbers = #tpu.dot_dimension_numbers<[1], [0], [0], [1], [0, 0, 1, 1], [], []>} : vector<64x128xf32>, vector<128x128xf32>, vector<64x128xf32> -> vector<64x128xf32>
    %c0_323 = arith.constant 0 : index
    %c0_324 = arith.constant 0 : index
    %687 = vector.load %arg8[%c0_323, %c0_324] : memref<1x128xf32, #tpu.memory_space<vmem>>, vector<1x128xf32>
    %688 = vector.broadcast %687 : vector<1x128xf32> to vector<64x128xf32>
    %689 = arith.addf %686, %688 : vector<64x128xf32>
    %690 = vector.shape_cast %689 : vector<64x128xf32> to vector<8x8x128xf32>
    %c0_325 = arith.constant 0 : index
    %c0_326 = arith.constant 0 : index
    %c0_327 = arith.constant 0 : index
    %691 = vector.load %arg9[%c0_325, %c0_326, %c0_327] : memref<8x8x128xf32, #tpu.memory_space<vmem>>, vector<8x8x128xf32>
    tpu.vector_store %arg9[%c0_325, %c0_326, %c0_327], %690 {strides = array<i32>} : memref<8x8x128xf32, #tpu.memory_space<vmem>>, vector<8x8x128xf32>,
    return
  }
  func.func @transform_0(%arg0: i32, %arg1: i32) -> (i32, i32, i32) {
    %c0_i32 = arith.constant 0 : i32
    %c0_i32_0 = arith.constant 0 : i32
    return %arg1, %arg0, %c0_i32 : i32, i32, i32
  }
  func.func @transform_1(%arg0: i32, %arg1: i32) -> (i32, i32, i32) {
    %c0_i32 = arith.constant 0 : i32
    %c0_i32_0 = arith.constant 0 : i32
    %c0_i32_1 = arith.constant 0 : i32
    %c0_i32_2 = arith.constant 0 : i32
    return %c0_i32, %c0_i32_0, %c0_i32_1 : i32, i32, i32
  }
  func.func @transform_2(%arg0: i32, %arg1: i32) -> (i32, i32, i32) {
    %c0_i32 = arith.constant 0 : i32
    %c0_i32_0 = arith.constant 0 : i32
    %c0_i32_1 = arith.constant 0 : i32
    %c0_i32_2 = arith.constant 0 : i32
    return %c0_i32, %c0_i32_0, %c0_i32_1 : i32, i32, i32
  }
  func.func @transform_3(%arg0: i32, %arg1: i32) -> (i32, i32, i32) {
    %c0_i32 = arith.constant 0 : i32
    %c0_i32_0 = arith.constant 0 : i32
    %c0_i32_1 = arith.constant 0 : i32
    %c0_i32_2 = arith.constant 0 : i32
    return %c0_i32, %c0_i32_0, %c0_i32_1 : i32, i32, i32
  }
  func.func @transform_4(%arg0: i32, %arg1: i32) -> (i32, i32, i32) {
    %c0_i32 = arith.constant 0 : i32
    %c0_i32_0 = arith.constant 0 : i32
    %c0_i32_1 = arith.constant 0 : i32
    %c0_i32_2 = arith.constant 0 : i32
    return %c0_i32, %c0_i32_0, %c0_i32_1 : i32, i32, i32
  }
  func.func @transform_5(%arg0: i32, %arg1: i32) -> (i32, i32) {
    %c0_i32 = arith.constant 0 : i32
    %c0_i32_0 = arith.constant 0 : i32
    %c0_i32_1 = arith.constant 0 : i32
    return %c0_i32, %c0_i32_0 : i32, i32
  }
  func.func @transform_6(%arg0: i32, %arg1: i32) -> (i32, i32) {
    %c0_i32 = arith.constant 0 : i32
    %c0_i32_0 = arith.constant 0 : i32
    %c0_i32_1 = arith.constant 0 : i32
    return %c0_i32, %c0_i32_0 : i32, i32
  }
  func.func @transform_7(%arg0: i32, %arg1: i32) -> (i32, i32, i32) {
    %c0_i32 = arith.constant 0 : i32
    %c0_i32_0 = arith.constant 0 : i32
    return %arg1, %arg0, %c0_i32 : i32, i32, i32
  }
}

</mosaic_0001>

<bundles_post_ra>
// kernel: tpu_custom_call.1
= control target key start
LH: loop header
LB: loop body
LE: loop exit
PB: predicated region body
PF: predicated region fallthrough
CT: control target
= control target key end

     0   :  { %12 = vsyncpa [#allocation4], 0  ;;  %s10934_s0 = inlined_call_operand.hbm [shape: f32[8,8,128], index: 0, kind: input, shape index: {}]   ;;  %s10935_s1 = inlined_call_operand.hbm [shape: f32[2,128,384], index: 1, kind: input, shape index: {}]   ;;  %s10936_s2 = inlined_call_operand.hbm [shape: f32[2,128,384], index: 2, kind: input, shape index: {}]   ;;  %s10937_s3 = inlined_call_operand.vmem [shape: f32[2,1,384], index: 3, kind: input, shape index: {}]   ;;  %s10938_s4 = inlined_call_operand.vmem [shape: f32[2,1,384], index: 4, kind: input, shape index: {}]   ;;  %s10939_s5 = inlined_call_operand.hbm [shape: f32[128,128], index: 5, kind: input, shape index: {}]   ;;  %s10940_s6 = inlined_call_operand.vmem [shape: f32[1,128], index: 6, kind: input, shape index: {}]   ;;  %s10941_s7 = inlined_call_operand.hbm [shape: f32[8,8,128], index: 7, kind: output, shape index: {}]  }
   0x1   :  { %13 = vsyncpa [#allocation7], 0 }
   0x2   :  { %14 = vsyncpa [#allocation10], 0 }
   0x3   :  { %15 = vsyncpa [#allocation5], 0  ;;  %s9110_s24 = smov [#allocation6]   ;;  %s8992_s28 = scalar_lea.hbm %s10935_s1, 12288 }
   0x4   :  { %s33_s25 = sshll.u32 %s9110_s24, 4  ;;  %p8993_p0 = scmp.ne.s32.totalorder %s10935_s1, %s8992_s28  ;;  %s34_s25 = int_to_ptr.vmem [resolvable:$true] %s33_s25 }
   0x5   :  { %p8996_p1 = scmp.lt.u32.totalorder %s8992_s28, %s10935_s1 }
   0x7   :  { %p8998_p2 = pnand %p8996_p1, %p8993_p0 }
   0x9   :  { %9001 = shalt.err (!%p8998_p2)
}
   0xa   :  { %s9002_s10 = scalar_lea.vmem %s34_s25, 12288  ;;  %p9007_p4 = scmp.lt.s32.totalorder %s34_s25, %s34_s25 }
   0xb   :  { %p9003_p3 = scmp.ne.s32.totalorder %s34_s25, %s9002_s10  ;;  %p9008_p5 = scmp.lt.s32.totalorder %s9002_s10, %s9002_s10 }
   0xd   :  { %p9009_p6 = por %p9008_p5, %p9007_p4 }
   0xf   :  { %p9010_p7 = pnand %p9009_p6, %p9003_p3 }
  0x11   :  { %9013 = shalt.err (!%p9010_p7)
}
  0x12   :  { %s9111_s11 = smov 384   ;;  %s9112_s12 = smov 24  }
  0x13   :  { %39 = dma.hbm_to_vmem [thread:$0]  %s10935_s1, 12288, %s34_s25, [#allocation7], %s9111_s11, %s9111_s11, %s9112_s12  }
  0x14   :  { %s9113_s15 = smov [#allocation3]   ;;  %s9014_s19 = scalar_lea.hbm %s10934_s0, 1024 }
  0x15   :  { %s21_s16 = sshll.u32 %s9113_s15, 4  ;;  %p9015_p8 = scmp.ne.s32.totalorder %s10934_s0, %s9014_s19  ;;  %s22_s16 = int_to_ptr.vmem [resolvable:$true] %s21_s16 }
  0x16   :  { %p9018_p9 = scmp.lt.u32.totalorder %s9014_s19, %s10934_s0 }
  0x18   :  { %p9020_p10 = pnand %p9018_p9, %p9015_p8 }
  0x1a   :  { %9023 = shalt.err (!%p9020_p10)
}
  0x1b   :  { %s9024_s24 = scalar_lea.vmem %s22_s16, 1024  ;;  %p9029_p12 = scmp.lt.s32.totalorder %s22_s16, %s22_s16 }
  0x1c   :  { %p9025_p11 = scmp.ne.s32.totalorder %s22_s16, %s9024_s24  ;;  %p9030_p13 = scmp.lt.s32.totalorder %s9024_s24, %s9024_s24 }
  0x1e   :  { %p9031_p0 = por %p9030_p13, %p9029_p12 }
  0x20   :  { %p9032_p1 = pnand %p9031_p0, %p9025_p11 }
  0x22   :  { %9035 = shalt.err (!%p9032_p1)
}
  0x23   :  { %s9114_s1 = smov 128   ;;  %s9115_s25 = smov 8  }
  0x24   :  { %27 = dma.hbm_to_vmem [thread:$0]  %s10934_s0, 1024, %s22_s16, [#allocation4], %s9114_s1, %s9114_s1, %s9115_s25  }
  0x25   :  { %s9116_s28 = smov [#allocation8]   ;;  %s9117_s30 = smov [#allocation9]  }
  0x26   :  { %s45_s29 = sshll.u32 %s9116_s28, 4  ;;  %s61_s8 = sshll.u32 %s9117_s30, 4  ;;  %s46_s29 = int_to_ptr.vmem [resolvable:$true] %s45_s29  ;;  %s9192_s8 = int_to_ptr.vmem [resolvable:$true] %s61_s8 }
  0x27   :  { %s9036_s13 = scalar_lea.hbm %s10936_s2, 12288 }
  0x28   :  { %p9037_p2 = scmp.ne.s32.totalorder %s10936_s2, %s9036_s13  ;;  %p9040_p3 = scmp.lt.u32.totalorder %s9036_s13, %s10936_s2 }
  0x2a   :  { %p9042_p4 = pnand %p9040_p3, %p9037_p2 }
  0x2c   :  { %9045 = shalt.err (!%p9042_p4)
}
  0x2d   :  { %s9046_s0 = scalar_lea.vmem %s46_s29, 12288  ;;  %p9051_p6 = scmp.lt.s32.totalorder %s46_s29, %s46_s29 }
  0x2e   :  { %p9047_p5 = scmp.ne.s32.totalorder %s46_s29, %s9046_s0  ;;  %p9052_p7 = scmp.lt.s32.totalorder %s9046_s0, %s9046_s0 }
  0x30   :  { %p9053_p8 = por %p9052_p7, %p9051_p6 }
  0x32   :  { %p9054_p9 = pnand %p9053_p8, %p9047_p5 }
  0x34   :  { %9057 = shalt.err (!%p9054_p9)
}
  0x35   :  { %51 = dma.hbm_to_vmem [thread:$0]  %s10936_s2, 12288, %s46_s29, [#allocation7], %s9111_s11, %s9111_s11, %s9112_s12  }
  0x36   :  { %s9058_s22 = scalar_lea.hbm %s10939_s5, 2048 }
  0x37   :  { %p9059_p10 = scmp.ne.s32.totalorder %s10939_s5, %s9058_s22  ;;  %p9062_p11 = scmp.lt.u32.totalorder %s9058_s22, %s10939_s5 }
  0x39   :  { %p9064_p12 = pnand %p9062_p11, %p9059_p10 }
  0x3b   :  { %9067 = shalt.err (!%p9064_p12)
}
  0x3c   :  { %s9068_s28 = scalar_lea.vmem %s9192_s8, 2048  ;;  %p9073_p0 = scmp.lt.s32.totalorder %s9192_s8, %s9192_s8 }
  0x3d   :  { %p9069_p13 = scmp.ne.s32.totalorder %s9192_s8, %s9068_s28  ;;  %p9074_p1 = scmp.lt.s32.totalorder %s9068_s28, %s9068_s28 }
  0x3f   :  { %p9075_p2 = por %p9074_p1, %p9073_p0 }
  0x41   :  { %p9076_p3 = pnand %p9075_p2, %p9069_p13 }
  0x43   :  { %9079 = shalt.err (!%p9076_p3)
}
  0x44   :  { %67 = dma.hbm_to_vmem [thread:$0]  %s10939_s5, 2048, %s9192_s8, [#allocation10], %s9114_s1, %s9114_s1, %s9115_s25  }
  0x45   :  { %9102 = dma.done.wait [#allocation4], 1024  }
  0x46   :  { %9103 = vsyncadd [#allocation4], 4294966272 }
  0x47   :  { %9104 = dma.done.wait [#allocation7], 24576  }
  0x48   :  { %9105 = vsyncadd [#allocation7], 4294942720 }
  0x49   :  { %9106 = dma.done.wait [#allocation10], 2048  }
  0x4a   :  { %9107 = vsyncadd [#allocation10], 4294965248  ;;  %v10942_v0 = vmov 0.0   ;;  %v97_v1 = vld [vmem:[#allocation6 + $0x8] sm:$0xff]  ;;  %v100_v2 = vld [vmem:[#allocation6 + $0x20] sm:$0xff]  ;;  %vm9120_vm0 = vmmov 0  }
  0x4b   :  { %225 = vmatprep.mubr.f32.mxu1 %v10942_v0  ;;  %509 = vmatprep.mubr.f32.mxu0 %v10942_v0  ;;  %v96_v3 = vld [vmem:[#allocation6] sm:$0xff]  ;;  %v7284_v4 = vpack.c.bf16 %v100_v2, %v97_v1  ;;  %v99_v5 = vld [vmem:[#allocation6 + $0x18] sm:$0xff]  ;;  %v106_v7 = vld [vmem:[#allocation6 + $0x50] sm:$0xff] }
  0x4c   :  { %v103_v6 = vld [vmem:[#allocation6 + $0x38] sm:$0xff]  ;;  %v7286_v8 = vpack.c.bf16 %v99_v5, %v96_v3  ;;  %v381_v10 = vld [vmem:[#allocation8 + $0x8] sm:$0xff]  ;;  %v384_v11 = vld [vmem:[#allocation8 + $0x20] sm:$0xff] }
  0x4d   :  { %v7288_v9 = vpack.c.bf16 %v106_v7, %v103_v6  ;;  %v102_v12 = vld [vmem:[#allocation6 + $0x30] sm:$0xff]  ;;  %7285 = vmatprep.subr.bf16.mxu1 %v7284_v4  ;;  %v7348_v13 = vpack.c.bf16 %v384_v11, %v381_v10  ;;  %v105_v14 = vld [vmem:[#allocation6 + $0x48] sm:$0xff]  ;;  %v380_v15 = vld [vmem:[#allocation8] sm:$0xff] }
  0x4e   :  { %v383_v16 = vld [vmem:[#allocation8 + $0x18] sm:$0xff]  ;;  %7287 = vmatpush1.bf16.msra.mxu1 %v7286_v8  ;;  %v7290_v17 = vpack.c.bf16 %v105_v14, %v102_v12  ;;  %v109_v19 = vld [vmem:[#allocation6 + $0x68] sm:$0xff]  ;;  %v112_v20 = vld [vmem:[#allocation6 + $0x80] sm:$0xff] }
  0x4f   :  { %v7350_v18 = vpack.c.bf16 %v383_v16, %v380_v15  ;;  %v387_v21 = vld [vmem:[#allocation8 + $0x38] sm:$0xff]  ;;  %7289 = vmatprep.subr.bf16.mxu1 %v7288_v9  ;;  %7349 = vmatprep.subr.bf16.mxu0 %v7348_v13  ;;  %v7292_v22 = vpack.c.bf16 %v112_v20, %v109_v19  ;;  %v390_v23 = vld [vmem:[#allocation8 + $0x50] sm:$0xff]  ;;  %v108_v24 = vld [vmem:[#allocation6 + $0x60] sm:$0xff] }
  0x50   :  { %v111_v25 = vld [vmem:[#allocation6 + $0x78] sm:$0xff]  ;;  %v7352_v26 = vpack.c.bf16 %v390_v23, %v387_v21  ;;  %v386_v27 = vld [vmem:[#allocation8 + $0x30] sm:$0xff]  ;;  %v389_v28 = vld [vmem:[#allocation8 + $0x48] sm:$0xff] }
  0x51   :  { %7351 = vmatpush1.bf16.msra.mxu0 %v7350_v18  ;;  %v115_v29 = vld [vmem:[#allocation6 + $0x98] sm:$0xff]  ;;  %v7354_v30 = vpack.c.bf16 %v389_v28, %v386_v27  ;;  %v118_v31 = vld [vmem:[#allocation6 + $0xb0] sm:$0xff]  ;;  %v393_v32 = vld [vmem:[#allocation8 + $0x68] sm:$0xff]  ;;  %v7294_v34 = vpack.c.bf16 %v111_v25, %v108_v24 }
  0x52   :  { %v396_v33 = vld [vmem:[#allocation8 + $0x80] sm:$0xff]  ;;  %7291 = vmatpush1.bf16.msra.mxu1 %v7290_v17  ;;  %7353 = vmatprep.subr.bf16.mxu0 %v7352_v26  ;;  %v114_v36 = vld [vmem:[#allocation6 + $0x90] sm:$0xff]  ;;  %v7296_v38 = vpack.c.bf16 %v118_v31, %v115_v29  ;;  %v117_v39 = vld [vmem:[#allocation6 + $0xa8] sm:$0xff] }
  0x53   :  { %v7356_v35 = vpack.c.bf16 %v396_v33, %v393_v32  ;;  %v392_v37 = vld [vmem:[#allocation8 + $0x60] sm:$0xff]  ;;  %7293 = vmatprep.subr.bf16.mxu1 %v7292_v22  ;;  %v395_v40 = vld [vmem:[#allocation8 + $0x78] sm:$0xff]  ;;  %v121_v41 = vld [vmem:[#allocation6 + $0xc8] sm:$0xff]  ;;  %v7298_v49 = vpack.c.bf16 %v117_v39, %v114_v36 }
  0x54   :  { %v7358_v42 = vpack.c.bf16 %v395_v40, %v392_v37  ;;  %v124_v43 = vld [vmem:[#allocation6 + $0xe0] sm:$0xff]  ;;  %v399_v44 = vld [vmem:[#allocation8 + $0x98] sm:$0xff]  ;;  %v402_v45 = vld [vmem:[#allocation8 + $0xb0] sm:$0xff] }
  0x55   :  { %7355 = vmatpush1.bf16.msra.mxu0 %v7354_v30  ;;  %v7360_v46 = vpack.c.bf16 %v402_v45, %v399_v44  ;;  %v398_v47 = vld [vmem:[#allocation8 + $0x90] sm:$0xff]  ;;  %v401_v48 = vld [vmem:[#allocation8 + $0xa8] sm:$0xff]  ;;  %v7300_v51 = vpack.c.bf16 %v124_v43, %v121_v41  ;;  %v120_v52 = vld [vmem:[#allocation6 + $0xc0] sm:$0xff] }
  0x56   :  { %7357 = vmatprep.subr.bf16.mxu0 %v7356_v35  ;;  %7295 = vmatpush1.bf16.msra.mxu1 %v7294_v34  ;;  %v405_v50 = vld [vmem:[#allocation8 + $0xc8] sm:$0xff]  ;;  %v123_v53 = vld [vmem:[#allocation6 + $0xd8] sm:$0xff]  ;;  %v408_v54 = vld [vmem:[#allocation8 + $0xe0] sm:$0xff]  ;;  %v7362_v55 = vpack.c.bf16 %v401_v48, %v398_v47 }
  0x57   :  { %7297 = vmatprep.subr.bf16.mxu1 %v7296_v38  ;;  %v127_v56 = vld [vmem:[#allocation6 + $0xf8] sm:$0xff]  ;;  %v130_v57 = vld [vmem:[#allocation6 + $0x110] sm:$0xff]  ;;  %v7364_v58 = vpack.c.bf16 %v408_v54, %v405_v50  ;;  %v404_v59 = vld [vmem:[#allocation8 + $0xc0] sm:$0xff]  ;;  %v7302_v61 = vpack.c.bf16 %v123_v53, %v120_v52 }
  0x58   :  { %v407_v60 = vld [vmem:[#allocation8 + $0xd8] sm:$0xff]  ;;  %v414_v63 = vld [vmem:[#allocation8 + $0x110] sm:$0xff]  ;;  %v7304_v1 = vpack.c.bf16 %v130_v57, %v127_v56  ;;  %v129_v3 = vld [vmem:[#allocation6 + $0x108] sm:$0xff] }
  0x59   :  { %7359 = vmatpush1.bf16.msra.mxu0 %v7358_v42  ;;  %v411_v62 = vld [vmem:[#allocation8 + $0xf8] sm:$0xff]  ;;  %v126_v2 = vld [vmem:[#allocation6 + $0xf0] sm:$0xff]  ;;  %v7366_v4 = vpack.c.bf16 %v407_v60, %v404_v59  ;;  %v133_v5 = vld [vmem:[#allocation6 + $0x128] sm:$0xff] }
  0x5a   :  { %7361 = vmatprep.subr.bf16.mxu0 %v7360_v46  ;;  %7299 = vmatpush1.bf16.msra.mxu1 %v7298_v49  ;;  %v136_v6 = vld [vmem:[#allocation6 + $0x140] sm:$0xff]  ;;  %v7368_v7 = vpack.c.bf16 %v414_v63, %v411_v62  ;;  %v410_v8 = vld [vmem:[#allocation8 + $0xf0] sm:$0xff]  ;;  %v413_v9 = vld [vmem:[#allocation8 + $0x108] sm:$0xff]  ;;  %v7306_v10 = vpack.c.bf16 %v129_v3, %v126_v2 }
  0x5b   :  { %7301 = vmatprep.subr.bf16.mxu1 %v7300_v51  ;;  %v417_v11 = vld [vmem:[#allocation8 + $0x128] sm:$0xff]  ;;  %v420_v12 = vld [vmem:[#allocation8 + $0x140] sm:$0xff]  ;;  %v7308_v13 = vpack.c.bf16 %v136_v6, %v133_v5  ;;  %v135_v15 = vld [vmem:[#allocation6 + $0x138] sm:$0xff]  ;;  %v7370_v16 = vpack.c.bf16 %v413_v9, %v410_v8  ;;  %v10944_v6 = vmov 0.0|0.0  }
  0x5c   :  { %v132_v14 = vld [vmem:[#allocation6 + $0x120] sm:$0xff]  ;;  %v139_v17 = vld [vmem:[#allocation6 + $0x158] sm:$0xff]  ;;  %v142_v18 = vld [vmem:[#allocation6 + $0x170] sm:$0xff]  ;;  %v7372_v19 = vpack.c.bf16 %v420_v12, %v417_v11 }
  0x5d   :  { %7363 = vmatpush1.bf16.msra.mxu0 %v7362_v55  ;;  %v416_v20 = vld [vmem:[#allocation8 + $0x120] sm:$0xff]  ;;  %v419_v21 = vld [vmem:[#allocation8 + $0x138] sm:$0xff]  ;;  %v7310_v22 = vpack.c.bf16 %v135_v15, %v132_v14  ;;  %v426_v24 = vld [vmem:[#allocation8 + $0x170] sm:$0xff]  ;;  %v7312_v25 = vpack.c.bf16 %v142_v18, %v139_v17 }
  0x5e   :  { %7365 = vmatprep.subr.bf16.mxu0 %v7364_v58  ;;  %7303 = vmatpush1.bf16.msra.mxu1 %v7302_v61  ;;  %v423_v23 = vld [vmem:[#allocation8 + $0x158] sm:$0xff]  ;;  %v138_v26 = vld [vmem:[#allocation6 + $0x150] sm:$0xff]  ;;  %v141_v27 = vld [vmem:[#allocation6 + $0x168] sm:$0xff]  ;;  %v7374_v28 = vpack.c.bf16 %v419_v21, %v416_v20 }
  0x5f   :  { %7305 = vmatprep.subr.bf16.mxu1 %v7304_v1  ;;  %v98_v29 = vld [vmem:[#allocation6 + $0x10] sm:$0xff]  ;;  %v101_v30 = vld [vmem:[#allocation6 + $0x28] sm:$0xff]  ;;  %v9231_v31 = vpack.c.bf16 %v426_v24, %v423_v23  ;;  %v7314_v34 = vpack.c.bf16 %v141_v27, %v138_v26  ;;  %v104_v37 = vld [vmem:[#allocation6 + $0x40] sm:$0xff] }
  0x60   :  { %v422_v32 = vld [vmem:[#allocation8 + $0x150] sm:$0xff]  ;;  %v425_v33 = vld [vmem:[#allocation8 + $0x168] sm:$0xff]  ;;  %v7316_v35 = vpack.c.bf16 %v101_v30, %v98_v29  ;;  %v107_v38 = vld [vmem:[#allocation6 + $0x58] sm:$0xff] }
  0x61   :  { %7367 = vmatpush1.bf16.msra.mxu0 %v7366_v4  ;;  %v9233_v36 = vpack.c.bf16 %v425_v33, %v422_v32  ;;  %v88_v39 = vld [vmem:[#allocation3] sm:$0xff]  ;;  %v7320_v40 = vpack.c.bf16 %v107_v38, %v104_v37  ;;  %v110_v41 = vld [vmem:[#allocation6 + $0x70] sm:$0xff]  ;;  %v113_v42 = vld [vmem:[#allocation6 + $0x88] sm:$0xff] }
  0x62   :  { %7369 = vmatprep.subr.bf16.mxu0 %v7368_v7  ;;  %7307 = vmatpush1.bf16.msra.mxu1 %v7306_v10  ;;  %v89_v43 = vld [vmem:[#allocation3 + $0x8] sm:$0xff]  ;;  %v7324_v44 = vpack.c.bf16 %v113_v42, %v110_v41  ;;  %v116_v45 = vld [vmem:[#allocation6 + $0xa0] sm:$0xff]  ;;  %v119_v46 = vld [vmem:[#allocation6 + $0xb8] sm:$0xff] }
  0x63   :  { %7309 = vmatprep.subr.bf16.mxu1 %v7308_v13  ;;  %v90_v47 = vld [vmem:[#allocation3 + $0x10] sm:$0xff]  ;;  %v7328_v48 = vpack.c.bf16 %v119_v46, %v116_v45  ;;  %v125_v50 = vld [vmem:[#allocation6 + $0xe8] sm:$0xff]  ;;  %v91_v51 = vld [vmem:[#allocation3 + $0x18] sm:$0xff] }
  0x64   :  { %v122_v49 = vld [vmem:[#allocation6 + $0xd0] sm:$0xff]  ;;  %v128_v53 = vld [vmem:[#allocation6 + $0x100] sm:$0xff]  ;;  %v131_v54 = vld [vmem:[#allocation6 + $0x118] sm:$0xff] }
  0x65   :  { %7371 = vmatpush1.bf16.msra.mxu0 %v7370_v16  ;;  %v7332_v52 = vpack.c.bf16 %v125_v50, %v122_v49  ;;  %v92_v55 = vld [vmem:[#allocation3 + $0x20] sm:$0xff]  ;;  %v7336_v56 = vpack.c.bf16 %v131_v54, %v128_v53  ;;  %v134_v57 = vld [vmem:[#allocation6 + $0x130] sm:$0xff]  ;;  %v137_v58 = vld [vmem:[#allocation6 + $0x148] sm:$0xff] }
  0x66   :  { %7373 = vmatprep.subr.bf16.mxu0 %v7372_v19  ;;  %7311 = vmatpush1.bf16.msra.mxu1 %v7310_v22  ;;  %v93_v59 = vld [vmem:[#allocation3 + $0x28] sm:$0xff]  ;;  %v7340_v60 = vpack.c.bf16 %v137_v58, %v134_v57  ;;  %v140_v61 = vld [vmem:[#allocation6 + $0x160] sm:$0xff]  ;;  %v143_v62 = vld [vmem:[#allocation6 + $0x178] sm:$0xff] }
  0x67   :  { %7313 = vmatprep.subr.bf16.mxu1 %v7312_v25  ;;  %v94_v63 = vld [vmem:[#allocation3 + $0x30] sm:$0xff]  ;;  %v7344_v1 = vpack.c.bf16 %v143_v62, %v140_v61  ;;  %v95_v2 = vld [vmem:[#allocation3 + $0x38] sm:$0xff]  ;;  %v385_v4 = vld [vmem:[#allocation8 + $0x28] sm:$0xff] }
  0x68   :  { %v382_v3 = vld [vmem:[#allocation8 + $0x10] sm:$0xff]  ;;  %v388_v7 = vld [vmem:[#allocation8 + $0x40] sm:$0xff]  ;;  %v391_v8 = vld [vmem:[#allocation8 + $0x58] sm:$0xff] }
  0x69   :  { %7375 = vmatpush1.bf16.msra.mxu0 %v7374_v28  ;;  %v9246_v5 = vpack.c.bf16 %v385_v4, %v382_v3  ;;  %v9250_v9 = vpack.c.bf16 %v391_v8, %v388_v7  ;;  %v394_v10 = vld [vmem:[#allocation8 + $0x70] sm:$0xff]  ;;  %v397_v11 = vld [vmem:[#allocation8 + $0x88] sm:$0xff]  ;;  %v400_v13 = vld [vmem:[#allocation8 + $0xa0] sm:$0xff] }
  0x6a   :  { %7377 = vmatprep.subr.bf16.mxu0 %v9231_v31  ;;  %7315 = vmatpush1.bf16.msra.mxu1 %v7314_v34  ;;  %v9254_v12 = vpack.c.bf16 %v397_v11, %v394_v10  ;;  %v403_v14 = vld [vmem:[#allocation8 + $0xb8] sm:$0xff]  ;;  %v406_v16 = vld [vmem:[#allocation8 + $0xd0] sm:$0xff]  ;;  %v409_v17 = vld [vmem:[#allocation8 + $0xe8] sm:$0xff] }
  0x6b   :  { %7317 = vmatprep.subr.bf16.mxu1 %v7316_v35  ;;  %v9258_v15 = vpack.c.bf16 %v403_v14, %v400_v13  ;;  %v9262_v18 = vpack.c.bf16 %v409_v17, %v406_v16  ;;  %v412_v19 = vld [vmem:[#allocation8 + $0x100] sm:$0xff]  ;;  %v415_v20 = vld [vmem:[#allocation8 + $0x118] sm:$0xff]  ;;  %v418_v22 = vld [vmem:[#allocation8 + $0x130] sm:$0xff] }
  0x6c   :  { %v9268_v21 = vpack.c.bf16 %v415_v20, %v412_v19  ;;  %v421_v23 = vld [vmem:[#allocation8 + $0x148] sm:$0xff]  ;;  %v424_v25 = vld [vmem:[#allocation8 + $0x160] sm:$0xff]  ;;  %v427_v26 = vld [vmem:[#allocation8 + $0x178] sm:$0xff] }
  0x6d   :  { %7379 = vmatpush1.bf16.msra.mxu0 %v9233_v36  ;;  %226 = vmatmul.mubr.f32.vlgmr.msra.gmra.mrb[0].mxu1 %v88_v39  ;;  %v9272_v24 = vpack.c.bf16 %v421_v23, %v418_v22  ;;  %v9276_v27 = vpack.c.bf16 %v427_v26, %v424_v25  ;;  %v612_v28 = vld [vmem:[#allocation6 + $0x188] sm:$0xff]  ;;  %v615_v29 = vld [vmem:[#allocation6 + $0x1a0] sm:$0xff]  ;;  %v614_v33 = vld [vmem:[#allocation6 + $0x198] sm:$0xff] }
  0x6e   :  { %7319 = vmatpush3.bf16.msra.mxu1 %v7316_v35  ;;  %231 = vmatprep.mubr.f32.mxu1 %v10942_v0  ;;  %v611_v30 = vld [vmem:[#allocation6 + $0x180] sm:$0xff]  ;;  %v9284_v32 = vpack.c.bf16 %v615_v29, %v612_v28  ;;  %v613_v34 = vld [vmem:[#allocation6 + $0x190] sm:$0xff]  ;;  %v616_v35 = vld [vmem:[#allocation6 + $0x1a8] sm:$0xff] }
  0x6f   :  { %7321 = vmatprep.subr.bf16.mxu1 %v7320_v40  ;;  %v9286_v37 = vpack.c.bf16 %v614_v33, %v611_v30  ;;  %v9288_v38 = vpack.c.bf16 %v616_v35, %v613_v34  ;;  %v617_v41 = vld [vmem:[#allocation6 + $0x1b0] sm:$0xff]  ;;  %v622_v45 = vld [vmem:[#allocation6 + $0x1d8] sm:$0xff]  ;;  %v627_v49 = vld [vmem:[#allocation6 + $0x200] sm:$0xff] }
  0x70   :  { %510 = vmatmul.mubr.f32.vlgmr.msra.gmra.mrb[0].mxu0 %v10942_v0  ;;  %7405 = vmatprep.subr.bf16.mxu0 %v9284_v32  ;;  %v623_v50 = vld [vmem:[#allocation6 + $0x1e0] sm:$0xff]  ;;  %v625_v53 = vld [vmem:[#allocation6 + $0x1f0] sm:$0xff]  ;;  %v628_v54 = vld [vmem:[#allocation6 + $0x208] sm:$0xff] }
  0x71   :  { %741 = vmatprep.mubr.f32.mxu0 %v10942_v0  ;;  %232 = vmatmul.mubr.f32.gmra.mrb[2].mxu1 %v89_v43  ;;  %v630_v57 = vld [vmem:[#allocation6 + $0x218] sm:$0xff]  ;;  %v633_v58 = vld [vmem:[#allocation6 + $0x230] sm:$0xff]  ;;  %v632_v61 = vld [vmem:[#allocation6 + $0x228] sm:$0xff] }
  0x72   :  { %7323 = vmatpush3.bf16.msra.mxu1 %v7320_v40  ;;  %237 = vmatprep.mubr.f32.mxu1 %v10942_v0  ;;  %v621_v40 = vld [vmem:[#allocation6 + $0x1d0] sm:$0xff]  ;;  %v631_v62 = vld [vmem:[#allocation6 + $0x220] sm:$0xff]  ;;  %v636_v3 = vld [vmem:[#allocation6 + $0x248] sm:$0xff] }
  0x73   :  { %7325 = vmatprep.subr.bf16.mxu1 %v7324_v44  ;;  %7407 = vmatpush1.bf16.msra.mxu0 %v9286_v37  ;;  %v639_v4 = vld [vmem:[#allocation6 + $0x260] sm:$0xff]  ;;  %v638_v10 = vld [vmem:[#allocation6 + $0x258] sm:$0xff]  ;;  %v637_v11 = vld [vmem:[#allocation6 + $0x250] sm:$0xff] }
  0x74   :  { %v9323_v7 = vpack.c.bf16 %v639_v4, %v636_v3  ;;  %v635_v8 = vld [vmem:[#allocation6 + $0x240] sm:$0xff]  ;;  %v640_v14 = vld [vmem:[#allocation6 + $0x268] sm:$0xff]  ;;  %v642_v17 = vld [vmem:[#allocation6 + $0x278] sm:$0xff] }
  0x75   :  { %238 = vmatmul.mubr.f32.gmra.mrb[4].mxu1 %v90_v47  ;;  %v9326_v13 = vpack.c.bf16 %v638_v10, %v635_v8  ;;  %v9329_v16 = vpack.c.bf16 %v640_v14, %v637_v11  ;;  %v645_v19 = vld [vmem:[#allocation6 + $0x290] sm:$0xff]  ;;  %v644_v23 = vld [vmem:[#allocation6 + $0x288] sm:$0xff]  ;;  %v643_v25 = vld [vmem:[#allocation6 + $0x280] sm:$0xff] }
  0x76   :  { %7327 = vmatpush3.bf16.msra.mxu1 %v7324_v44  ;;  %243 = vmatprep.mubr.f32.mxu1 %v10942_v0  ;;  %v619_v44 = vld [vmem:[#allocation6 + $0x1c0] sm:$0xff]  ;;  %v9333_v20 = vpack.c.bf16 %v645_v19, %v642_v17  ;;  %v641_v22 = vld [vmem:[#allocation6 + $0x270] sm:$0xff]  ;;  %v646_v28 = vld [vmem:[#allocation6 + $0x298] sm:$0xff] }
  0x77   :  { %7329 = vmatprep.subr.bf16.mxu1 %v7328_v48  ;;  %v9336_v26 = vpack.c.bf16 %v644_v23, %v641_v22  ;;  %v648_v29 = vld [vmem:[#allocation6 + $0x2a8] sm:$0xff]  ;;  %v651_v30 = vld [vmem:[#allocation6 + $0x2c0] sm:$0xff]  ;;  %v9339_v33 = vpack.c.bf16 %v646_v28, %v643_v25 }
  0x78   :  { %v9341_v34 = vpack.c.bf16 %v651_v30, %v648_v29  ;;  %v647_v35 = vld [vmem:[#allocation6 + $0x2a0] sm:$0xff] }
  0x79   :  { %244 = vmatmul.mubr.f32.gmra.mrb[6].mxu1 %v91_v51  ;;  %v144_v8 = vld [vmem:[%s10937_s3] sm:$0x7] }
  0x7a   :  { %7331 = vmatpush3.bf16.msra.mxu1 %v7328_v48  ;;  %249 = vmatprep.mubr.f32.mxu1 %v10942_v0  ;;  %v624_v48 = vld [vmem:[#allocation6 + $0x1e8] sm:$0xff]  ;;  %v9377_v11 = vld [vmem:[%s10938_s4] sm:$0x7] }
  0x7b   :  { %7333 = vmatprep.subr.bf16.mxu1 %v7332_v52 }
  0x7d   :  { %250 = vmatmul.mubr.f32.gmra.mrb[8].mxu1 %v92_v55 }
  0x7e   :  { %7335 = vmatpush3.bf16.msra.mxu1 %v7332_v52  ;;  %255 = vmatprep.mubr.f32.mxu1 %v10942_v0  ;;  %v626_v52 = vld [vmem:[#allocation6 + $0x1f8] sm:$0xff] }
  0x7f   :  { %7337 = vmatprep.subr.bf16.mxu1 %v7336_v56 }
  0x81   :  { %256 = vmatmul.mubr.f32.gmra.mrb[10].mxu1 %v93_v59 }
  0x82   :  { %7339 = vmatpush3.bf16.msra.mxu1 %v7336_v56  ;;  %261 = vmatprep.mubr.f32.mxu1 %v10942_v0  ;;  %v9308_v56 = vpack.c.bf16 %v628_v54, %v625_v53  ;;  %v655_v53 = vld [vmem:[#allocation6 + $0x2e0] sm:$0xff]  ;;  %v658_v54 = vld [vmem:[#allocation6 + $0x2f8] sm:$0xff] }
  0x83   :  { %7341 = vmatprep.subr.bf16.mxu1 %v7340_v60 }
  0x85   :  { %262 = vmatmul.mubr.f32.gmra.mrb[12].mxu1 %v94_v63 }
  0x86   :  { %7343 = vmatpush3.bf16.msra.mxu1 %v7340_v60  ;;  %267 = vmatprep.mubr.f32.mxu1 %v10942_v0  ;;  %v629_v60 = vld [vmem:[#allocation6 + $0x210] sm:$0xff] }
  0x87   :  { %7345 = vmatprep.subr.bf16.mxu1 %v7344_v1 }
  0x89   :  { %268 = vmatmul.mubr.f32.gmra.mrb[14].mxu1 %v95_v2 }
  0x8a   :  { %7347 = vmatpush3.bf16.msra.mxu1 %v7344_v1  ;;  %6388 = vmatprep.mubr.f32.mxu1 %v88_v39  ;;  %v618_v39 = vld [vmem:[#allocation6 + $0x1b8] sm:$0xff] }
  0x8b   :  { %7380 = vmatprep.subr.bf16.mxu1 %v10944_v6  ;;  %v9293_v42 = vpack.c.bf16 %v621_v40, %v618_v39  ;;  %v634_v1 = vld [vmem:[#allocation6 + $0x238] sm:$0xff]  ;;  %v649_v40 = vld [vmem:[#allocation6 + $0x2b0] sm:$0xff] }
  0x8c   :  { %v650_v39 = vld [vmem:[#allocation6 + $0x2b8] sm:$0xff] }
  0x8d   :  { %6389 = vmatmul.mubr.f32.vlgmr.msra.gmra.mrb[16].mxu1 %v89_v43  ;;  %v620_v43 = vld [vmem:[#allocation6 + $0x1c8] sm:$0xff]  ;;  %7409 = vmatprep.subr.bf16.mxu0 %v9293_v42 }
  0x8e   :  { %7382 = vmatpush3.bf16.msra.mxu1 %v9246_v5  ;;  %6391 = vmatprep.mubr.f32.mxu1 %v90_v47  ;;  %v9296_v46 = vpack.c.bf16 %v620_v43, %v617_v41  ;;  %v9298_v47 = vpack.c.bf16 %v622_v45, %v619_v44  ;;  %v9344_v41 = vpack.c.bf16 %v650_v39, %v647_v35  ;;  %v652_v43 = vld [vmem:[#allocation6 + $0x2c8] sm:$0xff]  ;;  %v654_v44 = vld [vmem:[#allocation6 + $0x2d8] sm:$0xff]  ;;  %v657_v45 = vld [vmem:[#allocation6 + $0x2f0] sm:$0xff] }
  0x8f   :  { %7383 = vmatprep.subr.bf16.mxu1 %v10944_v6 }
  0x90   :  { %7411 = vmatpush1.bf16.msra.mxu0 %v9296_v46 }
  0x91   :  { %6392 = vmatmul.mubr.f32.gmra.mrb[18].mxu1 %v91_v51  ;;  %v9303_v51 = vpack.c.bf16 %v627_v49, %v624_v48  ;;  %v9348_v48 = vpack.c.bf16 %v652_v43, %v649_v40  ;;  %v9350_v49 = vpack.c.bf16 %v657_v45, %v654_v44 }
  0x92   :  { %7385 = vmatpush3.bf16.msra.mxu1 %v9250_v9  ;;  %6394 = vmatprep.mubr.f32.mxu1 %v92_v55  ;;  %v9306_v55 = vpack.c.bf16 %v626_v52, %v623_v50  ;;  %v653_v50 = vld [vmem:[#allocation6 + $0x2d0] sm:$0xff]  ;;  %v656_v52 = vld [vmem:[#allocation6 + $0x2e8] sm:$0xff] }
  0x93   :  { %7386 = vmatprep.subr.bf16.mxu1 %v10944_v6  ;;  %7413 = vmatprep.subr.bf16.mxu0 %v9303_v51 }
  0x94   :  { %7415 = vmatpush1.bf16.msra.mxu0 %v9306_v55 }
  0x95   :  { %6395 = vmatmul.mubr.f32.gmra.mrb[20].mxu1 %v93_v59  ;;  %v9314_v59 = vpack.c.bf16 %v633_v58, %v630_v57  ;;  %v820_v57 = vld [vmem:[#allocation8 + $0x188] sm:$0xff]  ;;  %v823_v58 = vld [vmem:[#allocation8 + $0x1a0] sm:$0xff] }
  0x96   :  { %7388 = vmatpush3.bf16.msra.mxu1 %v9254_v12  ;;  %6397 = vmatprep.mubr.f32.mxu1 %v94_v63  ;;  %v9316_v63 = vpack.c.bf16 %v632_v61, %v629_v60  ;;  %v9354_v60 = vpack.c.bf16 %v656_v52, %v653_v50  ;;  %v9358_v61 = vpack.c.bf16 %v658_v54, %v655_v53 }
  0x97   :  { %7389 = vmatprep.subr.bf16.mxu1 %v10944_v6  ;;  %7417 = vmatprep.subr.bf16.mxu0 %v9314_v59 }
  0x98   :  { %7419 = vmatpush1.bf16.msra.mxu0 %v9316_v63 }
  0x99   :  { %6398 = vmatmul.mubr.f32.gmra.mrb[22].mxu1 %v95_v2  ;;  %v9319_v2 = vpack.c.bf16 %v634_v1, %v631_v62  ;;  %7421 = vmatprep.subr.bf16.mxu0 %v9323_v7  ;;  %v9360_v62 = vpack.c.bf16 %v823_v58, %v820_v57  ;;  %v146_v1 = vlaneseq }
  0x9a   :  { %7391 = vmatpush3.bf16.msra.mxu1 %v9258_v15  ;;  %6432 = vmatprep.mubr.msk.f32.mxu1 %vm9120_vm0, %v10942_v0 }
  0x9b   :  { %7392 = vmatprep.subr.bf16.mxu1 %v10944_v6  ;;  %v147_v3 = vshrl.u32 %v146_v1, 7 }
  0x9c   :  { %7423 = vmatpush1.bf16.msra.mxu0 %v9326_v13 }
  0x9d   :  { %7425 = vmatprep.subr.bf16.mxu0 %v9333_v20  ;;  %v9367_v4 = vsub.s32 0, %v147_v3  ;;  %v9372_v10 = vsub.s32 1, %v147_v3 }
  0x9e   :  { %7394 = vmatpush3.bf16.msra.mxu1 %v9262_v18 }
  0x9f   :  { %7395 = vmatprep.subr.bf16.mxu1 %v10944_v6  ;;  %11024 = vst [vmem:[#allocation16_spill] sm:$0xff] %v9367_v4  ;;  %11025 = vst [vmem:[#allocation17_spill] sm:$0xff] %v9372_v10  ;;  %v149_v14 = vrot.slane %v144_v8, %v9367_v4  ;;  %v153_v17 = vrot.slane %v144_v8, %v9372_v10  ;;  %v433_v19 = vrot.slane %v9377_v11, %v9367_v4 }
  0xa0   :  { %7427 = vmatpush1.bf16.msra.mxu0 %v9336_v26  ;;  %v437_v23 = vrot.slane %v9377_v11, %v9372_v10 }
  0xa1   :  { %7429 = vmatprep.subr.bf16.mxu0 %v9341_v34 }
  0xa2   :  { %7397 = vmatpush3.bf16.msra.mxu1 %v9268_v21 }
  0xa3   :  { %7398 = vmatprep.subr.bf16.mxu1 %v10944_v6 }
  0xa4   :  { %7431 = vmatpush1.bf16.msra.mxu0 %v9344_v41 }
  0xa5   :  { %7433 = vmatprep.subr.bf16.mxu0 %v9350_v49 }
  0xa6   :  { %7400 = vmatpush3.bf16.msra.mxu1 %v9272_v24 }
  0xa7   :  { %7401 = vmatprep.subr.bf16.mxu1 %v10944_v6 }
  0xa8   :  { %7435 = vmatpush1.bf16.msra.mxu0 %v9354_v60 }
  0xa9   :  { %7461 = vmatprep.subr.bf16.mxu0 %v9360_v62 }
  0xaa   :  { %7403 = vmatpush3.bf16.msra.mxu1 %v9276_v27 }
  0xab   :  { %7436 = vmatprep.subr.bf16.mxu1 %v10944_v6 }
  0xad   :  { %6433 = vmatmul.mubr.f32.vlgmr.msra.gmra.mrb[24].mxu1 %v10942_v0 }
  0xae   :  { %6467 = vmatprep.mubr.msk.f32.mxu1 %vm9120_vm0, %v10942_v0  ;;  %7438 = vmatpush3.bf16.msra.mxu1 %v9288_v38  ;;  %v9407_v0 = vsub.s32 2, %v147_v3 }
  0xaf   :  { %7439 = vmatprep.subr.bf16.mxu1 %v10944_v6 }
  0xb2   :  { %7441 = vmatpush3.bf16.msra.mxu1 %v9298_v47 }
  0xb3   :  { %7442 = vmatprep.subr.bf16.mxu1 %v10944_v6 }
  0xb6   :  { %7444 = vmatpush3.bf16.msra.mxu1 %v9308_v56 }
  0xb7   :  { %7445 = vmatprep.subr.bf16.mxu1 %v10944_v6 }
  0xba   :  { %7447 = vmatpush3.bf16.msra.mxu1 %v9319_v2 }
  0xbb   :  { %7448 = vmatprep.subr.bf16.mxu1 %v10944_v6 }
  0xbe   :  { %7450 = vmatpush3.bf16.msra.mxu1 %v9329_v16 }
  0xbf   :  { %7451 = vmatprep.subr.bf16.mxu1 %v10944_v6 }
  0xc2   :  { %7453 = vmatpush3.bf16.msra.mxu1 %v9339_v33 }
  0xc3   :  { %7454 = vmatprep.subr.bf16.mxu1 %v10944_v6 }
  0xc6   :  { %7456 = vmatpush3.bf16.msra.mxu1 %v9348_v48 }
  0xc7   :  { %7457 = vmatprep.subr.bf16.mxu1 %v10944_v6 }
  0xca   :  { %7459 = vmatpush3.bf16.msra.mxu1 %v9358_v61 }
  0xcb   :  { %7492 = vmatprep.subr.bf16.mxu1 %v10944_v6 }
 0x140   :  { %v227_v22 = vpop.f32.mrb[0].mxu1 }
 0x141   :  { %v228_v25 = vadd.f32 %v227_v22, %v149_v14  ;;  %v229_v28 = vpop.f32.mrb[1].mxu1 }
 0x142   :  { %v230_v29 = vadd.f32 %v229_v28, %v153_v17 }
 0x143   :  { %v511_v30 = vpop.f32.mrb[0].mxu0  ;;  %v8725_v35 = vadd.f32 %v433_v19, %v228_v25 }
 0x144   :  { %v513_v39 = vpop.f32.mrb[1].mxu0  ;;  %v233_v40 = vpop.f32.mrb[2].mxu1  ;;  %v8728_v43 = vadd.f32 %v437_v23, %v230_v29 }
 0x145   :  { %v9385_v44 = vadd.f32 %v233_v40, %v149_v14  ;;  %v8726_v45 = vadd.f32 %v8725_v35, %v511_v30  ;;  %v235_v50 = vpop.f32.mrb[3].mxu1 }
 0x146   :  { %v9387_v52 = vadd.f32 %v235_v50, %v153_v17  ;;  %v8729_v53 = vadd.f32 %v8728_v43, %v513_v39 }
 0x148   :  { %v239_v54 = vpop.f32.mrb[4].mxu1 }
 0x149   :  { %v9389_v57 = vadd.f32 %v239_v54, %v149_v14  ;;  %v241_v58 = vpop.f32.mrb[5].mxu1 }
 0x14a   :  { %v9391_v1 = vadd.f32 %v241_v58, %v153_v17 }
 0x14b   :  { %11026 = vst [vmem:[#allocation18_spill] sm:$0xff] %v9389_v57 }
 0x14c   :  { %11027 = vst [vmem:[#allocation19_spill] sm:$0xff] %v9391_v1  ;;  %v245_v22 = vpop.f32.mrb[6].mxu1  ;;  %v829_v1 = vld [vmem:[#allocation8 + $0x1d0] sm:$0xff] }
 0x14d   :  { %v9393_v28 = vadd.f32 %v245_v22, %v149_v14  ;;  %v247_v19 = vpop.f32.mrb[7].mxu1 }
 0x14e   :  { %v9395_v25 = vadd.f32 %v247_v19, %v153_v17 }
 0x14f   :  { %11028 = vst [vmem:[#allocation20_spill] sm:$0xff] %v9393_v28 }
 0x150   :  { %11029 = vst [vmem:[#allocation21_spill] sm:$0xff] %v9395_v25  ;;  %v251_v23 = vpop.f32.mrb[8].mxu1 }
 0x151   :  { %v9397_v29 = vadd.f32 %v251_v23, %v149_v14  ;;  %v253_v30 = vpop.f32.mrb[9].mxu1 }
 0x152   :  { %v9399_v35 = vadd.f32 %v253_v30, %v153_v17  ;;  %v157_v30 = vrot.slane %v144_v8, %v9407_v0 }
 0x153   :  { %11030 = vst [vmem:[#allocation22_spill] sm:$0xff] %v9397_v29 }
 0x154   :  { %11031 = vst [vmem:[#allocation23_spill] sm:$0xff] %v9399_v35  ;;  %v257_v40 = vpop.f32.mrb[10].mxu1 }
 0x155   :  { %v9401_v39 = vadd.f32 %v257_v40, %v149_v14  ;;  %v259_v43 = vpop.f32.mrb[11].mxu1 }
 0x156   :  { %v9403_v50 = vadd.f32 %v259_v43, %v153_v17 }
 0x157   :  { %11032 = vst [vmem:[#allocation24_spill] sm:$0xff] %v9401_v39 }
 0x158   :  { %11033 = vst [vmem:[#allocation25_spill] sm:$0xff] %v9403_v50  ;;  %v263_v54 = vpop.f32.mrb[12].mxu1  ;;  %v5851_v50 = vmul.f32 -1.442695, %v8726_v45 }
 0x159   :  { %v9405_v58 = vadd.f32 %v263_v54, %v149_v14  ;;  %v265_v22 = vpop.f32.mrb[13].mxu1 }
 0x15a   :  { %v9409_v19 = vadd.f32 %v265_v22, %v153_v17  ;;  %8832 = vpow2.f32 %v5851_v50  ;;  %v441_v50 = vrot.slane %v9377_v11, %v9407_v0 }
 0x15b   :  { %11034 = vst [vmem:[#allocation26_spill] sm:$0xff] %v9405_v58 }
 0x15c   :  { %11035 = vst [vmem:[#allocation27_spill] sm:$0xff] %v9409_v19  ;;  %v269_v6 = vpop.f32.mrb[14].mxu1 }
 0x15d   :  { %v9411_v23 = vadd.f32 %v269_v6, %v149_v14  ;;  %v271_v29 = vpop.f32.mrb[15].mxu1 }
 0x15e   :  { %v9414_v35 = vadd.f32 %v271_v29, %v153_v17 }
 0x15f   :  { %11036 = vst [vmem:[#allocation28_spill] sm:$0xff] %v9411_v23 }
 0x160   :  { %11037 = vst [vmem:[#allocation29_spill] sm:$0xff] %v9414_v35  ;;  %v6390_v40 = vpop.f32.mrb[16].mxu1 }
 0x161   :  { %v9416_v39 = vadd.f32 %v6390_v40, %v157_v30  ;;  %v340_v43 = vpop.f32.mrb[17].mxu1  ;;  %v5852_v40 = vmul.f32 -1.442695, %v8729_v53 }
 0x163   :  { %8834 = vpow2.f32 %v5852_v40  ;;  %v822_v40 = vld [vmem:[#allocation8 + $0x198] sm:$0xff] }
 0x164   :  { %v6393_v54 = vpop.f32.mrb[18].mxu1  ;;  %v8833_v45 = vpop.eup %8832 }
 0x165   :  { %v9418_v58 = vadd.f32 %v6393_v54, %v157_v30  ;;  %v350_v3 = vpop.f32.mrb[19].mxu1  ;;  %v590_v54 = vadd.f32 1.0, %v8833_v45  ;;  %v821_v45 = vld [vmem:[#allocation8 + $0x190] sm:$0xff] }
 0x166   :  { %v9420_v25 = vadd.f32 %v350_v3, %v157_v30 }
 0x167   :  { %11038 = vst [vmem:[#allocation30_spill] sm:$0xff] %v9418_v58  ;;  %8836 = vrcp.f32 %v590_v54  ;;  %v824_v54 = vld [vmem:[#allocation8 + $0x1a8] sm:$0xff] }
 0x168   :  { %11039 = vst [vmem:[#allocation31_spill] sm:$0xff] %v9420_v25  ;;  %v6396_v22 = vpop.f32.mrb[20].mxu1  ;;  %v826_v25 = vld [vmem:[#allocation8 + $0x1b8] sm:$0xff] }
 0x169   :  { %v9422_v6 = vadd.f32 %v6396_v22, %v157_v30  ;;  %v360_v14 = vpop.f32.mrb[21].mxu1 }
 0x16a   :  { %v9424_v23 = vadd.f32 %v360_v14, %v157_v30 }
 0x16b   :  { %11040 = vst [vmem:[#allocation32_spill] sm:$0xff] %v9422_v6 }
 0x16c   :  { %11041 = vst [vmem:[#allocation33_spill] sm:$0xff] %v9424_v23  ;;  %v6399_v8 = vpop.f32.mrb[22].mxu1 }
 0x16d   :  { %v9426_v17 = vadd.f32 %v6399_v8, %v157_v30  ;;  %v370_v29 = vpop.f32.mrb[23].mxu1  ;;  %v8835_v3 = vpop.eup %8834  ;;  %v341_v8 = vadd.f32 %v340_v43, %v157_v30  ;;  %v827_v43 = vld [vmem:[#allocation8 + $0x1c0] sm:$0xff] }
 0x16e   :  { %v9428_v35 = vadd.f32 %v370_v29, %v157_v30  ;;  %v597_v22 = vadd.f32 1.0, %v8835_v3  ;;  %v819_v29 = vld [vmem:[#allocation8 + $0x180] sm:$0xff] }
 0x16f   :  { %11042 = vst [vmem:[#allocation34_spill] sm:$0xff] %v9426_v17  ;;  %v9432_v57 = vpack.c.bf16 %v822_v40, %v819_v29  ;;  %v836_v29 = vld [vmem:[#allocation8 + $0x208] sm:$0xff]  ;;  %v838_v40 = vld [vmem:[#allocation8 + $0x218] sm:$0xff] }
 0x170   :  { %11043 = vst [vmem:[#allocation35_spill] sm:$0xff] %v9428_v35  ;;  %8838 = vrcp.f32 %v597_v22  ;;  %v835_v22 = vld [vmem:[#allocation8 + $0x200] sm:$0xff] }
 0x171   :  { %v8837_v23 = vpop.eup %8836 }
 0x17a   :  { %v8839_v53 = vpop.eup %8838 }
 0x17b   :  { %v603_v35 = vsub.f32 1.0, %v8839_v53  ;;  %v605_v3 = vmul.f32 0.0, %v8839_v53  ;;  %v833_v53 = vld [vmem:[#allocation8 + $0x1f0] sm:$0xff] }
 0x180   :  { %v582_v19 = vpop.f32.mrb[24].mxu1 }
 0x181   :  { %v583_v6 = vadd.f32 %v582_v19, %v441_v50  ;;  %v6434_v14 = vpop.f32.mrb[25].mxu1  ;;  %v9434_v19 = vpack.c.bf16 %v824_v54, %v821_v45  ;;  %v825_v50 = vld [vmem:[#allocation8 + $0x1b0] sm:$0xff]  ;;  %v11049_v54 = vmov 0.0  }
 0x182   :  { %v831_v14 = vld [vmem:[#allocation8 + $0x1e0] sm:$0xff]  ;;  %v841_v45 = vld [vmem:[#allocation8 + $0x230] sm:$0xff] }
 0x183   :  { %v600_v17 = vmul.f32 %v8837_v23, %v583_v6  ;;  %v9438_v23 = vpack.c.bf16 %v829_v1, %v826_v25  ;;  %v830_v6 = vld [vmem:[#allocation8 + $0x1d8] sm:$0xff]  ;;  %v11047_v1 = vmov 0.0|0.0  }
 0x185   :  { %v601_v58 = vadd.f32 %v600_v17, %v341_v8  ;;  %11044 = vst [vmem:[#allocation36_spill] sm:$0xff] %v9438_v23  ;;  %v832_v17 = vld [vmem:[#allocation8 + $0x1e8] sm:$0xff]  ;;  %v834_v8 = vld [vmem:[#allocation8 + $0x1f8] sm:$0xff] }
 0x186   :  { %v9450_v25 = vpack.c.bf16 %v835_v22, %v832_v17  ;;  %v842_v17 = vld [vmem:[#allocation8 + $0x238] sm:$0xff]  ;;  %v844_v22 = vld [vmem:[#allocation8 + $0x248] sm:$0xff] }
 0x187   :  { %8840 = vtanh.f32 %v601_v58  ;;  %v828_v58 = vld [vmem:[#allocation8 + $0x1c8] sm:$0xff] }
 0x188   :  { %11048 = vst [vmem:[#allocation39_spill] sm:$0xff] %v9450_v25 }
 0x191   :  { %v8841_v28 = vpop.eup %8840 }
 0x192   :  { %v604_v11 = vmul.f32 %v8841_v28, %v603_v35  ;;  %v9444_v28 = vpack.c.bf16 %v828_v58, %v825_v50  ;;  %v9446_v35 = vpack.c.bf16 %v830_v6, %v827_v43  ;;  %v837_v50 = vld [vmem:[#allocation8 + $0x210] sm:$0xff]  ;;  %v9463_v58 = vpack.c.bf16 %v841_v45, %v838_v40  ;;  %v840_v43 = vld [vmem:[#allocation8 + $0x228] sm:$0xff]  ;;  %v839_v6 = vld [vmem:[#allocation8 + $0x220] sm:$0xff] }
 0x193   :  { %v846_v40 = vld [vmem:[#allocation8 + $0x258] sm:$0xff]  ;;  %v845_v45 = vld [vmem:[#allocation8 + $0x250] sm:$0xff] }
 0x194   :  { %v9436_v30 = vadd.f32 %v605_v3, %v604_v11  ;;  %11045 = vst [vmem:[#allocation37_spill] sm:$0xff] %v9444_v28  ;;  %11046 = vst [vmem:[#allocation38_spill] sm:$0xff] %v9446_v35  ;;  %v9457_v11 = vpack.c.bf16 %v834_v8, %v831_v14  ;;  %v9459_v3 = vpack.c.bf16 %v836_v29, %v833_v53  ;;  %v843_v53 = vld [vmem:[#allocation8 + $0x240] sm:$0xff] }
 0x195   :  { %11052 = vst [vmem:[#allocation42_spill] sm:$0xff] %v9463_v58  ;;  %v9467_v14 = vpack.c.bf16 %v840_v43, %v837_v50  ;;  %v9469_v8 = vpack.c.bf16 %v842_v17, %v839_v6  ;;  %v9477_v50 = vpack.c.bf16 %v846_v40, %v843_v53  ;;  %v849_v6 = vld [vmem:[#allocation8 + $0x270] sm:$0xff]  ;;  %v852_v17 = vld [vmem:[#allocation8 + $0x288] sm:$0xff]  ;;  %v855_v40 = vld [vmem:[#allocation8 + $0x2a0] sm:$0xff] }
 0x196   :  { %742 = vmatmul.mubr.f32.vlgmr.msra.gmra.mrb[2].mxu0 %v9436_v30  ;;  %6468 = vmatmul.mubr.f32.vlgmr.msra.gmra.mrb[26].mxu1 %v9436_v30  ;;  %11050 = vst [vmem:[#allocation40_spill] sm:$0xff] %v9457_v11  ;;  %11051 = vst [vmem:[#allocation41_spill] sm:$0xff] %v9459_v3  ;;  %v9487_v53 = vpack.c.bf16 %v852_v17, %v849_v6  ;;  %v861_v17 = vld [vmem:[#allocation8 + $0x2d0] sm:$0xff] }
 0x197   :  { %7463 = vmatpush1.bf16.msra.mxu0 %v9432_v57  ;;  %7494 = vmatpush3.bf16.msra.mxu1 %v9434_v19  ;;  %11053 = vst [vmem:[#allocation43_spill] sm:$0xff] %v9467_v14  ;;  %11054 = vst [vmem:[#allocation44_spill] sm:$0xff] %v9469_v8 }
 0x198   :  { %7465 = vmatprep.subr.bf16.mxu0 %v9438_v23  ;;  %7495 = vmatprep.subr.bf16.mxu1 %v11047_v1  ;;  %v847_v23 = vld [vmem:[#allocation8 + $0x260] sm:$0xff]  ;;  %11056 = vst [vmem:[#allocation46_spill] sm:$0xff] %v9477_v50 }
 0x199   :  { %949 = vmatprep.mubr.f32.mxu0 %v11049_v54  ;;  %6502 = vmatprep.mubr.msk.f32.mxu1 %vm9120_vm0, %v11049_v54  ;;  %v9473_v29 = vpack.c.bf16 %v847_v23, %v844_v22  ;;  %v851_v22 = vld [vmem:[#allocation8 + $0x280] sm:$0xff] }
 0x19b   :  { %7467 = vmatpush1.bf16.msra.mxu0 %v9444_v28  ;;  %7497 = vmatpush3.bf16.msra.mxu1 %v9446_v35  ;;  %11055 = vst [vmem:[#allocation45_spill] sm:$0xff] %v9473_v29  ;;  %v850_v35 = vld [vmem:[#allocation8 + $0x278] sm:$0xff]  ;;  %v853_v28 = vld [vmem:[#allocation8 + $0x290] sm:$0xff] }
 0x19c   :  { %7469 = vmatprep.subr.bf16.mxu0 %v9450_v25  ;;  %7498 = vmatprep.subr.bf16.mxu1 %v11047_v1  ;;  %v848_v25 = vld [vmem:[#allocation8 + $0x268] sm:$0xff]  ;;  %v9483_v23 = vpack.c.bf16 %v853_v28, %v850_v35  ;;  %v858_v35 = vld [vmem:[#allocation8 + $0x2b8] sm:$0xff] }
 0x19d   :  { %v9479_v43 = vpack.c.bf16 %v848_v25, %v845_v45  ;;  %v857_v45 = vld [vmem:[#allocation8 + $0x2b0] sm:$0xff]  ;;  %v9497_v6 = vpack.c.bf16 %v858_v35, %v855_v40 }
 0x19e   :  { %11058 = vst [vmem:[#allocation48_spill] sm:$0xff] %v9483_v23 }
 0x19f   :  { %7471 = vmatpush1.bf16.msra.mxu0 %v9457_v11  ;;  %7500 = vmatpush3.bf16.msra.mxu1 %v9459_v3  ;;  %11057 = vst [vmem:[#allocation47_spill] sm:$0xff] %v9479_v43  ;;  %v856_v3 = vld [vmem:[#allocation8 + $0x2a8] sm:$0xff]  ;;  %v859_v11 = vld [vmem:[#allocation8 + $0x2c0] sm:$0xff]  ;;  %11060 = vst [vmem:[#allocation50_spill] sm:$0xff] %v9497_v6 }
 0x1a0   :  { %7473 = vmatprep.subr.bf16.mxu0 %v9463_v58  ;;  %7501 = vmatprep.subr.bf16.mxu1 %v11047_v1  ;;  %v854_v58 = vld [vmem:[#allocation8 + $0x298] sm:$0xff]  ;;  %v9493_v28 = vpack.c.bf16 %v859_v11, %v856_v3  ;;  %v864_v3 = vld [vmem:[#allocation8 + $0x2e8] sm:$0xff] }
 0x1a1   :  { %v9489_v25 = vpack.c.bf16 %v854_v58, %v851_v22  ;;  %v863_v22 = vld [vmem:[#allocation8 + $0x2e0] sm:$0xff]  ;;  %v9507_v40 = vpack.c.bf16 %v864_v3, %v861_v17  ;;  %v1055_v17 = vld [vmem:[#allocation8 + $0x30] sm:$0xff]  ;;  %v1058_v3 = vld [vmem:[#allocation8 + $0x48] sm:$0xff] }
 0x1a2   :  { %11059 = vst [vmem:[#allocation49_spill] sm:$0xff] %v9493_v28 }
 0x1a3   :  { %7475 = vmatpush1.bf16.msra.mxu0 %v9467_v14  ;;  %7503 = vmatpush3.bf16.msra.mxu1 %v9469_v8  ;;  %v862_v8 = vld [vmem:[#allocation8 + $0x2d8] sm:$0xff]  ;;  %v865_v14 = vld [vmem:[#allocation8 + $0x2f0] sm:$0xff] }
 0x1a4   :  { %7477 = vmatprep.subr.bf16.mxu0 %v9473_v29  ;;  %7504 = vmatprep.subr.bf16.mxu1 %v11047_v1  ;;  %v860_v29 = vld [vmem:[#allocation8 + $0x2c8] sm:$0xff]  ;;  %v9503_v11 = vpack.c.bf16 %v865_v14, %v862_v8  ;;  %v1049_v14 = vld [vmem:[#allocation8] sm:$0xff]  ;;  %v1052_v8 = vld [vmem:[#allocation8 + $0x18] sm:$0xff] }
 0x1a5   :  { %v9499_v58 = vpack.c.bf16 %v860_v29, %v857_v45  ;;  %v1056_v45 = vld [vmem:[#allocation8 + $0x38] sm:$0xff] }
 0x1a7   :  { %7479 = vmatpush1.bf16.msra.mxu0 %v9477_v50  ;;  %7506 = vmatpush3.bf16.msra.mxu1 %v9479_v43  ;;  %v1050_v43 = vld [vmem:[#allocation8 + $0x8] sm:$0xff]  ;;  %v1053_v50 = vld [vmem:[#allocation8 + $0x20] sm:$0xff] }
 0x1a8   :  { %7481 = vmatprep.subr.bf16.mxu0 %v9483_v23  ;;  %7507 = vmatprep.subr.bf16.mxu1 %v11047_v1  ;;  %v866_v23 = vld [vmem:[#allocation8 + $0x2f8] sm:$0xff]  ;;  %v9513_v35 = vpack.c.bf16 %v1053_v50, %v1050_v43  ;;  %v1062_v50 = vld [vmem:[#allocation8 + $0x68] sm:$0xff]  ;;  %v1065_v43 = vld [vmem:[#allocation8 + $0x80] sm:$0xff] }
 0x1a9   :  { %v9509_v29 = vpack.c.bf16 %v866_v23, %v863_v22  ;;  %v9527_v22 = vpack.c.bf16 %v1058_v3, %v1055_v17  ;;  %v1067_v3 = vld [vmem:[#allocation8 + $0x90] sm:$0xff] }
 0x1aa   :  { %11061 = vst [vmem:[#allocation51_spill] sm:$0xff] %v9513_v35 }
 0x1ab   :  { %7483 = vmatpush1.bf16.msra.mxu0 %v9487_v53  ;;  %7509 = vmatpush3.bf16.msra.mxu1 %v9489_v25 }
 0x1ac   :  { %7485 = vmatprep.subr.bf16.mxu0 %v9493_v28  ;;  %7510 = vmatprep.subr.bf16.mxu1 %v11047_v1  ;;  %v1059_v28 = vld [vmem:[#allocation8 + $0x50] sm:$0xff] }
 0x1ad   :  { %v9521_v23 = vpack.c.bf16 %v1059_v28, %v1056_v45  ;;  %v9531_v28 = vpack.c.bf16 %v1065_v43, %v1062_v50  ;;  %v1068_v45 = vld [vmem:[#allocation8 + $0x98] sm:$0xff]  ;;  %v1070_v50 = vld [vmem:[#allocation8 + $0xa8] sm:$0xff] }
 0x1ae   :  { %v1074_v43 = vld [vmem:[#allocation8 + $0xc8] sm:$0xff] }
 0x1af   :  { %7487 = vmatpush1.bf16.msra.mxu0 %v9497_v6  ;;  %7512 = vmatpush3.bf16.msra.mxu1 %v9499_v58  ;;  %v9517_v6 = vpack.c.bf16 %v1052_v8, %v1049_v14  ;;  %11063 = vst [vmem:[#allocation53_spill] sm:$0xff] %v9521_v23  ;;  %11064 = vst [vmem:[#allocation54_spill] sm:$0xff] %v9531_v28  ;;  %v1061_v14 = vld [vmem:[#allocation8 + $0x60] sm:$0xff]  ;;  %v1064_v8 = vld [vmem:[#allocation8 + $0x78] sm:$0xff] }
 0x1b0   :  { %7489 = vmatprep.subr.bf16.mxu0 %v9503_v11  ;;  %7513 = vmatprep.subr.bf16.mxu1 %v11047_v1 }
 0x1b1   :  { %11062 = vst [vmem:[#allocation52_spill] sm:$0xff] %v9517_v6 }
 0x1b3   :  { %7491 = vmatpush1.bf16.msra.mxu0 %v9507_v40  ;;  %7515 = vmatpush3.bf16.msra.mxu1 %v9509_v29 }
 0x1b4   :  { %7517 = vmatprep.subr.bf16.mxu0 %v9513_v35  ;;  %7548 = vmatprep.subr.bf16.mxu1 %v11047_v1  ;;  %v1071_v35 = vld [vmem:[#allocation8 + $0xb0] sm:$0xff] }
 0x1b5   :  { %v9542_v17 = vpack.c.bf16 %v1071_v35, %v1068_v45  ;;  %v1080_v35 = vld [vmem:[#allocation8 + $0xf8] sm:$0xff]  ;;  %v1083_v45 = vld [vmem:[#allocation8 + $0x110] sm:$0xff] }
 0x1b6   :  { %950 = vmatmul.mubr.f32.vlgmr.msra.gmra.mrb[2].mxu0 %v11049_v54  ;;  %6503 = vmatmul.mubr.f32.vlgmr.msra.gmra.mrb[28].mxu1 %v11049_v54 }
 0x1b7   :  { %7519 = vmatpush1.bf16.msra.mxu0 %v9517_v6  ;;  %7550 = vmatpush3.bf16.msra.mxu1 %v9246_v5  ;;  %v9538_v5 = vpack.c.bf16 %v1064_v8, %v1061_v14  ;;  %11065 = vst [vmem:[#allocation55_spill] sm:$0xff] %v9542_v17  ;;  %v9546_v6 = vpack.c.bf16 %v1070_v50, %v1067_v3  ;;  %v1073_v14 = vld [vmem:[#allocation8 + $0xc0] sm:$0xff]  ;;  %v1076_v8 = vld [vmem:[#allocation8 + $0xd8] sm:$0xff]  ;;  %v1079_v3 = vld [vmem:[#allocation8 + $0xf0] sm:$0xff] }
 0x1b8   :  { %7521 = vmatprep.subr.bf16.mxu0 %v9521_v23  ;;  %7551 = vmatprep.subr.bf16.mxu1 %v11047_v1  ;;  %v1077_v23 = vld [vmem:[#allocation8 + $0xe0] sm:$0xff]  ;;  %v1082_v50 = vld [vmem:[#allocation8 + $0x108] sm:$0xff] }
 0x1b9   :  { %1178 = vmatprep.mubr.f32.mxu0 %v11049_v54  ;;  %6537 = vmatprep.mubr.msk.f32.mxu1 %vm9120_vm0, %v11049_v54 }
 0x1bb   :  { %7523 = vmatpush1.bf16.msra.mxu0 %v9527_v22  ;;  %7553 = vmatpush3.bf16.msra.mxu1 %v9250_v9  ;;  %v9550_v9 = vpack.c.bf16 %v1077_v23, %v1074_v43  ;;  %v1086_v23 = vld [vmem:[#allocation8 + $0x128] sm:$0xff]  ;;  %v1089_v43 = vld [vmem:[#allocation8 + $0x140] sm:$0xff] }
 0x1bc   :  { %7525 = vmatprep.subr.bf16.mxu0 %v9531_v28  ;;  %7554 = vmatprep.subr.bf16.mxu1 %v11047_v1  ;;  %v9554_v28 = vpack.c.bf16 %v1076_v8, %v1073_v14  ;;  %v1085_v14 = vld [vmem:[#allocation8 + $0x120] sm:$0xff]  ;;  %v1088_v8 = vld [vmem:[#allocation8 + $0x138] sm:$0xff] }
 0x1bf   :  { %7527 = vmatpush1.bf16.msra.mxu0 %v9538_v5  ;;  %7556 = vmatpush3.bf16.msra.mxu1 %v9254_v12  ;;  %v9558_v12 = vpack.c.bf16 %v1083_v45, %v1080_v35  ;;  %v9570_v35 = vpack.c.bf16 %v1088_v8, %v1085_v14 }
 0x1c0   :  { %7529 = vmatprep.subr.bf16.mxu0 %v9542_v17  ;;  %7557 = vmatprep.subr.bf16.mxu1 %v11047_v1  ;;  %v9562_v17 = vpack.c.bf16 %v1082_v50, %v1079_v3 }
 0x1c3   :  { %7531 = vmatpush1.bf16.msra.mxu0 %v9546_v6  ;;  %7559 = vmatpush3.bf16.msra.mxu1 %v9258_v15  ;;  %v9566_v15 = vpack.c.bf16 %v1089_v43, %v1086_v23 }
 0x1c4   :  { %7533 = vmatprep.subr.bf16.mxu0 %v9550_v9  ;;  %7560 = vmatprep.subr.bf16.mxu1 %v11047_v1 }
 0x1c7   :  { %7535 = vmatpush1.bf16.msra.mxu0 %v9554_v28  ;;  %7562 = vmatpush3.bf16.msra.mxu1 %v9262_v18  ;;  %v5854_v18 = vld [vmem:[%s10938_s4 + $0x3] sm:$0x7] }
 0x1c8   :  { %7537 = vmatprep.subr.bf16.mxu0 %v9558_v12  ;;  %7563 = vmatprep.subr.bf16.mxu1 %v11047_v1 }
 0x1cb   :  { %7539 = vmatpush1.bf16.msra.mxu0 %v9562_v17  ;;  %7565 = vmatpush3.bf16.msra.mxu1 %v9268_v21  ;;  %v5853_v21 = vld [vmem:[%s10937_s3 + $0x3] sm:$0x7] }
 0x1cc   :  { %7541 = vmatprep.subr.bf16.mxu0 %v9566_v15  ;;  %7566 = vmatprep.subr.bf16.mxu1 %v11047_v1 }
 0x1cf   :  { %7543 = vmatpush1.bf16.msra.mxu0 %v9570_v35  ;;  %7568 = vmatpush3.bf16.msra.mxu1 %v9272_v24  ;;  %v665_v24 = vrot.slane %v5853_v21, %v9367_v4 }
 0x1d0   :  { %7545 = vmatprep.subr.bf16.mxu0 %v9231_v31  ;;  %7569 = vmatprep.subr.bf16.mxu1 %v11047_v1 }
 0x1d3   :  { %7547 = vmatpush1.bf16.msra.mxu0 %v9233_v36  ;;  %7571 = vmatpush3.bf16.msra.mxu1 %v9276_v27  ;;  %v873_v27 = vrot.slane %v5854_v18, %v9367_v4 }
 0x1d4   :  { %7573 = vmatprep.subr.bf16.mxu0 %v9284_v32  ;;  %7604 = vmatprep.subr.bf16.mxu1 %v11047_v1  ;;  %v669_v32 = vrot.slane %v5853_v21, %v9372_v10 }
 0x1d6   :  { %1179 = vmatmul.mubr.f32.vlgmr.msra.gmra.mrb[4].mxu0 %v9436_v30  ;;  %6538 = vmatmul.mubr.f32.vlgmr.msra.gmra.mrb[30].mxu1 %v9436_v30 }
 0x1d7   :  { %7575 = vmatpush1.bf16.msra.mxu0 %v9286_v37  ;;  %7606 = vmatpush3.bf16.msra.mxu1 %v9288_v38  ;;  %v877_v37 = vrot.slane %v5854_v18, %v9372_v10  ;;  %v8772_v38 = vadd.f32 %v873_v27, %v665_v24 }
 0x1d8   :  { %7577 = vmatprep.subr.bf16.mxu0 %v9293_v42  ;;  %7607 = vmatprep.subr.bf16.mxu1 %v11047_v1 }
 0x1d9   :  { %1407 = vmatprep.mubr.f32.mxu0 %v11049_v54  ;;  %6572 = vmatprep.mubr.msk.f32.mxu1 %vm9120_vm0, %v11049_v54 }
 0x1db   :  { %7579 = vmatpush1.bf16.msra.mxu0 %v9296_v46  ;;  %7609 = vmatpush3.bf16.msra.mxu1 %v9298_v47  ;;  %v8774_v46 = vadd.f32 %v877_v37, %v669_v32 }
 0x1dc   :  { %7581 = vmatprep.subr.bf16.mxu0 %v9303_v51  ;;  %7610 = vmatprep.subr.bf16.mxu1 %v11047_v1 }
 0x1df   :  { %7583 = vmatpush1.bf16.msra.mxu0 %v9306_v55  ;;  %7612 = vmatpush3.bf16.msra.mxu1 %v9308_v56 }
 0x1e0   :  { %7585 = vmatprep.subr.bf16.mxu0 %v9314_v59  ;;  %7613 = vmatprep.subr.bf16.mxu1 %v11047_v1 }
 0x1e3   :  { %7587 = vmatpush1.bf16.msra.mxu0 %v9316_v63  ;;  %7615 = vmatpush3.bf16.msra.mxu1 %v9319_v2 }
 0x1e4   :  { %7589 = vmatprep.subr.bf16.mxu0 %v9323_v7  ;;  %7616 = vmatprep.subr.bf16.mxu1 %v11047_v1 }
 0x1e7   :  { %7591 = vmatpush1.bf16.msra.mxu0 %v9326_v13  ;;  %7618 = vmatpush3.bf16.msra.mxu1 %v9329_v16  ;;  %v881_v16 = vrot.slane %v5854_v18, %v9407_v0 }
 0x1e8   :  { %7593 = vmatprep.subr.bf16.mxu0 %v9333_v20  ;;  %7619 = vmatprep.subr.bf16.mxu1 %v11047_v1 }
 0x1eb   :  { %7595 = vmatpush1.bf16.msra.mxu0 %v9336_v26  ;;  %7621 = vmatpush3.bf16.msra.mxu1 %v9339_v33  ;;  %v1097_v26 = vld [vmem:[%s10938_s4] sm:$0x7]  ;;  %v673_v33 = vrot.slane %v5853_v21, %v9407_v0 }
 0x1ec   :  { %7597 = vmatprep.subr.bf16.mxu0 %v9341_v34  ;;  %7622 = vmatprep.subr.bf16.mxu1 %v11047_v1 }
 0x1ef   :  { %7599 = vmatpush1.bf16.msra.mxu0 %v9344_v41  ;;  %7624 = vmatpush3.bf16.msra.mxu1 %v9348_v48  ;;  %v1102_v48 = vrot.slane %v1097_v26, %v9367_v4 }
 0x1f0   :  { %7601 = vmatprep.subr.bf16.mxu0 %v9350_v49  ;;  %7625 = vmatprep.subr.bf16.mxu1 %v11047_v1 }
 0x1f1   :  { %v8731_v3 = vadd.f32 %v1102_v48, %v9385_v44  ;;  %v11074_v48 = vld [vmem:[#allocation43_spill] sm:$0xff] }
 0x1f3   :  { %7603 = vmatpush1.bf16.msra.mxu0 %v9354_v60  ;;  %7627 = vmatpush3.bf16.msra.mxu1 %v9358_v61  ;;  %v1106_v60 = vrot.slane %v1097_v26, %v9372_v10 }
 0x1f4   :  { %7629 = vmatprep.subr.bf16.mxu0 %v9360_v62  ;;  %7660 = vmatprep.subr.bf16.mxu1 %v11047_v1 }
 0x1f5   :  { %v8734_v43 = vadd.f32 %v1106_v60, %v9387_v52  ;;  %v11076_v60 = vld [vmem:[#allocation45_spill] sm:$0xff] }
 0x269   :  { %v814_v31 = vpop.f32.mrb[26].mxu1 }
 0x26a   :  { %v6469_v36 = vpop.f32.mrb[27].mxu1  ;;  %v815_v61 = vadd.f32 %v814_v31, %v673_v33 }
 0x289   :  { %v951_v42 = vpop.f32.mrb[2].mxu0  ;;  %v1022_v47 = vpop.f32.mrb[28].mxu1 }
 0x28a   :  { %v8773_v51 = vadd.f32 %v8772_v38, %v951_v42  ;;  %v953_v55 = vpop.f32.mrb[3].mxu0  ;;  %v6504_v56 = vpop.f32.mrb[29].mxu1  ;;  %v1023_v41 = vadd.f32 %v1022_v47, %v881_v16  ;;  %v1110_v47 = vrot.slane %v1097_v26, %v9407_v0  ;;  %v11067_v26 = vld [vmem:[#allocation36_spill] sm:$0xff] }
 0x28b   :  { %v8775_v63 = vadd.f32 %v8774_v46, %v953_v55 }
 0x28c   :  { %v5855_v59 = vmul.f32 -1.442695, %v8773_v51 }
 0x28d   :  { %v5856_v2 = vmul.f32 -1.442695, %v8775_v63 }
 0x28e   :  { %8842 = vpow2.f32 %v5855_v59 }
 0x28f   :  { %8844 = vpow2.f32 %v5856_v2 }
 0x298   :  { %v8843_v7 = vpop.eup %8842 }
 0x299   :  { %v1030_v13 = vadd.f32 1.0, %v8843_v7  ;;  %v8845_v20 = vpop.eup %8844 }
 0x29a   :  { %v1037_v34 = vadd.f32 1.0, %v8845_v20 }
 0x29b   :  { %8846 = vrcp.f32 %v1030_v13 }
 0x29c   :  { %8848 = vrcp.f32 %v1037_v34  ;;  %v11070_v34 = vld [vmem:[#allocation39_spill] sm:$0xff] }
 0x2a5   :  { %v8847_v49 = vpop.eup %8846 }
 0x2a6   :  { %v1040_v62 = vmul.f32 %v8847_v49, %v1023_v41  ;;  %v8849_v24 = vpop.eup %8848  ;;  %v11073_v41 = vld [vmem:[#allocation42_spill] sm:$0xff]  ;;  %v11075_v49 = vld [vmem:[#allocation44_spill] sm:$0xff] }
 0x2a7   :  { %v1043_v32 = vsub.f32 1.0, %v8849_v24  ;;  %v1045_v38 = vmul.f32 0.0, %v8849_v24  ;;  %v1733_v24 = vld [vmem:[#allocation8 + $0xa0] sm:$0xff] }
 0x2a8   :  { %v1041_v45 = vadd.f32 %v1040_v62, %v815_v61  ;;  %v11077_v61 = vld [vmem:[#allocation46_spill] sm:$0xff]  ;;  %v11078_v62 = vld [vmem:[#allocation47_spill] sm:$0xff] }
 0x2a9   :  { %v1180_v50 = vpop.f32.mrb[4].mxu0  ;;  %v1251_v23 = vpop.f32.mrb[30].mxu1 }
 0x2aa   :  { %8850 = vtanh.f32 %v1041_v45  ;;  %v8732_v14 = vadd.f32 %v8731_v3, %v1180_v50  ;;  %v1182_v8 = vpop.f32.mrb[5].mxu0  ;;  %v6539_v36 = vpop.f32.mrb[31].mxu1  ;;  %v1252_v55 = vadd.f32 %v1251_v23, %v1110_v47  ;;  %v11079_v45 = vld [vmem:[#allocation48_spill] sm:$0xff]  ;;  %v11080_v3 = vld [vmem:[#allocation49_spill] sm:$0xff]  ;;  %v11081_v50 = vld [vmem:[#allocation50_spill] sm:$0xff] }
 0x2ab   :  { %v8735_v18 = vadd.f32 %v8734_v43, %v1182_v8  ;;  %v1715_v23 = vld [vmem:[#allocation8 + $0x10] sm:$0xff]  ;;  %v1718_v43 = vld [vmem:[#allocation8 + $0x28] sm:$0xff]  ;;  %v1724_v8 = vld [vmem:[#allocation8 + $0x58] sm:$0xff] }
 0x2ac   :  { %v5857_v21 = vmul.f32 -1.442695, %v8732_v14  ;;  %v1721_v14 = vld [vmem:[#allocation8 + $0x40] sm:$0xff]  ;;  %v1730_v36 = vld [vmem:[#allocation8 + $0x88] sm:$0xff]  ;;  %v1756_v47 = vld [vmem:[#allocation8 + $0x158] sm:$0xff] }
 0x2ad   :  { %v5858_v27 = vmul.f32 -1.442695, %v8735_v18 }
 0x2ae   :  { %8852 = vpow2.f32 %v5857_v21  ;;  %v11085_v21 = vld [vmem:[#allocation54_spill] sm:$0xff] }
 0x2af   :  { %8854 = vpow2.f32 %v5858_v27  ;;  %v1736_v27 = vld [vmem:[#allocation8 + $0xb8] sm:$0xff] }
 0x2b4   :  { %v8851_v31 = vpop.eup %8850 }
 0x2b5   :  { %v1044_v37 = vmul.f32 %v8851_v31, %v1043_v32  ;;  %v9703_v32 = vpack.c.bf16 %v1736_v27, %v1733_v24  ;;  %v11086_v31 = vld [vmem:[#allocation55_spill] sm:$0xff]  ;;  %v1962_v24 = vld [vmem:[#allocation6 + $0x220] sm:$0xff] }
 0x2b7   :  { %v9638_v42 = vadd.f32 %v1045_v38, %v1044_v37  ;;  %v1742_v37 = vld [vmem:[#allocation8 + $0xe8] sm:$0xff] }
 0x2b8   :  { %v8853_v44 = vpop.eup %8852 }
 0x2b9   :  { %11066 = vst [vmem:[#allocation56_spill] sm:$0xff] %v9638_v42  ;;  %v1259_v46 = vadd.f32 1.0, %v8853_v44  ;;  %v8855_v52 = vpop.eup %8854  ;;  %v1748_v44 = vld [vmem:[#allocation8 + $0x118] sm:$0xff] }
 0x2ba   :  { %v1266_v51 = vadd.f32 1.0, %v8855_v52  ;;  %v1754_v52 = vld [vmem:[#allocation8 + $0x148] sm:$0xff] }
 0x2bb   :  { %8856 = vrcp.f32 %v1259_v46 }
 0x2bc   :  { %8858 = vrcp.f32 %v1266_v51  ;;  %v1759_v51 = vld [vmem:[#allocation8 + $0x170] sm:$0xff] }
 0x2c5   :  { %v8857_v56 = vpop.eup %8856 }
 0x2c6   :  { %v1269_v59 = vmul.f32 %v8857_v56, %v1252_v55  ;;  %v8859_v2 = vpop.eup %8858  ;;  %v1755_v55 = vld [vmem:[#allocation8 + $0x150] sm:$0xff]  ;;  %v1757_v56 = vld [vmem:[#allocation8 + $0x160] sm:$0xff] }
 0x2c7   :  { %v1272_v7 = vsub.f32 1.0, %v8859_v2  ;;  %v1274_v20 = vmul.f32 %v8859_v2, %v9436_v30  ;;  %v11069_v30 = vld [vmem:[#allocation38_spill] sm:$0xff] }
 0x2c8   :  { %v1270_v63 = vadd.f32 %v1269_v59, %v9416_v39  ;;  %v11068_v39 = vld [vmem:[#allocation37_spill] sm:$0xff]  ;;  %v1760_v59 = vld [vmem:[#allocation8 + $0x178] sm:$0xff] }
 0x2ca   :  { %8860 = vtanh.f32 %v1270_v63 }
 0x2d4   :  { %v8861_v13 = vpop.eup %8860 }
 0x2d5   :  { %v1273_v16 = vmul.f32 %v8861_v13, %v1272_v7  ;;  %v1942_v7 = vld [vmem:[#allocation6 + $0x180] sm:$0xff]  ;;  %v1945_v13 = vld [vmem:[#allocation6 + $0x198] sm:$0xff] }
 0x2d7   :  { %v9643_v33 = vadd.f32 %v1274_v20, %v1273_v16  ;;  %v1944_v16 = vld [vmem:[#allocation6 + $0x190] sm:$0xff]  ;;  %v9745_v20 = vpack.c.bf16 %v1945_v13, %v1942_v7  ;;  %v1975_v7 = vld [vmem:[#allocation6 + $0x288] sm:$0xff]  ;;  %v1974_v13 = vld [vmem:[#allocation6 + $0x280] sm:$0xff] }
 0x2d9   :  { %1408 = vmatmul.mubr.f32.vlgmr.msra.gmra.mrb[6].mxu0 %v9643_v33  ;;  %6573 = vmatmul.mubr.f32.vlgmr.msra.gmra.mrb[32].mxu1 %v9643_v33 }
 0x2da   :  { %7631 = vmatpush1.bf16.msra.mxu0 %v9432_v57  ;;  %7662 = vmatpush3.bf16.msra.mxu1 %v9434_v19  ;;  %v11071_v57 = vld [vmem:[#allocation40_spill] sm:$0xff]  ;;  %v11072_v19 = vld [vmem:[#allocation41_spill] sm:$0xff] }
 0x2db   :  { %7633 = vmatprep.subr.bf16.mxu0 %v11067_v26  ;;  %7663 = vmatprep.subr.bf16.mxu1 %v11047_v1  ;;  %v1947_v26 = vld [vmem:[#allocation6 + $0x1a8] sm:$0xff] }
 0x2dc   :  { %1613 = vmatprep.mubr.f32.mxu0 %v11049_v54  ;;  %6607 = vmatprep.mubr.msk.f32.mxu1 %vm9120_vm0, %v11049_v54 }
 0x2de   :  { %7635 = vmatpush1.bf16.msra.mxu0 %v11068_v39  ;;  %7665 = vmatpush3.bf16.msra.mxu1 %v11069_v30  ;;  %v9748_v39 = vpack.c.bf16 %v1947_v26, %v1944_v16  ;;  %v1949_v30 = vld [vmem:[#allocation6 + $0x1b8] sm:$0xff] }
 0x2df   :  { %7637 = vmatprep.subr.bf16.mxu0 %v11070_v34  ;;  %7666 = vmatprep.subr.bf16.mxu1 %v11047_v1  ;;  %v1952_v34 = vld [vmem:[#allocation6 + $0x1d0] sm:$0xff]  ;;  %v1977_v26 = vld [vmem:[#allocation6 + $0x298] sm:$0xff] }
 0x2e2   :  { %7639 = vmatpush1.bf16.msra.mxu0 %v11071_v57  ;;  %7668 = vmatpush3.bf16.msra.mxu1 %v11072_v19  ;;  %v9752_v57 = vpack.c.bf16 %v1952_v34, %v1949_v30  ;;  %v1948_v19 = vld [vmem:[#allocation6 + $0x1b0] sm:$0xff]  ;;  %v1979_v30 = vld [vmem:[#allocation6 + $0x2a8] sm:$0xff]  ;;  %v1982_v34 = vld [vmem:[#allocation6 + $0x2c0] sm:$0xff] }
 0x2e3   :  { %7641 = vmatprep.subr.bf16.mxu0 %v11073_v41  ;;  %7669 = vmatprep.subr.bf16.mxu1 %v11047_v1  ;;  %v1951_v41 = vld [vmem:[#allocation6 + $0x1c8] sm:$0xff] }
 0x2e6   :  { %7643 = vmatpush1.bf16.msra.mxu0 %v11074_v48  ;;  %7671 = vmatpush3.bf16.msra.mxu1 %v11075_v49  ;;  %v1950_v48 = vld [vmem:[#allocation6 + $0x1c0] sm:$0xff]  ;;  %v9755_v49 = vpack.c.bf16 %v1951_v41, %v1948_v19  ;;  %v9798_v19 = vpack.c.bf16 %v1977_v26, %v1974_v13  ;;  %v9800_v41 = vpack.c.bf16 %v1982_v34, %v1979_v30 }
 0x2e7   :  { %7645 = vmatprep.subr.bf16.mxu0 %v11076_v60  ;;  %7672 = vmatprep.subr.bf16.mxu1 %v11047_v1  ;;  %v1953_v60 = vld [vmem:[#allocation6 + $0x1d8] sm:$0xff] }
 0x2ea   :  { %7647 = vmatpush1.bf16.msra.mxu0 %v11077_v61  ;;  %7674 = vmatpush3.bf16.msra.mxu1 %v11078_v62  ;;  %v9758_v61 = vpack.c.bf16 %v1953_v60, %v1950_v48  ;;  %v1955_v62 = vld [vmem:[#allocation6 + $0x1e8] sm:$0xff]  ;;  %v1978_v48 = vld [vmem:[#allocation6 + $0x2a0] sm:$0xff]  ;;  %v1981_v60 = vld [vmem:[#allocation6 + $0x2b8] sm:$0xff] }
 0x2eb   :  { %7649 = vmatprep.subr.bf16.mxu0 %v11079_v45  ;;  %7675 = vmatprep.subr.bf16.mxu1 %v11047_v1  ;;  %v1958_v45 = vld [vmem:[#allocation6 + $0x200] sm:$0xff] }
 0x2ee   :  { %7651 = vmatpush1.bf16.msra.mxu0 %v9487_v53  ;;  %7677 = vmatpush3.bf16.msra.mxu1 %v9489_v25  ;;  %v9680_v53 = vpack.c.bf16 %v1718_v43, %v1715_v23  ;;  %v11082_v25 = vld [vmem:[#allocation51_spill] sm:$0xff]  ;;  %v1956_v43 = vld [vmem:[#allocation6 + $0x1f0] sm:$0xff] }
 0x2ef   :  { %7653 = vmatprep.subr.bf16.mxu0 %v11080_v3  ;;  %7678 = vmatprep.subr.bf16.mxu1 %v11047_v1  ;;  %v9762_v3 = vpack.c.bf16 %v1958_v45, %v1955_v62  ;;  %v1957_v23 = vld [vmem:[#allocation6 + $0x1f8] sm:$0xff]  ;;  %v1980_v62 = vld [vmem:[#allocation6 + $0x2b0] sm:$0xff]  ;;  %v9803_v45 = vpack.c.bf16 %v1981_v60, %v1978_v48 }
 0x2f2   :  { %7655 = vmatpush1.bf16.msra.mxu0 %v11081_v50  ;;  %7680 = vmatpush3.bf16.msra.mxu1 %v9499_v58  ;;  %v11083_v58 = vld [vmem:[#allocation52_spill] sm:$0xff] }
 0x2f3   :  { %7657 = vmatprep.subr.bf16.mxu0 %v9503_v11  ;;  %7681 = vmatprep.subr.bf16.mxu1 %v11047_v1  ;;  %v9688_v11 = vpack.c.bf16 %v1724_v8, %v1721_v14  ;;  %v1954_v50 = vld [vmem:[#allocation6 + $0x1e0] sm:$0xff]  ;;  %v1959_v14 = vld [vmem:[#allocation6 + $0x208] sm:$0xff] }
 0x2f4   :  { %v9768_v8 = vpack.c.bf16 %v1959_v14, %v1956_v43  ;;  %v1988_v43 = vld [vmem:[#allocation6 + $0x2f0] sm:$0xff] }
 0x2f6   :  { %7659 = vmatpush1.bf16.msra.mxu0 %v9507_v40  ;;  %7683 = vmatpush3.bf16.msra.mxu1 %v9509_v29  ;;  %v11084_v40 = vld [vmem:[#allocation53_spill] sm:$0xff]  ;;  %v1727_v29 = vld [vmem:[#allocation8 + $0x70] sm:$0xff] }
 0x2f7   :  { %7685 = vmatprep.subr.bf16.mxu0 %v11082_v25  ;;  %7716 = vmatprep.subr.bf16.mxu1 %v11047_v1  ;;  %v9697_v18 = vpack.c.bf16 %v1730_v36, %v1727_v29  ;;  %v9765_v25 = vpack.c.bf16 %v1957_v23, %v1954_v50  ;;  %v1960_v36 = vld [vmem:[#allocation6 + $0x210] sm:$0xff]  ;;  %v1983_v50 = vld [vmem:[#allocation6 + $0x2c8] sm:$0xff]  ;;  %v1985_v23 = vld [vmem:[#allocation6 + $0x2d8] sm:$0xff] }
 0x2f8   :  { %v9807_v14 = vpack.c.bf16 %v1983_v50, %v1980_v62 }
 0x2f9   :  { %1614 = vmatmul.mubr.f32.vlgmr.msra.gmra.mrb[6].mxu0 %v9638_v42  ;;  %6608 = vmatmul.mubr.f32.vlgmr.msra.gmra.mrb[34].mxu1 %v9638_v42 }
 0x2fa   :  { %7687 = vmatpush1.bf16.msra.mxu0 %v11083_v58  ;;  %7718 = vmatpush3.bf16.msra.mxu1 %v9680_v53  ;;  %v1961_v58 = vld [vmem:[#allocation6 + $0x218] sm:$0xff] }
 0x2fb   :  { %7689 = vmatprep.subr.bf16.mxu0 %v11084_v40  ;;  %7719 = vmatprep.subr.bf16.mxu1 %v11047_v1  ;;  %v1964_v40 = vld [vmem:[#allocation6 + $0x230] sm:$0xff] }
 0x2fc   :  { %1842 = vmatprep.mubr.f32.mxu0 %v11049_v54  ;;  %6642 = vmatprep.mubr.msk.f32.mxu1 %vm9120_vm0, %v11049_v54  ;;  %v9772_v29 = vpack.c.bf16 %v1964_v40, %v1961_v58  ;;  %v9809_v58 = vpack.c.bf16 %v1988_v43, %v1985_v23  ;;  %v1984_v40 = vld [vmem:[#allocation6 + $0x2d0] sm:$0xff] }
 0x2fe   :  { %7691 = vmatpush1.bf16.msra.mxu0 %v9527_v22  ;;  %7721 = vmatpush3.bf16.msra.mxu1 %v9688_v11  ;;  %v1739_v22 = vld [vmem:[#allocation8 + $0xd0] sm:$0xff] }
 0x2ff   :  { %7693 = vmatprep.subr.bf16.mxu0 %v11085_v21  ;;  %7722 = vmatprep.subr.bf16.mxu1 %v11047_v1  ;;  %v9709_v38 = vpack.c.bf16 %v1742_v37, %v1739_v22  ;;  %v1963_v21 = vld [vmem:[#allocation6 + $0x228] sm:$0xff] }
 0x300   :  { %v9775_v27 = vpack.c.bf16 %v1963_v21, %v1960_v36  ;;  %v1967_v37 = vld [vmem:[#allocation6 + $0x248] sm:$0xff]  ;;  %v1986_v21 = vld [vmem:[#allocation6 + $0x2e0] sm:$0xff] }
 0x301   :  { %v1987_v36 = vld [vmem:[#allocation6 + $0x2e8] sm:$0xff] }
 0x302   :  { %7695 = vmatpush1.bf16.msra.mxu0 %v9538_v5  ;;  %7724 = vmatpush3.bf16.msra.mxu1 %v9697_v18  ;;  %v1745_v5 = vld [vmem:[#allocation8 + $0x100] sm:$0xff] }
 0x303   :  { %7697 = vmatprep.subr.bf16.mxu0 %v11086_v31  ;;  %7725 = vmatprep.subr.bf16.mxu1 %v11047_v1  ;;  %v9715_v46 = vpack.c.bf16 %v1748_v44, %v1745_v5  ;;  %v1965_v31 = vld [vmem:[#allocation6 + $0x238] sm:$0xff]  ;;  %v1970_v5 = vld [vmem:[#allocation6 + $0x260] sm:$0xff] }
 0x304   :  { %v9778_v22 = vpack.c.bf16 %v1965_v31, %v1962_v24  ;;  %v9782_v44 = vpack.c.bf16 %v1970_v5, %v1967_v37  ;;  %v1989_v24 = vld [vmem:[#allocation6 + $0x2f8] sm:$0xff]  ;;  %v2149_v31 = vld [vmem:[#allocation8 + $0x188] sm:$0xff]  ;;  %v2152_v37 = vld [vmem:[#allocation8 + $0x1a0] sm:$0xff]  ;;  %v9813_v5 = vpack.c.bf16 %v1987_v36, %v1984_v40 }
 0x306   :  { %7699 = vmatpush1.bf16.msra.mxu0 %v9546_v6  ;;  %7727 = vmatpush3.bf16.msra.mxu1 %v9703_v32  ;;  %v1751_v6 = vld [vmem:[#allocation8 + $0x130] sm:$0xff] }
 0x307   :  { %7701 = vmatprep.subr.bf16.mxu0 %v9550_v9  ;;  %7728 = vmatprep.subr.bf16.mxu1 %v11047_v1  ;;  %v9721_v9 = vpack.c.bf16 %v1754_v52, %v1751_v6  ;;  %v1966_v6 = vld [vmem:[#allocation6 + $0x240] sm:$0xff]  ;;  %v1969_v52 = vld [vmem:[#allocation6 + $0x258] sm:$0xff] }
 0x30a   :  { %7703 = vmatpush1.bf16.msra.mxu0 %v9554_v28  ;;  %7730 = vmatpush3.bf16.msra.mxu1 %v9709_v38  ;;  %v9725_v28 = vpack.c.bf16 %v1759_v51, %v1756_v47  ;;  %v1968_v47 = vld [vmem:[#allocation6 + $0x250] sm:$0xff]  ;;  %v9785_v51 = vpack.c.bf16 %v1969_v52, %v1966_v6  ;;  %v9817_v6 = vpack.c.bf16 %v1989_v24, %v1986_v21 }
 0x30b   :  { %7705 = vmatprep.subr.bf16.mxu0 %v9558_v12  ;;  %7731 = vmatprep.subr.bf16.mxu1 %v11047_v1  ;;  %v1758_v12 = vld [vmem:[#allocation8 + $0x168] sm:$0xff]  ;;  %v9819_v52 = vpack.c.bf16 %v2152_v37, %v2149_v31 }
 0x30c   :  { %v9729_v63 = vpack.c.bf16 %v1758_v12, %v1755_v55  ;;  %v1971_v55 = vld [vmem:[#allocation6 + $0x268] sm:$0xff] }
 0x30d   :  { %v9788_v12 = vpack.c.bf16 %v1971_v55, %v1968_v47  ;;  %11087 = vst [vmem:[#allocation36_spill] sm:$0xff] %v9819_v52 }
 0x30e   :  { %7707 = vmatpush1.bf16.msra.mxu0 %v9562_v17  ;;  %7733 = vmatpush3.bf16.msra.mxu1 %v9715_v46  ;;  %v9731_v17 = vpack.c.bf16 %v1760_v59, %v1757_v56  ;;  %v1973_v56 = vld [vmem:[#allocation6 + $0x278] sm:$0xff]  ;;  %v1976_v59 = vld [vmem:[#allocation6 + $0x290] sm:$0xff] }
 0x30f   :  { %7709 = vmatprep.subr.bf16.mxu0 %v9566_v15  ;;  %7734 = vmatprep.subr.bf16.mxu1 %v11047_v1  ;;  %v1943_v15 = vld [vmem:[#allocation6 + $0x188] sm:$0xff] }
 0x312   :  { %7711 = vmatpush1.bf16.msra.mxu0 %v9570_v35  ;;  %7736 = vmatpush3.bf16.msra.mxu1 %v9721_v9  ;;  %v1946_v35 = vld [vmem:[#allocation6 + $0x1a0] sm:$0xff] }
 0x313   :  { %7713 = vmatprep.subr.bf16.mxu0 %v9725_v28  ;;  %7737 = vmatprep.subr.bf16.mxu1 %v11047_v1  ;;  %v9743_v2 = vpack.c.bf16 %v1946_v35, %v1943_v15  ;;  %v9792_v15 = vpack.c.bf16 %v1976_v59, %v1973_v56  ;;  %v1972_v35 = vld [vmem:[#allocation6 + $0x270] sm:$0xff]  ;;  %v5860_v56 = vld [vmem:[%s10938_s4 + $0x3] sm:$0x7] }
 0x314   :  { %v9795_v16 = vpack.c.bf16 %v1975_v7, %v1972_v35  ;;  %v5859_v59 = vld [vmem:[%s10937_s3 + $0x3] sm:$0x7]  ;;  %v1537_v7 = vrot.slane %v5860_v56, %v9367_v4  ;;  %v1541_v26 = vrot.slane %v5860_v56, %v9372_v10  ;;  %v1545_v37 = vrot.slane %v5860_v56, %v9407_v0 }
 0x315   :  { %v1331_v35 = vrot.slane %v5859_v59, %v9367_v4  ;;  %v1335_v13 = vrot.slane %v5859_v59, %v9372_v10 }
 0x316   :  { %7715 = vmatpush1.bf16.msra.mxu0 %v9729_v63  ;;  %7739 = vmatpush3.bf16.msra.mxu1 %v9731_v17 }
 0x317   :  { %7772 = vmatprep.subr.bf16.mxu1 %v11047_v1  ;;  %7741 = vmatprep.subr.bf16.mxu0 %v9743_v2  ;;  %v8776_v30 = vadd.f32 %v1537_v7, %v1331_v35  ;;  %v8778_v60 = vadd.f32 %v1541_v26, %v1335_v13  ;;  %v1339_v35 = vrot.slane %v5859_v59, %v9407_v0 }
 0x319   :  { %1843 = vmatmul.mubr.f32.vlgmr.msra.gmra.mrb[8].mxu0 %v9643_v33  ;;  %6643 = vmatmul.mubr.f32.vlgmr.msra.gmra.mrb[36].mxu1 %v9643_v33 }
 0x31a   :  { %2071 = vmatprep.mubr.f32.mxu0 %v11049_v54  ;;  %6677 = vmatprep.mubr.msk.f32.mxu1 %vm9120_vm0, %v11049_v54 }
 0x31b   :  { %7743 = vmatpush1.bf16.msra.mxu0 %v9745_v20  ;;  %7774 = vmatpush3.bf16.msra.mxu1 %v9748_v39 }
 0x31c   :  { %7775 = vmatprep.subr.bf16.mxu1 %v11047_v1  ;;  %7745 = vmatprep.subr.bf16.mxu0 %v9752_v57 }
 0x31f   :  { %7747 = vmatpush1.bf16.msra.mxu0 %v9755_v49  ;;  %7777 = vmatpush3.bf16.msra.mxu1 %v9758_v61 }
 0x320   :  { %7778 = vmatprep.subr.bf16.mxu1 %v11047_v1  ;;  %7749 = vmatprep.subr.bf16.mxu0 %v9762_v3 }
 0x323   :  { %7751 = vmatpush1.bf16.msra.mxu0 %v9765_v25  ;;  %7780 = vmatpush3.bf16.msra.mxu1 %v9768_v8 }
 0x324   :  { %7781 = vmatprep.subr.bf16.mxu1 %v11047_v1  ;;  %7753 = vmatprep.subr.bf16.mxu0 %v9772_v29 }
 0x327   :  { %7755 = vmatpush1.bf16.msra.mxu0 %v9775_v27  ;;  %7783 = vmatpush3.bf16.msra.mxu1 %v9778_v22 }
 0x328   :  { %7784 = vmatprep.subr.bf16.mxu1 %v11047_v1  ;;  %7757 = vmatprep.subr.bf16.mxu0 %v9782_v44 }
 0x32b   :  { %7759 = vmatpush1.bf16.msra.mxu0 %v9785_v51  ;;  %7786 = vmatpush3.bf16.msra.mxu1 %v9788_v12 }
 0x32c   :  { %7787 = vmatprep.subr.bf16.mxu1 %v11047_v1  ;;  %7761 = vmatprep.subr.bf16.mxu0 %v9792_v15 }
 0x32f   :  { %7763 = vmatpush1.bf16.msra.mxu0 %v9795_v16  ;;  %7789 = vmatpush3.bf16.msra.mxu1 %v9798_v19 }
 0x330   :  { %7765 = vmatprep.subr.bf16.mxu0 %v9800_v41  ;;  %7790 = vmatprep.subr.bf16.mxu1 %v11047_v1 }
 0x333   :  { %7767 = vmatpush1.bf16.msra.mxu0 %v9803_v45  ;;  %7792 = vmatpush3.bf16.msra.mxu1 %v9807_v14 }
 0x334   :  { %7769 = vmatprep.subr.bf16.mxu0 %v9809_v58  ;;  %7793 = vmatprep.subr.bf16.mxu1 %v11047_v1 }
 0x337   :  { %7771 = vmatpush1.bf16.msra.mxu0 %v9813_v5  ;;  %7795 = vmatpush3.bf16.msra.mxu1 %v9817_v6 }
 0x338   :  { %7797 = vmatprep.subr.bf16.mxu0 %v9819_v52  ;;  %7828 = vmatprep.subr.bf16.mxu1 %v11047_v1 }
 0x3ac   :  { %v1480_v47 = vpop.f32.mrb[32].mxu1 }
 0x3ad   :  { %v6574_v55 = vpop.f32.mrb[33].mxu1 }
 0x3ae   :  { %v1761_v55 = vld [vmem:[%s10938_s4] sm:$0x7] }
 0x3af   :  { %v1766_v26 = vrot.slane %v1761_v55, %v9367_v4 }
 0x3cc   :  { %v1615_v34 = vpop.f32.mrb[6].mxu0  ;;  %v1686_v48 = vpop.f32.mrb[34].mxu1 }
 0x3cd   :  { %v8777_v62 = vadd.f32 %v8776_v30, %v1615_v34  ;;  %v1617_v50 = vpop.f32.mrb[7].mxu0  ;;  %v6609_v23 = vpop.f32.mrb[35].mxu1  ;;  %v1687_v13 = vadd.f32 %v1686_v48, %v1545_v37  ;;  %v1770_v34 = vrot.slane %v1761_v55, %v9372_v10 }
 0x3ce   :  { %v8779_v40 = vadd.f32 %v8778_v60, %v1617_v50  ;;  %v1481_v60 = vadd.f32 %v1480_v47, %v1339_v35  ;;  %v11088_v23 = vld [vmem:[#allocation18_spill] sm:$0xff] }
 0x3cf   :  { %v5861_v43 = vmul.f32 -1.442695, %v8777_v62 }
 0x3d0   :  { %v5862_v36 = vmul.f32 -1.442695, %v8779_v40 }
 0x3d1   :  { %8862 = vpow2.f32 %v5861_v43  ;;  %v8737_v43 = vadd.f32 %v1766_v26, %v11088_v23 }
 0x3d2   :  { %8864 = vpow2.f32 %v5862_v36  ;;  %v11089_v36 = vld [vmem:[#allocation19_spill] sm:$0xff] }
 0x3db   :  { %v8863_v21 = vpop.eup %8862 }
 0x3dc   :  { %v1694_v24 = vadd.f32 1.0, %v8863_v21  ;;  %v8865_v31 = vpop.eup %8864  ;;  %v8740_v21 = vadd.f32 %v1770_v34, %v11089_v36 }
 0x3dd   :  { %v1701_v7 = vadd.f32 1.0, %v8865_v31 }
 0x3de   :  { %8866 = vrcp.f32 %v1694_v24 }
 0x3df   :  { %8868 = vrcp.f32 %v1701_v7 }
 0x3e8   :  { %v8867_v30 = vpop.eup %8866 }
 0x3e9   :  { %v1704_v62 = vmul.f32 %v8867_v30, %v1687_v13  ;;  %v8869_v4 = vpop.eup %8868 }
 0x3ea   :  { %v1707_v10 = vsub.f32 1.0, %v8869_v4  ;;  %v1709_v7 = vmul.f32 %v8869_v4, %v9638_v42  ;;  %v2151_v4 = vld [vmem:[#allocation8 + $0x198] sm:$0xff] }
 0x3eb   :  { %v1705_v50 = vadd.f32 %v1704_v62, %v1481_v60  ;;  %v1774_v60 = vrot.slane %v1761_v55, %v9407_v0  ;;  %v2183_v42 = vld [vmem:[#allocation8 + $0x298] sm:$0xff] }
 0x3ec   :  { %v1844_v56 = vpop.f32.mrb[8].mxu0  ;;  %v1915_v40 = vpop.f32.mrb[36].mxu1 }
 0x3ed   :  { %8870 = vtanh.f32 %v1705_v50  ;;  %v8738_v24 = vadd.f32 %v8737_v43, %v1844_v56  ;;  %v1846_v59 = vpop.f32.mrb[9].mxu0  ;;  %v6644_v31 = vpop.f32.mrb[37].mxu1  ;;  %v1916_v50 = vadd.f32 %v1915_v40, %v1774_v60  ;;  %v11091_v56 = vld [vmem:[#allocation31_spill] sm:$0xff]  ;;  %v2156_v60 = vld [vmem:[#allocation8 + $0x1c0] sm:$0xff] }
 0x3ee   :  { %v8741_v48 = vadd.f32 %v8740_v21, %v1846_v59  ;;  %v2153_v59 = vld [vmem:[#allocation8 + $0x1a8] sm:$0xff] }
 0x3ef   :  { %v5863_v37 = vmul.f32 -1.442695, %v8738_v24  ;;  %v2150_v24 = vld [vmem:[#allocation8 + $0x190] sm:$0xff] }
 0x3f0   :  { %v5864_v52 = vmul.f32 -1.442695, %v8741_v48  ;;  %v2155_v48 = vld [vmem:[#allocation8 + $0x1b8] sm:$0xff]  ;;  %v9853_v40 = vpack.c.bf16 %v2153_v59, %v2150_v24  ;;  %v2170_v24 = vld [vmem:[#allocation8 + $0x230] sm:$0xff] }
 0x3f1   :  { %8872 = vpow2.f32 %v5863_v37  ;;  %v2158_v37 = vld [vmem:[#allocation8 + $0x1d0] sm:$0xff] }
 0x3f2   :  { %8874 = vpow2.f32 %v5864_v52 }
 0x3f7   :  { %v8871_v47 = vpop.eup %8870 }
 0x3f8   :  { %v1708_v35 = vmul.f32 %v8871_v47, %v1707_v10  ;;  %v2148_v10 = vld [vmem:[#allocation8 + $0x180] sm:$0xff] }
 0x3fa   :  { %v9846_v13 = vadd.f32 %v1709_v7, %v1708_v35  ;;  %v9851_v35 = vpack.c.bf16 %v2151_v4, %v2148_v10  ;;  %v2154_v7 = vld [vmem:[#allocation8 + $0x1b0] sm:$0xff]  ;;  %v2167_v4 = vld [vmem:[#allocation8 + $0x218] sm:$0xff] }
 0x3fb   :  { %v8873_v26 = vpop.eup %8872  ;;  %v2162_v10 = vld [vmem:[#allocation8 + $0x1f0] sm:$0xff] }
 0x3fc   :  { %11090 = vst [vmem:[#allocation37_spill] sm:$0xff] %v9846_v13  ;;  %v1923_v30 = vadd.f32 1.0, %v8873_v26  ;;  %v8875_v34 = vpop.eup %8874 }
 0x3fd   :  { %v1930_v62 = vadd.f32 1.0, %v8875_v34  ;;  %v2157_v34 = vld [vmem:[#allocation8 + $0x1c8] sm:$0xff] }
 0x3fe   :  { %8876 = vrcp.f32 %v1923_v30  ;;  %v9857_v30 = vpack.c.bf16 %v2158_v37, %v2155_v48  ;;  %v2166_v48 = vld [vmem:[#allocation8 + $0x210] sm:$0xff]  ;;  %v9882_v37 = vpack.c.bf16 %v2170_v24, %v2167_v4  ;;  %v2179_v4 = vld [vmem:[#allocation8 + $0x278] sm:$0xff] }
 0x3ff   :  { %8878 = vrcp.f32 %v1930_v62  ;;  %v2159_v62 = vld [vmem:[#allocation8 + $0x1d8] sm:$0xff]  ;;  %v2182_v24 = vld [vmem:[#allocation8 + $0x290] sm:$0xff] }
 0x400   :  { %11093 = vst [vmem:[#allocation39_spill] sm:$0xff] %v9882_v37 }
 0x408   :  { %v8877_v23 = vpop.eup %8876 }
 0x409   :  { %v1933_v43 = vmul.f32 %v8877_v23, %v1916_v50  ;;  %v8879_v52 = vpop.eup %8878  ;;  %v2161_v50 = vld [vmem:[#allocation8 + $0x1e8] sm:$0xff]  ;;  %v2164_v23 = vld [vmem:[#allocation8 + $0x200] sm:$0xff] }
 0x40a   :  { %v1936_v21 = vsub.f32 1.0, %v8879_v52  ;;  %v1938_v55 = vmul.f32 %v8879_v52, %v9643_v33  ;;  %v9863_v33 = vpack.c.bf16 %v2157_v34, %v2154_v7  ;;  %v2163_v52 = vld [vmem:[#allocation8 + $0x1f8] sm:$0xff]  ;;  %v2173_v34 = vld [vmem:[#allocation8 + $0x248] sm:$0xff] }
 0x40b   :  { %v1934_v36 = vadd.f32 %v1933_v43, %v11091_v56  ;;  %v9865_v43 = vpack.c.bf16 %v2159_v62, %v2156_v60  ;;  %v2160_v56 = vld [vmem:[#allocation8 + $0x1e0] sm:$0xff]  ;;  %v2171_v7 = vld [vmem:[#allocation8 + $0x238] sm:$0xff] }
 0x40c   :  { %v9876_v59 = vpack.c.bf16 %v2163_v52, %v2160_v56  ;;  %v2176_v60 = vld [vmem:[#allocation8 + $0x260] sm:$0xff]  ;;  %v2175_v52 = vld [vmem:[#allocation8 + $0x258] sm:$0xff] }
 0x40d   :  { %8880 = vtanh.f32 %v1934_v36  ;;  %v9869_v36 = vpack.c.bf16 %v2164_v23, %v2161_v50  ;;  %v2172_v23 = vld [vmem:[#allocation8 + $0x240] sm:$0xff]  ;;  %v9892_v56 = vpack.c.bf16 %v2176_v60, %v2173_v34  ;;  %v2181_v34 = vld [vmem:[#allocation8 + $0x288] sm:$0xff] }
 0x40e   :  { %v2180_v60 = vld [vmem:[#allocation8 + $0x280] sm:$0xff] }
 0x40f   :  { %11096 = vst [vmem:[#allocation42_spill] sm:$0xff] %v9892_v56 }
 0x417   :  { %v8881_v31 = vpop.eup %8880 }
 0x418   :  { %v1937_v47 = vmul.f32 %v8881_v31, %v1936_v21  ;;  %v2165_v21 = vld [vmem:[#allocation8 + $0x208] sm:$0xff] }
 0x419   :  { %v9878_v31 = vpack.c.bf16 %v2165_v21, %v2162_v10  ;;  %v2174_v10 = vld [vmem:[#allocation8 + $0x250] sm:$0xff]  ;;  %v2177_v21 = vld [vmem:[#allocation8 + $0x268] sm:$0xff] }
 0x41a   :  { %v9855_v26 = vadd.f32 %v1938_v55, %v1937_v47  ;;  %v2169_v47 = vld [vmem:[#allocation8 + $0x228] sm:$0xff]  ;;  %v2168_v55 = vld [vmem:[#allocation8 + $0x220] sm:$0xff] }
 0x41b   :  { %11092 = vst [vmem:[#allocation38_spill] sm:$0xff] %v9878_v31  ;;  %v9886_v62 = vpack.c.bf16 %v2169_v47, %v2166_v48  ;;  %v9888_v50 = vpack.c.bf16 %v2171_v7, %v2168_v55  ;;  %v9896_v48 = vpack.c.bf16 %v2175_v52, %v2172_v23  ;;  %v9898_v47 = vpack.c.bf16 %v2177_v21, %v2174_v10  ;;  %v2178_v55 = vld [vmem:[#allocation8 + $0x270] sm:$0xff]  ;;  %v2184_v10 = vld [vmem:[#allocation8 + $0x2a0] sm:$0xff] }
 0x41c   :  { %2072 = vmatmul.mubr.f32.vlgmr.msra.gmra.mrb[10].mxu0 %v9855_v26  ;;  %6678 = vmatmul.mubr.f32.vlgmr.msra.gmra.mrb[38].mxu1 %v9855_v26  ;;  %v9902_v7 = vpack.c.bf16 %v2182_v24, %v2179_v4  ;;  %v9906_v23 = vpack.c.bf16 %v2181_v34, %v2178_v55  ;;  %v9908_v52 = vpack.c.bf16 %v2183_v42, %v2180_v60  ;;  %v2187_v4 = vld [vmem:[#allocation8 + $0x2b8] sm:$0xff]  ;;  %v2186_v24 = vld [vmem:[#allocation8 + $0x2b0] sm:$0xff]  ;;  %v2192_v60 = vld [vmem:[#allocation8 + $0x2e0] sm:$0xff] }
 0x41d   :  { %7799 = vmatpush1.bf16.msra.mxu0 %v9851_v35  ;;  %7830 = vmatpush3.bf16.msra.mxu1 %v9853_v40  ;;  %11094 = vst [vmem:[#allocation40_spill] sm:$0xff] %v9886_v62  ;;  %11095 = vst [vmem:[#allocation41_spill] sm:$0xff] %v9888_v50  ;;  %v9916_v55 = vpack.c.bf16 %v2187_v4, %v2184_v10  ;;  %v2190_v34 = vld [vmem:[#allocation8 + $0x2d0] sm:$0xff] }
 0x41e   :  { %7801 = vmatprep.subr.bf16.mxu0 %v9857_v30  ;;  %7831 = vmatprep.subr.bf16.mxu1 %v11047_v1  ;;  %11097 = vst [vmem:[#allocation43_spill] sm:$0xff] %v9896_v48  ;;  %11098 = vst [vmem:[#allocation44_spill] sm:$0xff] %v9898_v47 }
 0x41f   :  { %2277 = vmatprep.mubr.f32.mxu0 %v11049_v54  ;;  %6712 = vmatprep.mubr.msk.f32.mxu1 %vm9120_vm0, %v11049_v54  ;;  %11099 = vst [vmem:[#allocation45_spill] sm:$0xff] %v9902_v7  ;;  %11101 = vst [vmem:[#allocation47_spill] sm:$0xff] %v9916_v55 }
 0x421   :  { %7803 = vmatpush1.bf16.msra.mxu0 %v9863_v33  ;;  %7833 = vmatpush3.bf16.msra.mxu1 %v9865_v43 }
 0x422   :  { %7805 = vmatprep.subr.bf16.mxu0 %v9869_v36  ;;  %7834 = vmatprep.subr.bf16.mxu1 %v11047_v1 }
 0x425   :  { %7807 = vmatpush1.bf16.msra.mxu0 %v9876_v59  ;;  %7836 = vmatpush3.bf16.msra.mxu1 %v9878_v31  ;;  %v2188_v31 = vld [vmem:[#allocation8 + $0x2c0] sm:$0xff] }
 0x426   :  { %7809 = vmatprep.subr.bf16.mxu0 %v9882_v37  ;;  %7837 = vmatprep.subr.bf16.mxu1 %v11047_v1  ;;  %v2185_v37 = vld [vmem:[#allocation8 + $0x2a8] sm:$0xff] }
 0x427   :  { %v9912_v21 = vpack.c.bf16 %v2188_v31, %v2185_v37  ;;  %v2193_v37 = vld [vmem:[#allocation8 + $0x2e8] sm:$0xff] }
 0x428   :  { %v9926_v10 = vpack.c.bf16 %v2193_v37, %v2190_v34  ;;  %v2383_v34 = vld [vmem:[#allocation8 + $0x30] sm:$0xff]  ;;  %v2386_v37 = vld [vmem:[#allocation8 + $0x48] sm:$0xff] }
 0x429   :  { %7811 = vmatpush1.bf16.msra.mxu0 %v9886_v62  ;;  %7839 = vmatpush3.bf16.msra.mxu1 %v9888_v50  ;;  %11100 = vst [vmem:[#allocation46_spill] sm:$0xff] %v9912_v21  ;;  %v2191_v50 = vld [vmem:[#allocation8 + $0x2d8] sm:$0xff]  ;;  %v2194_v62 = vld [vmem:[#allocation8 + $0x2f0] sm:$0xff] }
 0x42a   :  { %7813 = vmatprep.subr.bf16.mxu0 %v9892_v56  ;;  %7840 = vmatprep.subr.bf16.mxu1 %v11047_v1  ;;  %v2189_v56 = vld [vmem:[#allocation8 + $0x2c8] sm:$0xff]  ;;  %v9922_v31 = vpack.c.bf16 %v2194_v62, %v2191_v50  ;;  %v2377_v62 = vld [vmem:[#allocation8] sm:$0xff]  ;;  %v2380_v50 = vld [vmem:[#allocation8 + $0x18] sm:$0xff] }
 0x42b   :  { %v9918_v42 = vpack.c.bf16 %v2189_v56, %v2186_v24  ;;  %v2384_v24 = vld [vmem:[#allocation8 + $0x38] sm:$0xff] }
 0x42d   :  { %7815 = vmatpush1.bf16.msra.mxu0 %v9896_v48  ;;  %7842 = vmatpush3.bf16.msra.mxu1 %v9898_v47  ;;  %v2378_v47 = vld [vmem:[#allocation8 + $0x8] sm:$0xff]  ;;  %v2381_v48 = vld [vmem:[#allocation8 + $0x20] sm:$0xff] }
 0x42e   :  { %7817 = vmatprep.subr.bf16.mxu0 %v9902_v7  ;;  %7843 = vmatprep.subr.bf16.mxu1 %v11047_v1  ;;  %v2195_v7 = vld [vmem:[#allocation8 + $0x2f8] sm:$0xff]  ;;  %v9932_v4 = vpack.c.bf16 %v2381_v48, %v2378_v47  ;;  %v2390_v48 = vld [vmem:[#allocation8 + $0x68] sm:$0xff]  ;;  %v2393_v47 = vld [vmem:[#allocation8 + $0x80] sm:$0xff] }
 0x42f   :  { %v9928_v56 = vpack.c.bf16 %v2195_v7, %v2192_v60  ;;  %v9946_v60 = vpack.c.bf16 %v2386_v37, %v2383_v34  ;;  %v2395_v37 = vld [vmem:[#allocation8 + $0x90] sm:$0xff] }
 0x430   :  { %11102 = vst [vmem:[#allocation48_spill] sm:$0xff] %v9932_v4 }
 0x431   :  { %7819 = vmatpush1.bf16.msra.mxu0 %v9906_v23  ;;  %7845 = vmatpush3.bf16.msra.mxu1 %v9908_v52 }
 0x432   :  { %7821 = vmatprep.subr.bf16.mxu0 %v9912_v21  ;;  %7846 = vmatprep.subr.bf16.mxu1 %v11047_v1  ;;  %v2387_v21 = vld [vmem:[#allocation8 + $0x50] sm:$0xff] }
 0x433   :  { %v9940_v7 = vpack.c.bf16 %v2387_v21, %v2384_v24  ;;  %v9950_v21 = vpack.c.bf16 %v2393_v47, %v2390_v48  ;;  %v2396_v24 = vld [vmem:[#allocation8 + $0x98] sm:$0xff]  ;;  %v2398_v48 = vld [vmem:[#allocation8 + $0xa8] sm:$0xff] }
 0x434   :  { %v2402_v47 = vld [vmem:[#allocation8 + $0xc8] sm:$0xff] }
 0x435   :  { %7823 = vmatpush1.bf16.msra.mxu0 %v9916_v55  ;;  %7848 = vmatpush3.bf16.msra.mxu1 %v9918_v42  ;;  %v9936_v55 = vpack.c.bf16 %v2380_v50, %v2377_v62  ;;  %11104 = vst [vmem:[#allocation50_spill] sm:$0xff] %v9940_v7  ;;  %11105 = vst [vmem:[#allocation51_spill] sm:$0xff] %v9950_v21  ;;  %v2389_v62 = vld [vmem:[#allocation8 + $0x60] sm:$0xff]  ;;  %v2392_v50 = vld [vmem:[#allocation8 + $0x78] sm:$0xff] }
 0x436   :  { %7825 = vmatprep.subr.bf16.mxu0 %v9922_v31  ;;  %7849 = vmatprep.subr.bf16.mxu1 %v11047_v1 }
 0x437   :  { %11103 = vst [vmem:[#allocation49_spill] sm:$0xff] %v9936_v55 }
 0x439   :  { %7827 = vmatpush1.bf16.msra.mxu0 %v9926_v10  ;;  %7851 = vmatpush3.bf16.msra.mxu1 %v9928_v56 }
 0x43a   :  { %7853 = vmatprep.subr.bf16.mxu0 %v9932_v4  ;;  %7884 = vmatprep.subr.bf16.mxu1 %v11047_v1  ;;  %v2399_v4 = vld [vmem:[#allocation8 + $0xb0] sm:$0xff] }
 0x43b   :  { %v9961_v34 = vpack.c.bf16 %v2399_v4, %v2396_v24  ;;  %v2408_v4 = vld [vmem:[#allocation8 + $0xf8] sm:$0xff]  ;;  %v2411_v24 = vld [vmem:[#allocation8 + $0x110] sm:$0xff] }
 0x43c   :  { %2278 = vmatmul.mubr.f32.vlgmr.msra.gmra.mrb[10].mxu0 %v9846_v13  ;;  %6713 = vmatmul.mubr.f32.vlgmr.msra.gmra.mrb[40].mxu1 %v9846_v13 }
 0x43d   :  { %7855 = vmatpush1.bf16.msra.mxu0 %v9936_v55  ;;  %7886 = vmatpush3.bf16.msra.mxu1 %v9680_v53  ;;  %v9957_v53 = vpack.c.bf16 %v2392_v50, %v2389_v62  ;;  %11106 = vst [vmem:[#allocation52_spill] sm:$0xff] %v9961_v34  ;;  %v9965_v55 = vpack.c.bf16 %v2398_v48, %v2395_v37  ;;  %v2401_v62 = vld [vmem:[#allocation8 + $0xc0] sm:$0xff]  ;;  %v2404_v50 = vld [vmem:[#allocation8 + $0xd8] sm:$0xff]  ;;  %v2407_v37 = vld [vmem:[#allocation8 + $0xf0] sm:$0xff] }
 0x43e   :  { %7857 = vmatprep.subr.bf16.mxu0 %v9940_v7  ;;  %7887 = vmatprep.subr.bf16.mxu1 %v11047_v1  ;;  %v2405_v7 = vld [vmem:[#allocation8 + $0xe0] sm:$0xff]  ;;  %v2410_v48 = vld [vmem:[#allocation8 + $0x108] sm:$0xff] }
 0x43f   :  { %2506 = vmatprep.mubr.f32.mxu0 %v11049_v54  ;;  %6747 = vmatprep.mubr.msk.f32.mxu1 %vm9120_vm0, %v11049_v54 }
 0x441   :  { %7859 = vmatpush1.bf16.msra.mxu0 %v9946_v60  ;;  %7889 = vmatpush3.bf16.msra.mxu1 %v9688_v11  ;;  %v9969_v11 = vpack.c.bf16 %v2405_v7, %v2402_v47  ;;  %v2414_v7 = vld [vmem:[#allocation8 + $0x128] sm:$0xff]  ;;  %v2417_v47 = vld [vmem:[#allocation8 + $0x140] sm:$0xff] }
 0x442   :  { %7861 = vmatprep.subr.bf16.mxu0 %v9950_v21  ;;  %7890 = vmatprep.subr.bf16.mxu1 %v11047_v1  ;;  %v9973_v21 = vpack.c.bf16 %v2404_v50, %v2401_v62  ;;  %v2413_v62 = vld [vmem:[#allocation8 + $0x120] sm:$0xff]  ;;  %v2416_v50 = vld [vmem:[#allocation8 + $0x138] sm:$0xff] }
 0x445   :  { %7863 = vmatpush1.bf16.msra.mxu0 %v9957_v53  ;;  %7892 = vmatpush3.bf16.msra.mxu1 %v9697_v18  ;;  %v9977_v18 = vpack.c.bf16 %v2411_v24, %v2408_v4  ;;  %v9989_v4 = vpack.c.bf16 %v2416_v50, %v2413_v62  ;;  %v11110_v62 = vld [vmem:[#allocation20_spill] sm:$0xff] }
 0x446   :  { %7865 = vmatprep.subr.bf16.mxu0 %v9961_v34  ;;  %7893 = vmatprep.subr.bf16.mxu1 %v11047_v1  ;;  %v9981_v34 = vpack.c.bf16 %v2410_v48, %v2407_v37 }
 0x449   :  { %7867 = vmatpush1.bf16.msra.mxu0 %v9965_v55  ;;  %7895 = vmatpush3.bf16.msra.mxu1 %v9703_v32  ;;  %v9985_v32 = vpack.c.bf16 %v2417_v47, %v2414_v7 }
 0x44a   :  { %7869 = vmatprep.subr.bf16.mxu0 %v9969_v11  ;;  %7896 = vmatprep.subr.bf16.mxu1 %v11047_v1 }
 0x44d   :  { %7871 = vmatpush1.bf16.msra.mxu0 %v9973_v21  ;;  %7898 = vmatpush3.bf16.msra.mxu1 %v9709_v38  ;;  %v11107_v38 = vld [vmem:[#allocation36_spill] sm:$0xff] }
 0x44e   :  { %7873 = vmatprep.subr.bf16.mxu0 %v9977_v18  ;;  %7899 = vmatprep.subr.bf16.mxu1 %v11047_v1 }
 0x451   :  { %7875 = vmatpush1.bf16.msra.mxu0 %v9981_v34  ;;  %7901 = vmatpush3.bf16.msra.mxu1 %v9715_v46 }
 0x452   :  { %7877 = vmatprep.subr.bf16.mxu0 %v9985_v32  ;;  %7902 = vmatprep.subr.bf16.mxu1 %v11047_v1 }
 0x455   :  { %7879 = vmatpush1.bf16.msra.mxu0 %v9989_v4  ;;  %7904 = vmatpush3.bf16.msra.mxu1 %v9721_v9 }
 0x456   :  { %7881 = vmatprep.subr.bf16.mxu0 %v9725_v28  ;;  %7905 = vmatprep.subr.bf16.mxu1 %v11047_v1  ;;  %v5866_v28 = vld [vmem:[%s10938_s4 + $0x3] sm:$0x7] }
 0x459   :  { %7883 = vmatpush1.bf16.msra.mxu0 %v9729_v63  ;;  %7907 = vmatpush3.bf16.msra.mxu1 %v9731_v17  ;;  %v5865_v63 = vld [vmem:[%s10937_s3 + $0x3] sm:$0x7] }
 0x45a   :  { %7909 = vmatprep.subr.bf16.mxu0 %v9743_v2  ;;  %7940 = vmatprep.subr.bf16.mxu1 %v11047_v1  ;;  %v11108_v17 = vld [vmem:[#allocation16_spill] sm:$0xff] }
 0x45b   :  { %v1995_v2 = vrot.slane %v5865_v63, %v11108_v17 }
 0x45c   :  { %2507 = vmatmul.mubr.f32.vlgmr.msra.gmra.mrb[12].mxu0 %v9855_v26  ;;  %6748 = vmatmul.mubr.f32.vlgmr.msra.gmra.mrb[42].mxu1 %v9855_v26 }
 0x45d   :  { %7911 = vmatpush1.bf16.msra.mxu0 %v9745_v20  ;;  %7942 = vmatpush3.bf16.msra.mxu1 %v9748_v39  ;;  %v2201_v20 = vrot.slane %v5866_v28, %v11108_v17  ;;  %v11109_v39 = vld [vmem:[#allocation17_spill] sm:$0xff] }
 0x45e   :  { %7913 = vmatprep.subr.bf16.mxu0 %v9752_v57  ;;  %7943 = vmatprep.subr.bf16.mxu1 %v11047_v1  ;;  %v1999_v57 = vrot.slane %v5865_v63, %v11109_v39 }
 0x45f   :  { %2735 = vmatprep.mubr.f32.mxu0 %v11049_v54  ;;  %6782 = vmatprep.mubr.msk.f32.mxu1 %vm9120_vm0, %v11049_v54 }
 0x461   :  { %7915 = vmatpush1.bf16.msra.mxu0 %v9755_v49  ;;  %7945 = vmatpush3.bf16.msra.mxu1 %v9758_v61  ;;  %v2205_v49 = vrot.slane %v5866_v28, %v11109_v39  ;;  %v8780_v61 = vadd.f32 %v2201_v20, %v1995_v2 }
 0x462   :  { %7917 = vmatprep.subr.bf16.mxu0 %v9762_v3  ;;  %7946 = vmatprep.subr.bf16.mxu1 %v11047_v1 }
 0x465   :  { %7919 = vmatpush1.bf16.msra.mxu0 %v9765_v25  ;;  %7948 = vmatpush3.bf16.msra.mxu1 %v9768_v8  ;;  %v8782_v8 = vadd.f32 %v2205_v49, %v1999_v57 }
 0x466   :  { %7921 = vmatprep.subr.bf16.mxu0 %v9772_v29  ;;  %7949 = vmatprep.subr.bf16.mxu1 %v11047_v1 }
 0x469   :  { %7923 = vmatpush1.bf16.msra.mxu0 %v9775_v27  ;;  %7951 = vmatpush3.bf16.msra.mxu1 %v9778_v22 }
 0x46a   :  { %7925 = vmatprep.subr.bf16.mxu0 %v9782_v44  ;;  %7952 = vmatprep.subr.bf16.mxu1 %v11047_v1 }
 0x46d   :  { %7927 = vmatpush1.bf16.msra.mxu0 %v9785_v51  ;;  %7954 = vmatpush3.bf16.msra.mxu1 %v9788_v12 }
 0x46e   :  { %7929 = vmatprep.subr.bf16.mxu0 %v9792_v15  ;;  %7955 = vmatprep.subr.bf16.mxu1 %v11047_v1 }
 0x471   :  { %7931 = vmatpush1.bf16.msra.mxu0 %v9795_v16  ;;  %7957 = vmatpush3.bf16.msra.mxu1 %v9798_v19 }
 0x472   :  { %7933 = vmatprep.subr.bf16.mxu0 %v9800_v41  ;;  %7958 = vmatprep.subr.bf16.mxu1 %v11047_v1  ;;  %v2209_v41 = vrot.slane %v5866_v28, %v9407_v0  ;;  %v11111_v28 = vld [vmem:[#allocation21_spill] sm:$0xff] }
 0x475   :  { %7935 = vmatpush1.bf16.msra.mxu0 %v9803_v45  ;;  %7960 = vmatpush3.bf16.msra.mxu1 %v9807_v14  ;;  %v2425_v45 = vld [vmem:[%s10938_s4] sm:$0x7]  ;;  %v2003_v14 = vrot.slane %v5865_v63, %v9407_v0 }
 0x476   :  { %7937 = vmatprep.subr.bf16.mxu0 %v9809_v58  ;;  %7961 = vmatprep.subr.bf16.mxu1 %v11047_v1  ;;  %v2434_v37 = vrot.slane %v2425_v45, %v11109_v39 }
 0x478   :  { %v8746_v2 = vadd.f32 %v2434_v37, %v11111_v28  ;;  %v3052_v28 = vld [vmem:[#allocation8 + $0x58] sm:$0xff] }
 0x479   :  { %7939 = vmatpush1.bf16.msra.mxu0 %v9813_v5  ;;  %7963 = vmatpush3.bf16.msra.mxu1 %v9817_v6  ;;  %v2430_v6 = vrot.slane %v2425_v45, %v11108_v17 }
 0x47a   :  { %7965 = vmatprep.subr.bf16.mxu0 %v11107_v38  ;;  %7996 = vmatprep.subr.bf16.mxu1 %v11047_v1 }
 0x47b   :  { %v8743_v50 = vadd.f32 %v2430_v6, %v11110_v62  ;;  %v11123_v62 = vld [vmem:[#allocation47_spill] sm:$0xff] }
 0x4ef   :  { %v2144_v46 = vpop.f32.mrb[38].mxu1 }
 0x4f0   :  { %v6679_v9 = vpop.f32.mrb[39].mxu1  ;;  %v2145_v48 = vadd.f32 %v2144_v46, %v2003_v14 }
 0x50f   :  { %v2279_v3 = vpop.f32.mrb[10].mxu0  ;;  %v2350_v25 = vpop.f32.mrb[40].mxu1 }
 0x510   :  { %v8781_v29 = vadd.f32 %v8780_v61, %v2279_v3  ;;  %v2281_v27 = vpop.f32.mrb[11].mxu0  ;;  %v6714_v22 = vpop.f32.mrb[41].mxu1  ;;  %v2351_v5 = vadd.f32 %v2350_v25, %v2209_v41 }
 0x511   :  { %v8783_v51 = vadd.f32 %v8782_v8, %v2281_v27 }
 0x512   :  { %v5867_v44 = vmul.f32 -1.442695, %v8781_v29 }
 0x513   :  { %v5868_v12 = vmul.f32 -1.442695, %v8783_v51 }
 0x514   :  { %8882 = vpow2.f32 %v5867_v44 }
 0x515   :  { %8884 = vpow2.f32 %v5868_v12 }
 0x51e   :  { %v8883_v15 = vpop.eup %8882 }
 0x51f   :  { %v2358_v16 = vadd.f32 1.0, %v8883_v15  ;;  %v8885_v19 = vpop.eup %8884  ;;  %v2438_v15 = vrot.slane %v2425_v45, %v9407_v0  ;;  %v11118_v45 = vld [vmem:[#allocation42_spill] sm:$0xff] }
 0x520   :  { %v2365_v58 = vadd.f32 1.0, %v8885_v19 }
 0x521   :  { %8886 = vrcp.f32 %v2358_v16 }
 0x522   :  { %8888 = vrcp.f32 %v2365_v58  ;;  %v11113_v58 = vld [vmem:[#allocation30_spill] sm:$0xff] }
 0x52b   :  { %v8887_v24 = vpop.eup %8886 }
 0x52c   :  { %v2368_v7 = vmul.f32 %v8887_v24, %v2351_v5  ;;  %v8889_v3 = vpop.eup %8888 }
 0x52d   :  { %v2371_v8 = vsub.f32 1.0, %v8889_v3  ;;  %v2373_v27 = vmul.f32 %v8889_v3, %v9846_v13  ;;  %v11128_v3 = vld [vmem:[#allocation52_spill] sm:$0xff] }
 0x52e   :  { %v2369_v47 = vadd.f32 %v2368_v7, %v2145_v48 }
 0x52f   :  { %v2508_v38 = vpop.f32.mrb[12].mxu0  ;;  %v2579_v9 = vpop.f32.mrb[42].mxu1 }
 0x530   :  { %8890 = vtanh.f32 %v2369_v47  ;;  %v8744_v20 = vadd.f32 %v8743_v50, %v2508_v38  ;;  %v2510_v63 = vpop.f32.mrb[13].mxu0  ;;  %v6749_v57 = vpop.f32.mrb[43].mxu1  ;;  %v2580_v19 = vadd.f32 %v2579_v9, %v2438_v15  ;;  %v3043_v50 = vld [vmem:[#allocation8 + $0x10] sm:$0xff]  ;;  %v3046_v38 = vld [vmem:[#allocation8 + $0x28] sm:$0xff]  ;;  %v3049_v9 = vld [vmem:[#allocation8 + $0x40] sm:$0xff] }
 0x531   :  { %v8747_v49 = vadd.f32 %v8746_v2, %v2510_v63  ;;  %v3058_v2 = vld [vmem:[#allocation8 + $0x88] sm:$0xff]  ;;  %v11127_v63 = vld [vmem:[#allocation51_spill] sm:$0xff]  ;;  %v3061_v57 = vld [vmem:[#allocation8 + $0xa0] sm:$0xff] }
 0x532   :  { %v5869_v61 = vmul.f32 -1.442695, %v8744_v20  ;;  %v3085_v15 = vld [vmem:[#allocation8 + $0x160] sm:$0xff] }
 0x533   :  { %v5870_v25 = vmul.f32 -1.442695, %v8747_v49  ;;  %v3064_v49 = vld [vmem:[#allocation8 + $0xb8] sm:$0xff] }
 0x534   :  { %8892 = vpow2.f32 %v5869_v61  ;;  %v10123_v61 = vpack.c.bf16 %v3064_v49, %v3061_v57  ;;  %v3291_v57 = vld [vmem:[#allocation6 + $0x228] sm:$0xff]  ;;  %v3290_v49 = vld [vmem:[#allocation6 + $0x220] sm:$0xff] }
 0x535   :  { %8894 = vpow2.f32 %v5870_v25  ;;  %v3070_v25 = vld [vmem:[#allocation8 + $0xe8] sm:$0xff] }
 0x53a   :  { %v8891_v46 = vpop.eup %8890 }
 0x53b   :  { %v2372_v29 = vmul.f32 %v8891_v46, %v2371_v8  ;;  %v3076_v46 = vld [vmem:[#allocation8 + $0x118] sm:$0xff] }
 0x53d   :  { %v10058_v22 = vadd.f32 %v2373_v27, %v2372_v29  ;;  %v3082_v27 = vld [vmem:[#allocation8 + $0x148] sm:$0xff] }
 0x53e   :  { %v8893_v44 = vpop.eup %8892 }
 0x53f   :  { %11112 = vst [vmem:[#allocation53_spill] sm:$0xff] %v10058_v22  ;;  %v2587_v51 = vadd.f32 1.0, %v8893_v44  ;;  %v8895_v12 = vpop.eup %8894  ;;  %v3084_v44 = vld [vmem:[#allocation8 + $0x158] sm:$0xff] }
 0x540   :  { %v2594_v16 = vadd.f32 1.0, %v8895_v12  ;;  %v3083_v12 = vld [vmem:[#allocation8 + $0x150] sm:$0xff] }
 0x541   :  { %8896 = vrcp.f32 %v2587_v51  ;;  %v3087_v51 = vld [vmem:[#allocation8 + $0x170] sm:$0xff] }
 0x542   :  { %8898 = vrcp.f32 %v2594_v16  ;;  %v3088_v16 = vld [vmem:[#allocation8 + $0x178] sm:$0xff] }
 0x54b   :  { %v8897_v41 = vpop.eup %8896 }
 0x54c   :  { %v2597_v14 = vmul.f32 %v8897_v41, %v2580_v19  ;;  %v8899_v6 = vpop.eup %8898 }
 0x54d   :  { %v2600_v24 = vsub.f32 1.0, %v8899_v6  ;;  %v2602_v7 = vmul.f32 %v8899_v6, %v9855_v26  ;;  %v11116_v26 = vld [vmem:[#allocation40_spill] sm:$0xff] }
 0x54e   :  { %v2598_v5 = vadd.f32 %v2597_v14, %v11113_v58  ;;  %v3270_v14 = vld [vmem:[#allocation6 + $0x180] sm:$0xff]  ;;  %v3273_v58 = vld [vmem:[#allocation6 + $0x198] sm:$0xff] }
 0x54f   :  { %v10165_v6 = vpack.c.bf16 %v3273_v58, %v3270_v14  ;;  %v3300_v14 = vld [vmem:[#allocation6 + $0x270] sm:$0xff]  ;;  %v3303_v58 = vld [vmem:[#allocation6 + $0x288] sm:$0xff] }
 0x550   :  { %8900 = vtanh.f32 %v2598_v5  ;;  %v3272_v5 = vld [vmem:[#allocation6 + $0x190] sm:$0xff] }
 0x55a   :  { %v8901_v37 = vpop.eup %8900 }
 0x55b   :  { %v2601_v48 = vmul.f32 %v8901_v37, %v2600_v24  ;;  %v3275_v24 = vld [vmem:[#allocation6 + $0x1a8] sm:$0xff] }
 0x55c   :  { %v10168_v37 = vpack.c.bf16 %v3275_v24, %v3272_v5  ;;  %v3302_v5 = vld [vmem:[#allocation6 + $0x280] sm:$0xff]  ;;  %v10215_v24 = vpack.c.bf16 %v3303_v58, %v3300_v14 }
 0x55d   :  { %v10063_v47 = vadd.f32 %v2602_v7, %v2601_v48  ;;  %v3277_v48 = vld [vmem:[#allocation6 + $0x1b8] sm:$0xff]  ;;  %v3280_v7 = vld [vmem:[#allocation6 + $0x1d0] sm:$0xff]  ;;  %v5871_v14 = vld [vmem:[%s10937_s3 + $0x3] sm:$0x7] }
 0x55e   :  { %v2659_v58 = vrot.slane %v5871_v14, %v11108_v17 }
 0x55f   :  { %2736 = vmatmul.mubr.f32.vlgmr.msra.gmra.mrb[14].mxu0 %v10063_v47  ;;  %6783 = vmatmul.mubr.f32.vlgmr.msra.gmra.mrb[44].mxu1 %v10063_v47 }
 0x560   :  { %7967 = vmatpush1.bf16.msra.mxu0 %v9851_v35  ;;  %7998 = vmatpush3.bf16.msra.mxu1 %v9853_v40  ;;  %v11114_v35 = vld [vmem:[#allocation38_spill] sm:$0xff]  ;;  %v11115_v40 = vld [vmem:[#allocation39_spill] sm:$0xff] }
 0x561   :  { %7969 = vmatprep.subr.bf16.mxu0 %v9857_v30  ;;  %7999 = vmatprep.subr.bf16.mxu1 %v11047_v1  ;;  %v11117_v30 = vld [vmem:[#allocation41_spill] sm:$0xff] }
 0x562   :  { %2941 = vmatprep.mubr.f32.mxu0 %v11049_v54  ;;  %6817 = vmatprep.mubr.msk.f32.mxu1 %vm9120_vm0, %v11049_v54 }
 0x564   :  { %7971 = vmatpush1.bf16.msra.mxu0 %v9863_v33  ;;  %8001 = vmatpush3.bf16.msra.mxu1 %v9865_v43  ;;  %v11119_v33 = vld [vmem:[#allocation43_spill] sm:$0xff]  ;;  %v11120_v43 = vld [vmem:[#allocation44_spill] sm:$0xff] }
 0x565   :  { %7973 = vmatprep.subr.bf16.mxu0 %v9869_v36  ;;  %8002 = vmatprep.subr.bf16.mxu1 %v11047_v1  ;;  %v11121_v36 = vld [vmem:[#allocation45_spill] sm:$0xff] }
 0x568   :  { %7975 = vmatpush1.bf16.msra.mxu0 %v9876_v59  ;;  %8004 = vmatpush3.bf16.msra.mxu1 %v11114_v35  ;;  %v11122_v59 = vld [vmem:[#allocation46_spill] sm:$0xff]  ;;  %v10172_v35 = vpack.c.bf16 %v3280_v7, %v3277_v48  ;;  %v3305_v48 = vld [vmem:[#allocation6 + $0x298] sm:$0xff]  ;;  %v3307_v7 = vld [vmem:[#allocation6 + $0x2a8] sm:$0xff] }
 0x569   :  { %7977 = vmatprep.subr.bf16.mxu0 %v11115_v40  ;;  %8005 = vmatprep.subr.bf16.mxu1 %v11047_v1  ;;  %v3276_v40 = vld [vmem:[#allocation6 + $0x1b0] sm:$0xff] }
 0x56c   :  { %7979 = vmatpush1.bf16.msra.mxu0 %v11116_v26  ;;  %8007 = vmatpush3.bf16.msra.mxu1 %v11117_v30  ;;  %v3279_v26 = vld [vmem:[#allocation6 + $0x1c8] sm:$0xff]  ;;  %v3278_v30 = vld [vmem:[#allocation6 + $0x1c0] sm:$0xff] }
 0x56d   :  { %7981 = vmatprep.subr.bf16.mxu0 %v11118_v45  ;;  %8008 = vmatprep.subr.bf16.mxu1 %v11047_v1  ;;  %v10175_v45 = vpack.c.bf16 %v3279_v26, %v3276_v40  ;;  %v3310_v40 = vld [vmem:[#allocation6 + $0x2c0] sm:$0xff]  ;;  %v10218_v26 = vpack.c.bf16 %v3305_v48, %v3302_v5  ;;  %v2663_v48 = vrot.slane %v5871_v14, %v11109_v39 }
 0x570   :  { %7983 = vmatpush1.bf16.msra.mxu0 %v11119_v33  ;;  %8010 = vmatpush3.bf16.msra.mxu1 %v11120_v43  ;;  %v3281_v33 = vld [vmem:[#allocation6 + $0x1d8] sm:$0xff] }
 0x571   :  { %7985 = vmatprep.subr.bf16.mxu0 %v11121_v36  ;;  %8011 = vmatprep.subr.bf16.mxu1 %v11047_v1  ;;  %v10178_v43 = vpack.c.bf16 %v3281_v33, %v3278_v30  ;;  %v3283_v36 = vld [vmem:[#allocation6 + $0x1e8] sm:$0xff]  ;;  %v10220_v30 = vpack.c.bf16 %v3310_v40, %v3307_v7  ;;  %v3306_v33 = vld [vmem:[#allocation6 + $0x2a0] sm:$0xff] }
 0x574   :  { %7987 = vmatpush1.bf16.msra.mxu0 %v9906_v23  ;;  %8013 = vmatpush3.bf16.msra.mxu1 %v9908_v52  ;;  %v10100_v23 = vpack.c.bf16 %v3046_v38, %v3043_v50  ;;  %v11124_v52 = vld [vmem:[#allocation48_spill] sm:$0xff]  ;;  %v3285_v38 = vld [vmem:[#allocation6 + $0x1f8] sm:$0xff] }
 0x575   :  { %7989 = vmatprep.subr.bf16.mxu0 %v11122_v59  ;;  %8014 = vmatprep.subr.bf16.mxu1 %v11047_v1  ;;  %v3286_v59 = vld [vmem:[#allocation6 + $0x200] sm:$0xff] }
 0x576   :  { %v3282_v50 = vld [vmem:[#allocation6 + $0x1e0] sm:$0xff] }
 0x578   :  { %7991 = vmatpush1.bf16.msra.mxu0 %v11123_v62  ;;  %8016 = vmatpush3.bf16.msra.mxu1 %v9918_v42  ;;  %v11125_v42 = vld [vmem:[#allocation49_spill] sm:$0xff]  ;;  %v10182_v62 = vpack.c.bf16 %v3286_v59, %v3283_v36  ;;  %v3309_v36 = vld [vmem:[#allocation6 + $0x2b8] sm:$0xff]  ;;  %v3308_v59 = vld [vmem:[#allocation6 + $0x2b0] sm:$0xff] }
 0x579   :  { %7993 = vmatprep.subr.bf16.mxu0 %v9922_v31  ;;  %8017 = vmatprep.subr.bf16.mxu1 %v11047_v1  ;;  %v10108_v31 = vpack.c.bf16 %v3052_v28, %v3049_v9  ;;  %v10185_v9 = vpack.c.bf16 %v3285_v38, %v3282_v50  ;;  %v3287_v28 = vld [vmem:[#allocation6 + $0x208] sm:$0xff]  ;;  %v10223_v50 = vpack.c.bf16 %v3309_v36, %v3306_v33 }
 0x57a   :  { %v3311_v38 = vld [vmem:[#allocation6 + $0x2c8] sm:$0xff] }
 0x57c   :  { %7995 = vmatpush1.bf16.msra.mxu0 %v9926_v10  ;;  %8019 = vmatpush3.bf16.msra.mxu1 %v9928_v56  ;;  %v11126_v10 = vld [vmem:[#allocation50_spill] sm:$0xff] }
 0x57d   :  { %8021 = vmatprep.subr.bf16.mxu0 %v11124_v52  ;;  %8052 = vmatprep.subr.bf16.mxu1 %v11047_v1  ;;  %v3055_v56 = vld [vmem:[#allocation8 + $0x70] sm:$0xff] }
 0x57e   :  { %v10117_v20 = vpack.c.bf16 %v3058_v2, %v3055_v56  ;;  %v3284_v52 = vld [vmem:[#allocation6 + $0x1f0] sm:$0xff] }
 0x57f   :  { %2942 = vmatmul.mubr.f32.vlgmr.msra.gmra.mrb[14].mxu0 %v10058_v22  ;;  %6818 = vmatmul.mubr.f32.vlgmr.msra.gmra.mrb[46].mxu1 %v10058_v22  ;;  %v3292_v56 = vld [vmem:[#allocation6 + $0x230] sm:$0xff] }
 0x580   :  { %8023 = vmatpush1.bf16.msra.mxu0 %v11125_v42  ;;  %8054 = vmatpush3.bf16.msra.mxu1 %v10100_v23  ;;  %v10188_v42 = vpack.c.bf16 %v3287_v28, %v3284_v52  ;;  %v3313_v52 = vld [vmem:[#allocation6 + $0x2d8] sm:$0xff]  ;;  %v3316_v28 = vld [vmem:[#allocation6 + $0x2f0] sm:$0xff] }
 0x581   :  { %8025 = vmatprep.subr.bf16.mxu0 %v11126_v10  ;;  %8055 = vmatprep.subr.bf16.mxu1 %v11047_v1  ;;  %v3289_v10 = vld [vmem:[#allocation6 + $0x218] sm:$0xff] }
 0x582   :  { %3170 = vmatprep.mubr.f32.mxu0 %v11049_v54  ;;  %6852 = vmatprep.mubr.msk.f32.mxu1 %vm9120_vm0, %v11049_v54  ;;  %v10192_v2 = vpack.c.bf16 %v3292_v56, %v3289_v10  ;;  %v10227_v10 = vpack.c.bf16 %v3311_v38, %v3308_v59  ;;  %v10229_v56 = vpack.c.bf16 %v3316_v28, %v3313_v52 }
 0x584   :  { %8027 = vmatpush1.bf16.msra.mxu0 %v9946_v60  ;;  %8057 = vmatpush3.bf16.msra.mxu1 %v10108_v31  ;;  %v3067_v60 = vld [vmem:[#allocation8 + $0xd0] sm:$0xff] }
 0x585   :  { %8029 = vmatprep.subr.bf16.mxu0 %v11127_v63  ;;  %8058 = vmatprep.subr.bf16.mxu1 %v11047_v1  ;;  %v10129_v8 = vpack.c.bf16 %v3070_v25, %v3067_v60  ;;  %v3288_v63 = vld [vmem:[#allocation6 + $0x210] sm:$0xff]  ;;  %v3293_v60 = vld [vmem:[#allocation6 + $0x238] sm:$0xff] }
 0x586   :  { %v10198_v25 = vpack.c.bf16 %v3293_v60, %v3290_v49  ;;  %v3314_v49 = vld [vmem:[#allocation6 + $0x2e0] sm:$0xff]  ;;  %v3317_v60 = vld [vmem:[#allocation6 + $0x2f8] sm:$0xff] }
 0x588   :  { %8031 = vmatpush1.bf16.msra.mxu0 %v9957_v53  ;;  %8060 = vmatpush3.bf16.msra.mxu1 %v10117_v20  ;;  %v3073_v53 = vld [vmem:[#allocation8 + $0x100] sm:$0xff] }
 0x589   :  { %8033 = vmatprep.subr.bf16.mxu0 %v11128_v3  ;;  %8061 = vmatprep.subr.bf16.mxu1 %v11047_v1  ;;  %v10135_v29 = vpack.c.bf16 %v3076_v46, %v3073_v53  ;;  %v10195_v3 = vpack.c.bf16 %v3291_v57, %v3288_v63  ;;  %v3295_v53 = vld [vmem:[#allocation6 + $0x248] sm:$0xff]  ;;  %v3298_v46 = vld [vmem:[#allocation6 + $0x260] sm:$0xff]  ;;  %v3312_v63 = vld [vmem:[#allocation6 + $0x2d0] sm:$0xff] }
 0x58a   :  { %v3315_v57 = vld [vmem:[#allocation6 + $0x2e8] sm:$0xff] }
 0x58c   :  { %8035 = vmatpush1.bf16.msra.mxu0 %v9965_v55  ;;  %8063 = vmatpush3.bf16.msra.mxu1 %v10123_v61  ;;  %v3079_v55 = vld [vmem:[#allocation8 + $0x130] sm:$0xff] }
 0x58d   :  { %8037 = vmatprep.subr.bf16.mxu0 %v9969_v11  ;;  %8064 = vmatprep.subr.bf16.mxu1 %v11047_v1  ;;  %v10141_v11 = vpack.c.bf16 %v3082_v27, %v3079_v55  ;;  %v10202_v55 = vpack.c.bf16 %v3298_v46, %v3295_v53  ;;  %v3294_v27 = vld [vmem:[#allocation6 + $0x240] sm:$0xff]  ;;  %v3477_v53 = vld [vmem:[#allocation8 + $0x188] sm:$0xff] }
 0x58e   :  { %v3480_v46 = vld [vmem:[#allocation8 + $0x1a0] sm:$0xff] }
 0x590   :  { %8039 = vmatpush1.bf16.msra.mxu0 %v9973_v21  ;;  %8066 = vmatpush3.bf16.msra.mxu1 %v10129_v8  ;;  %v10145_v21 = vpack.c.bf16 %v3087_v51, %v3084_v44  ;;  %v3297_v44 = vld [vmem:[#allocation6 + $0x258] sm:$0xff]  ;;  %v3296_v51 = vld [vmem:[#allocation6 + $0x250] sm:$0xff] }
 0x591   :  { %8041 = vmatprep.subr.bf16.mxu0 %v9977_v18  ;;  %8067 = vmatprep.subr.bf16.mxu1 %v11047_v1  ;;  %v3086_v18 = vld [vmem:[#allocation8 + $0x168] sm:$0xff] }
 0x592   :  { %v10149_v19 = vpack.c.bf16 %v3086_v18, %v3083_v12  ;;  %v10205_v12 = vpack.c.bf16 %v3297_v44, %v3294_v27  ;;  %v3299_v18 = vld [vmem:[#allocation6 + $0x268] sm:$0xff]  ;;  %v10233_v27 = vpack.c.bf16 %v3315_v57, %v3312_v63  ;;  %v10237_v44 = vpack.c.bf16 %v3317_v60, %v3314_v49 }
 0x594   :  { %8043 = vmatpush1.bf16.msra.mxu0 %v9981_v34  ;;  %8069 = vmatpush3.bf16.msra.mxu1 %v10135_v29  ;;  %v10151_v34 = vpack.c.bf16 %v3088_v16, %v3085_v15  ;;  %v10208_v15 = vpack.c.bf16 %v3299_v18, %v3296_v51  ;;  %v3301_v16 = vld [vmem:[#allocation6 + $0x278] sm:$0xff]  ;;  %v10239_v51 = vpack.c.bf16 %v3480_v46, %v3477_v53 }
 0x595   :  { %8045 = vmatprep.subr.bf16.mxu0 %v9985_v32  ;;  %8070 = vmatprep.subr.bf16.mxu1 %v11047_v1  ;;  %v3271_v32 = vld [vmem:[#allocation6 + $0x188] sm:$0xff] }
 0x596   :  { %11129 = vst [vmem:[#allocation54_spill] sm:$0xff] %v10239_v51 }
 0x598   :  { %8047 = vmatpush1.bf16.msra.mxu0 %v9989_v4  ;;  %8072 = vmatpush3.bf16.msra.mxu1 %v10141_v11  ;;  %v3274_v4 = vld [vmem:[#allocation6 + $0x1a0] sm:$0xff] }
 0x599   :  { %8049 = vmatprep.subr.bf16.mxu0 %v10145_v21  ;;  %8073 = vmatprep.subr.bf16.mxu1 %v11047_v1  ;;  %v10163_v41 = vpack.c.bf16 %v3274_v4, %v3271_v32  ;;  %v3304_v32 = vld [vmem:[#allocation6 + $0x290] sm:$0xff] }
 0x59a   :  { %v10212_v4 = vpack.c.bf16 %v3304_v32, %v3301_v16  ;;  %v5872_v32 = vld [vmem:[%s10938_s4 + $0x3] sm:$0x7] }
 0x59b   :  { %v2865_v5 = vrot.slane %v5872_v32, %v11108_v17  ;;  %v2869_v7 = vrot.slane %v5872_v32, %v11109_v39 }
 0x59c   :  { %8051 = vmatpush1.bf16.msra.mxu0 %v10149_v19  ;;  %8075 = vmatpush3.bf16.msra.mxu1 %v10151_v34 }
 0x59d   :  { %8108 = vmatprep.subr.bf16.mxu1 %v11047_v1  ;;  %8077 = vmatprep.subr.bf16.mxu0 %v10163_v41  ;;  %v8784_v40 = vadd.f32 %v2865_v5, %v2659_v58  ;;  %v8786_v59 = vadd.f32 %v2869_v7, %v2663_v48  ;;  %v3089_v58 = vld [vmem:[%s10938_s4] sm:$0x7]  ;;  %v2667_v5 = vrot.slane %v5871_v14, %v9407_v0 }
 0x59f   :  { %3171 = vmatmul.mubr.f32.vlgmr.msra.gmra.mrb[16].mxu0 %v10063_v47  ;;  %6853 = vmatmul.mubr.f32.vlgmr.msra.gmra.mrb[48].mxu1 %v10063_v47 }
 0x5a0   :  { %3399 = vmatprep.mubr.f32.mxu0 %v11049_v54  ;;  %6887 = vmatprep.mubr.msk.f32.mxu1 %vm9120_vm0, %v11049_v54 }
 0x5a1   :  { %8079 = vmatpush1.bf16.msra.mxu0 %v10165_v6  ;;  %8110 = vmatpush3.bf16.msra.mxu1 %v10168_v37 }
 0x5a2   :  { %8111 = vmatprep.subr.bf16.mxu1 %v11047_v1  ;;  %8081 = vmatprep.subr.bf16.mxu0 %v10172_v35 }
 0x5a5   :  { %8083 = vmatpush1.bf16.msra.mxu0 %v10175_v45  ;;  %8113 = vmatpush3.bf16.msra.mxu1 %v10178_v43 }
 0x5a6   :  { %8114 = vmatprep.subr.bf16.mxu1 %v11047_v1  ;;  %8085 = vmatprep.subr.bf16.mxu0 %v10182_v62 }
 0x5a9   :  { %8087 = vmatpush1.bf16.msra.mxu0 %v10185_v9  ;;  %8116 = vmatpush3.bf16.msra.mxu1 %v10188_v42 }
 0x5aa   :  { %8117 = vmatprep.subr.bf16.mxu1 %v11047_v1  ;;  %8089 = vmatprep.subr.bf16.mxu0 %v10192_v2 }
 0x5ad   :  { %8091 = vmatpush1.bf16.msra.mxu0 %v10195_v3  ;;  %8119 = vmatpush3.bf16.msra.mxu1 %v10198_v25 }
 0x5ae   :  { %8120 = vmatprep.subr.bf16.mxu1 %v11047_v1  ;;  %8093 = vmatprep.subr.bf16.mxu0 %v10202_v55 }
 0x5b1   :  { %8095 = vmatpush1.bf16.msra.mxu0 %v10205_v12  ;;  %8122 = vmatpush3.bf16.msra.mxu1 %v10208_v15 }
 0x5b2   :  { %8123 = vmatprep.subr.bf16.mxu1 %v11047_v1  ;;  %8097 = vmatprep.subr.bf16.mxu0 %v10212_v4 }
 0x5b5   :  { %8099 = vmatpush1.bf16.msra.mxu0 %v10215_v24  ;;  %8125 = vmatpush3.bf16.msra.mxu1 %v10218_v26 }
 0x5b6   :  { %8101 = vmatprep.subr.bf16.mxu0 %v10220_v30  ;;  %8126 = vmatprep.subr.bf16.mxu1 %v11047_v1 }
 0x5b9   :  { %8103 = vmatpush1.bf16.msra.mxu0 %v10223_v50  ;;  %8128 = vmatpush3.bf16.msra.mxu1 %v10227_v10 }
 0x5ba   :  { %8105 = vmatprep.subr.bf16.mxu0 %v10229_v56  ;;  %8129 = vmatprep.subr.bf16.mxu1 %v11047_v1 }
 0x5bd   :  { %8107 = vmatpush1.bf16.msra.mxu0 %v10233_v27  ;;  %8131 = vmatpush3.bf16.msra.mxu1 %v10237_v44 }
 0x5be   :  { %8133 = vmatprep.subr.bf16.mxu0 %v10239_v51  ;;  %8164 = vmatprep.subr.bf16.mxu1 %v11047_v1 }
 0x632   :  { %v2808_v18 = vpop.f32.mrb[44].mxu1 }
 0x633   :  { %v6784_v16 = vpop.f32.mrb[45].mxu1 }
 0x634   :  { %v2873_v16 = vrot.slane %v5872_v32, %v9407_v0 }
 0x652   :  { %v2943_v33 = vpop.f32.mrb[14].mxu0  ;;  %v3014_v36 = vpop.f32.mrb[46].mxu1 }
 0x653   :  { %v8785_v38 = vadd.f32 %v8784_v40, %v2943_v33  ;;  %v2945_v52 = vpop.f32.mrb[15].mxu0  ;;  %v6819_v28 = vpop.f32.mrb[47].mxu1  ;;  %v3015_v7 = vadd.f32 %v3014_v36, %v2873_v16  ;;  %v3094_v40 = vrot.slane %v3089_v58, %v11108_v17 }
 0x654   :  { %v8787_v57 = vadd.f32 %v8786_v59, %v2945_v52  ;;  %v3098_v59 = vrot.slane %v3089_v58, %v11109_v39 }
 0x655   :  { %v5873_v63 = vmul.f32 -1.442695, %v8785_v38  ;;  %v2809_v38 = vadd.f32 %v2808_v18, %v2667_v5 }
 0x656   :  { %v5874_v49 = vmul.f32 -1.442695, %v8787_v57 }
 0x657   :  { %8902 = vpow2.f32 %v5873_v63  ;;  %v11130_v63 = vld [vmem:[#allocation22_spill] sm:$0xff] }
 0x658   :  { %8904 = vpow2.f32 %v5874_v49  ;;  %v8749_v57 = vadd.f32 %v3094_v40, %v11130_v63 }
 0x661   :  { %v8903_v60 = vpop.eup %8902 }
 0x662   :  { %v3022_v53 = vadd.f32 1.0, %v8903_v60  ;;  %v8905_v46 = vpop.eup %8904  ;;  %v11131_v60 = vld [vmem:[#allocation23_spill] sm:$0xff] }
 0x663   :  { %v3029_v48 = vadd.f32 1.0, %v8905_v46 }
 0x664   :  { %8906 = vrcp.f32 %v3022_v53  ;;  %v8752_v53 = vadd.f32 %v3098_v59, %v11131_v60 }
 0x665   :  { %8908 = vrcp.f32 %v3029_v48 }
 0x66e   :  { %v8907_v33 = vpop.eup %8906 }
 0x66f   :  { %v3032_v52 = vmul.f32 %v8907_v33, %v3015_v7  ;;  %v8909_v17 = vpop.eup %8908 }
 0x670   :  { %v3035_v39 = vsub.f32 1.0, %v8909_v17  ;;  %v3037_v48 = vmul.f32 %v8909_v17, %v10058_v22  ;;  %v3479_v17 = vld [vmem:[#allocation8 + $0x198] sm:$0xff] }
 0x671   :  { %v3033_v28 = vadd.f32 %v3032_v52, %v2809_v38  ;;  %v3102_v38 = vrot.slane %v3089_v58, %v9407_v0  ;;  %v3511_v22 = vld [vmem:[#allocation8 + $0x298] sm:$0xff] }
 0x672   :  { %v3172_v32 = vpop.f32.mrb[16].mxu0  ;;  %v3243_v49 = vpop.f32.mrb[48].mxu1 }
 0x673   :  { %8910 = vtanh.f32 %v3033_v28  ;;  %v8750_v13 = vadd.f32 %v8749_v57, %v3172_v32  ;;  %v3174_v14 = vpop.f32.mrb[17].mxu0  ;;  %v6854_v46 = vpop.f32.mrb[49].mxu1  ;;  %v3244_v28 = vadd.f32 %v3243_v49, %v3102_v38  ;;  %v11133_v57 = vld [vmem:[#allocation33_spill] sm:$0xff]  ;;  %v3484_v38 = vld [vmem:[#allocation8 + $0x1c0] sm:$0xff] }
 0x674   :  { %v8753_v36 = vadd.f32 %v8752_v53, %v3174_v14  ;;  %v3478_v53 = vld [vmem:[#allocation8 + $0x190] sm:$0xff]  ;;  %v3481_v14 = vld [vmem:[#allocation8 + $0x1a8] sm:$0xff] }
 0x675   :  { %v5875_v16 = vmul.f32 -1.442695, %v8750_v13  ;;  %v10273_v49 = vpack.c.bf16 %v3481_v14, %v3478_v53  ;;  %v3498_v53 = vld [vmem:[#allocation8 + $0x230] sm:$0xff] }
 0x676   :  { %v5876_v51 = vmul.f32 -1.442695, %v8753_v36  ;;  %v3483_v36 = vld [vmem:[#allocation8 + $0x1b8] sm:$0xff] }
 0x677   :  { %8912 = vpow2.f32 %v5875_v16  ;;  %v3486_v16 = vld [vmem:[#allocation8 + $0x1d0] sm:$0xff] }
 0x678   :  { %8914 = vpow2.f32 %v5876_v51 }
 0x67d   :  { %v8911_v18 = vpop.eup %8910 }
 0x67e   :  { %v3036_v5 = vmul.f32 %v8911_v18, %v3035_v39  ;;  %v3476_v39 = vld [vmem:[#allocation8 + $0x180] sm:$0xff] }
 0x680   :  { %v10266_v7 = vadd.f32 %v3037_v48, %v3036_v5  ;;  %v10271_v5 = vpack.c.bf16 %v3479_v17, %v3476_v39  ;;  %v3482_v48 = vld [vmem:[#allocation8 + $0x1b0] sm:$0xff]  ;;  %v3495_v17 = vld [vmem:[#allocation8 + $0x218] sm:$0xff] }
 0x681   :  { %v8913_v40 = vpop.eup %8912  ;;  %v3490_v39 = vld [vmem:[#allocation8 + $0x1f0] sm:$0xff] }
 0x682   :  { %11132 = vst [vmem:[#allocation55_spill] sm:$0xff] %v10266_v7  ;;  %v3251_v33 = vadd.f32 1.0, %v8913_v40  ;;  %v8915_v59 = vpop.eup %8914 }
 0x683   :  { %v3258_v52 = vadd.f32 1.0, %v8915_v59  ;;  %v3485_v59 = vld [vmem:[#allocation8 + $0x1c8] sm:$0xff] }
 0x684   :  { %8916 = vrcp.f32 %v3251_v33  ;;  %v10277_v33 = vpack.c.bf16 %v3486_v16, %v3483_v36  ;;  %v3494_v36 = vld [vmem:[#allocation8 + $0x210] sm:$0xff]  ;;  %v10302_v16 = vpack.c.bf16 %v3498_v53, %v3495_v17  ;;  %v3507_v17 = vld [vmem:[#allocation8 + $0x278] sm:$0xff] }
 0x685   :  { %8918 = vrcp.f32 %v3258_v52  ;;  %v3487_v52 = vld [vmem:[#allocation8 + $0x1d8] sm:$0xff]  ;;  %v3510_v53 = vld [vmem:[#allocation8 + $0x290] sm:$0xff] }
 0x686   :  { %11135 = vst [vmem:[#allocation19_spill] sm:$0xff] %v10302_v16 }
 0x68e   :  { %v8917_v13 = vpop.eup %8916 }
 0x68f   :  { %v3261_v63 = vmul.f32 %v8917_v13, %v3244_v28  ;;  %v8919_v51 = vpop.eup %8918  ;;  %v3489_v28 = vld [vmem:[#allocation8 + $0x1e8] sm:$0xff]  ;;  %v3492_v13 = vld [vmem:[#allocation8 + $0x200] sm:$0xff] }
 0x690   :  { %v3264_v60 = vsub.f32 1.0, %v8919_v51  ;;  %v3266_v58 = vmul.f32 %v8919_v51, %v10063_v47  ;;  %v10283_v47 = vpack.c.bf16 %v3485_v59, %v3482_v48  ;;  %v3491_v51 = vld [vmem:[#allocation8 + $0x1f8] sm:$0xff]  ;;  %v3501_v59 = vld [vmem:[#allocation8 + $0x248] sm:$0xff] }
 0x691   :  { %v3262_v32 = vadd.f32 %v3261_v63, %v11133_v57  ;;  %v10285_v63 = vpack.c.bf16 %v3487_v52, %v3484_v38  ;;  %v3488_v57 = vld [vmem:[#allocation8 + $0x1e0] sm:$0xff]  ;;  %v3499_v48 = vld [vmem:[#allocation8 + $0x238] sm:$0xff] }
 0x692   :  { %v10296_v14 = vpack.c.bf16 %v3491_v51, %v3488_v57  ;;  %v3504_v38 = vld [vmem:[#allocation8 + $0x260] sm:$0xff]  ;;  %v3503_v51 = vld [vmem:[#allocation8 + $0x258] sm:$0xff] }
 0x693   :  { %8920 = vtanh.f32 %v3262_v32  ;;  %v10289_v32 = vpack.c.bf16 %v3492_v13, %v3489_v28  ;;  %v3500_v13 = vld [vmem:[#allocation8 + $0x240] sm:$0xff]  ;;  %v10312_v57 = vpack.c.bf16 %v3504_v38, %v3501_v59  ;;  %v3509_v59 = vld [vmem:[#allocation8 + $0x288] sm:$0xff] }
 0x694   :  { %v3508_v38 = vld [vmem:[#allocation8 + $0x280] sm:$0xff] }
 0x695   :  { %11138 = vst [vmem:[#allocation20_spill] sm:$0xff] %v10312_v57 }
 0x69d   :  { %v8921_v46 = vpop.eup %8920 }
 0x69e   :  { %v3265_v18 = vmul.f32 %v8921_v46, %v3264_v60  ;;  %v3493_v60 = vld [vmem:[#allocation8 + $0x208] sm:$0xff] }
 0x69f   :  { %v10298_v46 = vpack.c.bf16 %v3493_v60, %v3490_v39  ;;  %v3502_v39 = vld [vmem:[#allocation8 + $0x250] sm:$0xff]  ;;  %v3505_v60 = vld [vmem:[#allocation8 + $0x268] sm:$0xff] }
 0x6a0   :  { %v10275_v40 = vadd.f32 %v3266_v58, %v3265_v18  ;;  %v3497_v18 = vld [vmem:[#allocation8 + $0x228] sm:$0xff]  ;;  %v3496_v58 = vld [vmem:[#allocation8 + $0x220] sm:$0xff] }
 0x6a1   :  { %11134 = vst [vmem:[#allocation18_spill] sm:$0xff] %v10298_v46  ;;  %v10306_v52 = vpack.c.bf16 %v3497_v18, %v3494_v36  ;;  %v10308_v28 = vpack.c.bf16 %v3499_v48, %v3496_v58  ;;  %v10316_v36 = vpack.c.bf16 %v3503_v51, %v3500_v13  ;;  %v10318_v18 = vpack.c.bf16 %v3505_v60, %v3502_v39  ;;  %v3506_v58 = vld [vmem:[#allocation8 + $0x270] sm:$0xff]  ;;  %v3512_v39 = vld [vmem:[#allocation8 + $0x2a0] sm:$0xff] }
 0x6a2   :  { %3400 = vmatmul.mubr.f32.vlgmr.msra.gmra.mrb[18].mxu0 %v10275_v40  ;;  %6888 = vmatmul.mubr.f32.vlgmr.msra.gmra.mrb[50].mxu1 %v10275_v40  ;;  %v10322_v48 = vpack.c.bf16 %v3510_v53, %v3507_v17  ;;  %v10326_v13 = vpack.c.bf16 %v3509_v59, %v3506_v58  ;;  %v10328_v51 = vpack.c.bf16 %v3511_v22, %v3508_v38  ;;  %v3515_v17 = vld [vmem:[#allocation8 + $0x2b8] sm:$0xff]  ;;  %v3514_v53 = vld [vmem:[#allocation8 + $0x2b0] sm:$0xff]  ;;  %v3520_v38 = vld [vmem:[#allocation8 + $0x2e0] sm:$0xff] }
 0x6a3   :  { %8135 = vmatpush1.bf16.msra.mxu0 %v10271_v5  ;;  %8166 = vmatpush3.bf16.msra.mxu1 %v10273_v49  ;;  %11136 = vst [vmem:[#allocation31_spill] sm:$0xff] %v10306_v52  ;;  %11137 = vst [vmem:[#allocation36_spill] sm:$0xff] %v10308_v28  ;;  %v10336_v58 = vpack.c.bf16 %v3515_v17, %v3512_v39  ;;  %v3518_v59 = vld [vmem:[#allocation8 + $0x2d0] sm:$0xff] }
 0x6a4   :  { %8137 = vmatprep.subr.bf16.mxu0 %v10277_v33  ;;  %8167 = vmatprep.subr.bf16.mxu1 %v11047_v1  ;;  %11139 = vst [vmem:[#allocation21_spill] sm:$0xff] %v10316_v36  ;;  %11140 = vst [vmem:[#allocation30_spill] sm:$0xff] %v10318_v18 }
 0x6a5   :  { %3605 = vmatprep.mubr.f32.mxu0 %v11049_v54  ;;  %6922 = vmatprep.mubr.msk.f32.mxu1 %vm9120_vm0, %v11049_v54  ;;  %11141 = vst [vmem:[#allocation38_spill] sm:$0xff] %v10322_v48  ;;  %11143 = vst [vmem:[#allocation40_spill] sm:$0xff] %v10336_v58 }
 0x6a7   :  { %8139 = vmatpush1.bf16.msra.mxu0 %v10283_v47  ;;  %8169 = vmatpush3.bf16.msra.mxu1 %v10285_v63 }
 0x6a8   :  { %8141 = vmatprep.subr.bf16.mxu0 %v10289_v32  ;;  %8170 = vmatprep.subr.bf16.mxu1 %v11047_v1 }
 0x6ab   :  { %8143 = vmatpush1.bf16.msra.mxu0 %v10296_v14  ;;  %8172 = vmatpush3.bf16.msra.mxu1 %v10298_v46  ;;  %v3516_v46 = vld [vmem:[#allocation8 + $0x2c0] sm:$0xff] }
 0x6ac   :  { %8145 = vmatprep.subr.bf16.mxu0 %v10302_v16  ;;  %8173 = vmatprep.subr.bf16.mxu1 %v11047_v1  ;;  %v3513_v16 = vld [vmem:[#allocation8 + $0x2a8] sm:$0xff] }
 0x6ad   :  { %v10332_v60 = vpack.c.bf16 %v3516_v46, %v3513_v16  ;;  %v3521_v16 = vld [vmem:[#allocation8 + $0x2e8] sm:$0xff] }
 0x6ae   :  { %v10346_v39 = vpack.c.bf16 %v3521_v16, %v3518_v59  ;;  %v3711_v59 = vld [vmem:[#allocation8 + $0x30] sm:$0xff]  ;;  %v3714_v16 = vld [vmem:[#allocation8 + $0x48] sm:$0xff] }
 0x6af   :  { %8147 = vmatpush1.bf16.msra.mxu0 %v10306_v52  ;;  %8175 = vmatpush3.bf16.msra.mxu1 %v10308_v28  ;;  %11142 = vst [vmem:[#allocation39_spill] sm:$0xff] %v10332_v60  ;;  %v3519_v28 = vld [vmem:[#allocation8 + $0x2d8] sm:$0xff]  ;;  %v3522_v52 = vld [vmem:[#allocation8 + $0x2f0] sm:$0xff] }
 0x6b0   :  { %8149 = vmatprep.subr.bf16.mxu0 %v10312_v57  ;;  %8176 = vmatprep.subr.bf16.mxu1 %v11047_v1  ;;  %v3517_v57 = vld [vmem:[#allocation8 + $0x2c8] sm:$0xff]  ;;  %v10342_v46 = vpack.c.bf16 %v3522_v52, %v3519_v28  ;;  %v3705_v52 = vld [vmem:[#allocation8] sm:$0xff]  ;;  %v3708_v28 = vld [vmem:[#allocation8 + $0x18] sm:$0xff] }
 0x6b1   :  { %v10338_v22 = vpack.c.bf16 %v3517_v57, %v3514_v53  ;;  %v3712_v53 = vld [vmem:[#allocation8 + $0x38] sm:$0xff] }
 0x6b3   :  { %8151 = vmatpush1.bf16.msra.mxu0 %v10316_v36  ;;  %8178 = vmatpush3.bf16.msra.mxu1 %v10318_v18  ;;  %v3706_v18 = vld [vmem:[#allocation8 + $0x8] sm:$0xff]  ;;  %v3709_v36 = vld [vmem:[#allocation8 + $0x20] sm:$0xff] }
 0x6b4   :  { %8153 = vmatprep.subr.bf16.mxu0 %v10322_v48  ;;  %8179 = vmatprep.subr.bf16.mxu1 %v11047_v1  ;;  %v3523_v48 = vld [vmem:[#allocation8 + $0x2f8] sm:$0xff]  ;;  %v10352_v17 = vpack.c.bf16 %v3709_v36, %v3706_v18  ;;  %v3718_v36 = vld [vmem:[#allocation8 + $0x68] sm:$0xff]  ;;  %v3721_v18 = vld [vmem:[#allocation8 + $0x80] sm:$0xff] }
 0x6b5   :  { %v10348_v57 = vpack.c.bf16 %v3523_v48, %v3520_v38  ;;  %v10366_v38 = vpack.c.bf16 %v3714_v16, %v3711_v59  ;;  %v3723_v16 = vld [vmem:[#allocation8 + $0x90] sm:$0xff] }
 0x6b6   :  { %11144 = vst [vmem:[#allocation41_spill] sm:$0xff] %v10352_v17 }
 0x6b7   :  { %8155 = vmatpush1.bf16.msra.mxu0 %v10326_v13  ;;  %8181 = vmatpush3.bf16.msra.mxu1 %v10328_v51 }
 0x6b8   :  { %8157 = vmatprep.subr.bf16.mxu0 %v10332_v60  ;;  %8182 = vmatprep.subr.bf16.mxu1 %v11047_v1  ;;  %v3715_v60 = vld [vmem:[#allocation8 + $0x50] sm:$0xff] }
 0x6b9   :  { %v10360_v48 = vpack.c.bf16 %v3715_v60, %v3712_v53  ;;  %v10370_v60 = vpack.c.bf16 %v3721_v18, %v3718_v36  ;;  %v3724_v53 = vld [vmem:[#allocation8 + $0x98] sm:$0xff]  ;;  %v3726_v36 = vld [vmem:[#allocation8 + $0xa8] sm:$0xff] }
 0x6ba   :  { %v3730_v18 = vld [vmem:[#allocation8 + $0xc8] sm:$0xff] }
 0x6bb   :  { %8159 = vmatpush1.bf16.msra.mxu0 %v10336_v58  ;;  %8184 = vmatpush3.bf16.msra.mxu1 %v10338_v22  ;;  %v10356_v58 = vpack.c.bf16 %v3708_v28, %v3705_v52  ;;  %11146 = vst [vmem:[#allocation43_spill] sm:$0xff] %v10360_v48  ;;  %11147 = vst [vmem:[#allocation44_spill] sm:$0xff] %v10370_v60  ;;  %v3717_v52 = vld [vmem:[#allocation8 + $0x60] sm:$0xff]  ;;  %v3720_v28 = vld [vmem:[#allocation8 + $0x78] sm:$0xff] }
 0x6bc   :  { %8161 = vmatprep.subr.bf16.mxu0 %v10342_v46  ;;  %8185 = vmatprep.subr.bf16.mxu1 %v11047_v1 }
 0x6bd   :  { %11145 = vst [vmem:[#allocation42_spill] sm:$0xff] %v10356_v58 }
 0x6bf   :  { %8163 = vmatpush1.bf16.msra.mxu0 %v10346_v39  ;;  %8187 = vmatpush3.bf16.msra.mxu1 %v10348_v57 }
 0x6c0   :  { %8189 = vmatprep.subr.bf16.mxu0 %v10352_v17  ;;  %8220 = vmatprep.subr.bf16.mxu1 %v11047_v1  ;;  %v3727_v17 = vld [vmem:[#allocation8 + $0xb0] sm:$0xff] }
 0x6c1   :  { %v10381_v59 = vpack.c.bf16 %v3727_v17, %v3724_v53  ;;  %v3736_v17 = vld [vmem:[#allocation8 + $0xf8] sm:$0xff]  ;;  %v3739_v53 = vld [vmem:[#allocation8 + $0x110] sm:$0xff] }
 0x6c2   :  { %3606 = vmatmul.mubr.f32.vlgmr.msra.gmra.mrb[18].mxu0 %v10266_v7  ;;  %6923 = vmatmul.mubr.f32.vlgmr.msra.gmra.mrb[52].mxu1 %v10266_v7 }
 0x6c3   :  { %8191 = vmatpush1.bf16.msra.mxu0 %v10356_v58  ;;  %8222 = vmatpush3.bf16.msra.mxu1 %v10100_v23  ;;  %v10377_v23 = vpack.c.bf16 %v3720_v28, %v3717_v52  ;;  %11148 = vst [vmem:[#allocation45_spill] sm:$0xff] %v10381_v59  ;;  %v10385_v58 = vpack.c.bf16 %v3726_v36, %v3723_v16  ;;  %v3729_v52 = vld [vmem:[#allocation8 + $0xc0] sm:$0xff]  ;;  %v3732_v28 = vld [vmem:[#allocation8 + $0xd8] sm:$0xff]  ;;  %v3735_v16 = vld [vmem:[#allocation8 + $0xf0] sm:$0xff] }
 0x6c4   :  { %8193 = vmatprep.subr.bf16.mxu0 %v10360_v48  ;;  %8223 = vmatprep.subr.bf16.mxu1 %v11047_v1  ;;  %v3733_v48 = vld [vmem:[#allocation8 + $0xe0] sm:$0xff]  ;;  %v3738_v36 = vld [vmem:[#allocation8 + $0x108] sm:$0xff] }
 0x6c5   :  { %3834 = vmatprep.mubr.f32.mxu0 %v11049_v54  ;;  %6957 = vmatprep.mubr.msk.f32.mxu1 %vm9120_vm0, %v11049_v54 }
 0x6c7   :  { %8195 = vmatpush1.bf16.msra.mxu0 %v10366_v38  ;;  %8225 = vmatpush3.bf16.msra.mxu1 %v10108_v31  ;;  %v10389_v31 = vpack.c.bf16 %v3733_v48, %v3730_v18  ;;  %v3742_v48 = vld [vmem:[#allocation8 + $0x128] sm:$0xff]  ;;  %v3745_v18 = vld [vmem:[#allocation8 + $0x140] sm:$0xff] }
 0x6c8   :  { %8197 = vmatprep.subr.bf16.mxu0 %v10370_v60  ;;  %8226 = vmatprep.subr.bf16.mxu1 %v11047_v1  ;;  %v10393_v60 = vpack.c.bf16 %v3732_v28, %v3729_v52  ;;  %v3741_v52 = vld [vmem:[#allocation8 + $0x120] sm:$0xff]  ;;  %v3744_v28 = vld [vmem:[#allocation8 + $0x138] sm:$0xff] }
 0x6cb   :  { %8199 = vmatpush1.bf16.msra.mxu0 %v10377_v23  ;;  %8228 = vmatpush3.bf16.msra.mxu1 %v10117_v20  ;;  %v10397_v20 = vpack.c.bf16 %v3739_v53, %v3736_v17  ;;  %v10409_v17 = vpack.c.bf16 %v3744_v28, %v3741_v52  ;;  %v11152_v52 = vld [vmem:[#allocation24_spill] sm:$0xff] }
 0x6cc   :  { %8201 = vmatprep.subr.bf16.mxu0 %v10381_v59  ;;  %8229 = vmatprep.subr.bf16.mxu1 %v11047_v1  ;;  %v10401_v59 = vpack.c.bf16 %v3738_v36, %v3735_v16 }
 0x6cf   :  { %8203 = vmatpush1.bf16.msra.mxu0 %v10385_v58  ;;  %8231 = vmatpush3.bf16.msra.mxu1 %v10123_v61  ;;  %v10405_v61 = vpack.c.bf16 %v3745_v18, %v3742_v48 }
 0x6d0   :  { %8205 = vmatprep.subr.bf16.mxu0 %v10389_v31  ;;  %8232 = vmatprep.subr.bf16.mxu1 %v11047_v1 }
 0x6d3   :  { %8207 = vmatpush1.bf16.msra.mxu0 %v10393_v60  ;;  %8234 = vmatpush3.bf16.msra.mxu1 %v10129_v8  ;;  %v11149_v8 = vld [vmem:[#allocation54_spill] sm:$0xff] }
 0x6d4   :  { %8209 = vmatprep.subr.bf16.mxu0 %v10397_v20  ;;  %8235 = vmatprep.subr.bf16.mxu1 %v11047_v1 }
 0x6d7   :  { %8211 = vmatpush1.bf16.msra.mxu0 %v10401_v59  ;;  %8237 = vmatpush3.bf16.msra.mxu1 %v10135_v29 }
 0x6d8   :  { %8213 = vmatprep.subr.bf16.mxu0 %v10405_v61  ;;  %8238 = vmatprep.subr.bf16.mxu1 %v11047_v1 }
 0x6db   :  { %8215 = vmatpush1.bf16.msra.mxu0 %v10409_v17  ;;  %8240 = vmatpush3.bf16.msra.mxu1 %v10141_v11 }
 0x6dc   :  { %8217 = vmatprep.subr.bf16.mxu0 %v10145_v21  ;;  %8241 = vmatprep.subr.bf16.mxu1 %v11047_v1  ;;  %v5878_v21 = vld [vmem:[%s10938_s4 + $0x3] sm:$0x7] }
 0x6df   :  { %8219 = vmatpush1.bf16.msra.mxu0 %v10149_v19  ;;  %8243 = vmatpush3.bf16.msra.mxu1 %v10151_v34  ;;  %v5877_v19 = vld [vmem:[%s10937_s3 + $0x3] sm:$0x7] }
 0x6e0   :  { %8245 = vmatprep.subr.bf16.mxu0 %v10163_v41  ;;  %8276 = vmatprep.subr.bf16.mxu1 %v11047_v1  ;;  %v11150_v34 = vld [vmem:[#allocation16_spill] sm:$0xff] }
 0x6e1   :  { %v3323_v41 = vrot.slane %v5877_v19, %v11150_v34 }
 0x6e2   :  { %3835 = vmatmul.mubr.f32.vlgmr.msra.gmra.mrb[20].mxu0 %v10275_v40  ;;  %6958 = vmatmul.mubr.f32.vlgmr.msra.gmra.mrb[54].mxu1 %v10275_v40 }
 0x6e3   :  { %8247 = vmatpush1.bf16.msra.mxu0 %v10165_v6  ;;  %8278 = vmatpush3.bf16.msra.mxu1 %v10168_v37  ;;  %v3529_v6 = vrot.slane %v5878_v21, %v11150_v34  ;;  %v11151_v37 = vld [vmem:[#allocation17_spill] sm:$0xff] }
 0x6e4   :  { %8249 = vmatprep.subr.bf16.mxu0 %v10172_v35  ;;  %8279 = vmatprep.subr.bf16.mxu1 %v11047_v1  ;;  %v3327_v35 = vrot.slane %v5877_v19, %v11151_v37 }
 0x6e5   :  { %4063 = vmatprep.mubr.f32.mxu0 %v11049_v54  ;;  %6992 = vmatprep.mubr.msk.f32.mxu1 %vm9120_vm0, %v11049_v54 }
 0x6e7   :  { %8251 = vmatpush1.bf16.msra.mxu0 %v10175_v45  ;;  %8281 = vmatpush3.bf16.msra.mxu1 %v10178_v43  ;;  %v3533_v45 = vrot.slane %v5878_v21, %v11151_v37  ;;  %v8788_v43 = vadd.f32 %v3529_v6, %v3323_v41 }
 0x6e8   :  { %8253 = vmatprep.subr.bf16.mxu0 %v10182_v62  ;;  %8282 = vmatprep.subr.bf16.mxu1 %v11047_v1 }
 0x6eb   :  { %8255 = vmatpush1.bf16.msra.mxu0 %v10185_v9  ;;  %8284 = vmatpush3.bf16.msra.mxu1 %v10188_v42  ;;  %v8790_v42 = vadd.f32 %v3533_v45, %v3327_v35 }
 0x6ec   :  { %8257 = vmatprep.subr.bf16.mxu0 %v10192_v2  ;;  %8285 = vmatprep.subr.bf16.mxu1 %v11047_v1 }
 0x6ef   :  { %8259 = vmatpush1.bf16.msra.mxu0 %v10195_v3  ;;  %8287 = vmatpush3.bf16.msra.mxu1 %v10198_v25 }
 0x6f0   :  { %8261 = vmatprep.subr.bf16.mxu0 %v10202_v55  ;;  %8288 = vmatprep.subr.bf16.mxu1 %v11047_v1 }
 0x6f3   :  { %8263 = vmatpush1.bf16.msra.mxu0 %v10205_v12  ;;  %8290 = vmatpush3.bf16.msra.mxu1 %v10208_v15 }
 0x6f4   :  { %8265 = vmatprep.subr.bf16.mxu0 %v10212_v4  ;;  %8291 = vmatprep.subr.bf16.mxu1 %v11047_v1 }
 0x6f7   :  { %8267 = vmatpush1.bf16.msra.mxu0 %v10215_v24  ;;  %8293 = vmatpush3.bf16.msra.mxu1 %v10218_v26 }
 0x6f8   :  { %8269 = vmatprep.subr.bf16.mxu0 %v10220_v30  ;;  %8294 = vmatprep.subr.bf16.mxu1 %v11047_v1  ;;  %v3537_v30 = vrot.slane %v5878_v21, %v9407_v0  ;;  %v11153_v21 = vld [vmem:[#allocation25_spill] sm:$0xff] }
 0x6fb   :  { %8271 = vmatpush1.bf16.msra.mxu0 %v10223_v50  ;;  %8296 = vmatpush3.bf16.msra.mxu1 %v10227_v10  ;;  %v3753_v50 = vld [vmem:[%s10938_s4] sm:$0x7]  ;;  %v3331_v10 = vrot.slane %v5877_v19, %v9407_v0 }
 0x6fc   :  { %8273 = vmatprep.subr.bf16.mxu0 %v10229_v56  ;;  %8297 = vmatprep.subr.bf16.mxu1 %v11047_v1  ;;  %v3762_v16 = vrot.slane %v3753_v50, %v11151_v37 }
 0x6fe   :  { %v8758_v41 = vadd.f32 %v3762_v16, %v11153_v21  ;;  %v4380_v21 = vld [vmem:[#allocation8 + $0x58] sm:$0xff] }
 0x6ff   :  { %8275 = vmatpush1.bf16.msra.mxu0 %v10233_v27  ;;  %8299 = vmatpush3.bf16.msra.mxu1 %v10237_v44  ;;  %v3758_v44 = vrot.slane %v3753_v50, %v11150_v34 }
 0x700   :  { %8301 = vmatprep.subr.bf16.mxu0 %v11149_v8  ;;  %8332 = vmatprep.subr.bf16.mxu1 %v11047_v1 }
 0x701   :  { %v8755_v28 = vadd.f32 %v3758_v44, %v11152_v52  ;;  %v11165_v52 = vld [vmem:[#allocation40_spill] sm:$0xff] }
 0x775   :  { %v3472_v29 = vpop.f32.mrb[50].mxu1 }
 0x776   :  { %v6889_v11 = vpop.f32.mrb[51].mxu1  ;;  %v3473_v36 = vadd.f32 %v3472_v29, %v3331_v10 }
 0x795   :  { %v3607_v62 = vpop.f32.mrb[18].mxu0  ;;  %v3678_v9 = vpop.f32.mrb[52].mxu1 }
 0x796   :  { %v8789_v2 = vadd.f32 %v8788_v43, %v3607_v62  ;;  %v3609_v3 = vpop.f32.mrb[19].mxu0  ;;  %v6924_v25 = vpop.f32.mrb[53].mxu1  ;;  %v3679_v27 = vadd.f32 %v3678_v9, %v3537_v30 }
 0x797   :  { %v8791_v12 = vadd.f32 %v8790_v42, %v3609_v3 }
 0x798   :  { %v5879_v55 = vmul.f32 -1.442695, %v8789_v2 }
 0x799   :  { %v5880_v15 = vmul.f32 -1.442695, %v8791_v12 }
 0x79a   :  { %8922 = vpow2.f32 %v5879_v55 }
 0x79b   :  { %8924 = vpow2.f32 %v5880_v15 }
 0x7a4   :  { %v8923_v4 = vpop.eup %8922 }
 0x7a5   :  { %v3686_v24 = vadd.f32 1.0, %v8923_v4  ;;  %v8925_v26 = vpop.eup %8924  ;;  %v3766_v4 = vrot.slane %v3753_v50, %v9407_v0  ;;  %v11160_v50 = vld [vmem:[#allocation20_spill] sm:$0xff] }
 0x7a6   :  { %v3693_v56 = vadd.f32 1.0, %v8925_v26 }
 0x7a7   :  { %8926 = vrcp.f32 %v3686_v24 }
 0x7a8   :  { %8928 = vrcp.f32 %v3693_v56  ;;  %v11155_v56 = vld [vmem:[#allocation32_spill] sm:$0xff] }
 0x7b1   :  { %v8927_v53 = vpop.eup %8926 }
 0x7b2   :  { %v3696_v48 = vmul.f32 %v8927_v53, %v3679_v27  ;;  %v8929_v62 = vpop.eup %8928 }
 0x7b3   :  { %v3699_v42 = vsub.f32 1.0, %v8929_v62  ;;  %v3701_v3 = vmul.f32 %v8929_v62, %v10266_v7  ;;  %v11170_v62 = vld [vmem:[#allocation45_spill] sm:$0xff] }
 0x7b4   :  { %v3697_v18 = vadd.f32 %v3696_v48, %v3473_v36 }
 0x7b5   :  { %v3836_v8 = vpop.f32.mrb[20].mxu0  ;;  %v3907_v11 = vpop.f32.mrb[54].mxu1 }
 0x7b6   :  { %8930 = vtanh.f32 %v3697_v18  ;;  %v8756_v6 = vadd.f32 %v8755_v28, %v3836_v8  ;;  %v3838_v19 = vpop.f32.mrb[21].mxu0  ;;  %v6959_v35 = vpop.f32.mrb[55].mxu1  ;;  %v3908_v26 = vadd.f32 %v3907_v11, %v3766_v4  ;;  %v4371_v28 = vld [vmem:[#allocation8 + $0x10] sm:$0xff]  ;;  %v4374_v8 = vld [vmem:[#allocation8 + $0x28] sm:$0xff]  ;;  %v4377_v11 = vld [vmem:[#allocation8 + $0x40] sm:$0xff] }
 0x7b7   :  { %v8759_v45 = vadd.f32 %v8758_v41, %v3838_v19  ;;  %v4386_v41 = vld [vmem:[#allocation8 + $0x88] sm:$0xff]  ;;  %v11169_v19 = vld [vmem:[#allocation44_spill] sm:$0xff] }
 0x7b8   :  { %v5881_v43 = vmul.f32 -1.442695, %v8756_v6  ;;  %v4389_v35 = vld [vmem:[#allocation8 + $0xa0] sm:$0xff] }
 0x7b9   :  { %v5882_v9 = vmul.f32 -1.442695, %v8759_v45  ;;  %v4392_v45 = vld [vmem:[#allocation8 + $0xb8] sm:$0xff]  ;;  %v4413_v4 = vld [vmem:[#allocation8 + $0x160] sm:$0xff] }
 0x7ba   :  { %8932 = vpow2.f32 %v5881_v43  ;;  %v10543_v43 = vpack.c.bf16 %v4392_v45, %v4389_v35  ;;  %v4619_v35 = vld [vmem:[#allocation6 + $0x228] sm:$0xff]  ;;  %v4618_v45 = vld [vmem:[#allocation6 + $0x220] sm:$0xff] }
 0x7bb   :  { %8934 = vpow2.f32 %v5882_v9  ;;  %v4398_v9 = vld [vmem:[#allocation8 + $0xe8] sm:$0xff] }
 0x7c0   :  { %v8931_v29 = vpop.eup %8930 }
 0x7c1   :  { %v3700_v2 = vmul.f32 %v8931_v29, %v3699_v42  ;;  %v4404_v29 = vld [vmem:[#allocation8 + $0x118] sm:$0xff] }
 0x7c3   :  { %v10478_v25 = vadd.f32 %v3701_v3, %v3700_v2  ;;  %v4410_v3 = vld [vmem:[#allocation8 + $0x148] sm:$0xff] }
 0x7c4   :  { %v8933_v55 = vpop.eup %8932 }
 0x7c5   :  { %11154 = vst [vmem:[#allocation46_spill] sm:$0xff] %v10478_v25  ;;  %v3915_v12 = vadd.f32 1.0, %v8933_v55  ;;  %v8935_v15 = vpop.eup %8934  ;;  %v4412_v55 = vld [vmem:[#allocation8 + $0x158] sm:$0xff] }
 0x7c6   :  { %v3922_v24 = vadd.f32 1.0, %v8935_v15  ;;  %v4411_v15 = vld [vmem:[#allocation8 + $0x150] sm:$0xff] }
 0x7c7   :  { %8936 = vrcp.f32 %v3915_v12  ;;  %v4415_v12 = vld [vmem:[#allocation8 + $0x170] sm:$0xff] }
 0x7c8   :  { %8938 = vrcp.f32 %v3922_v24  ;;  %v4416_v24 = vld [vmem:[#allocation8 + $0x178] sm:$0xff] }
 0x7d1   :  { %v8937_v30 = vpop.eup %8936 }
 0x7d2   :  { %v3925_v10 = vmul.f32 %v8937_v30, %v3908_v26  ;;  %v8939_v44 = vpop.eup %8938 }
 0x7d3   :  { %v3928_v53 = vsub.f32 1.0, %v8939_v44  ;;  %v3930_v48 = vmul.f32 %v8939_v44, %v10275_v40  ;;  %v11158_v40 = vld [vmem:[#allocation31_spill] sm:$0xff] }
 0x7d4   :  { %v3926_v27 = vadd.f32 %v3925_v10, %v11155_v56  ;;  %v4598_v10 = vld [vmem:[#allocation6 + $0x180] sm:$0xff]  ;;  %v4601_v56 = vld [vmem:[#allocation6 + $0x198] sm:$0xff] }
 0x7d5   :  { %v10585_v44 = vpack.c.bf16 %v4601_v56, %v4598_v10  ;;  %v4628_v10 = vld [vmem:[#allocation6 + $0x270] sm:$0xff]  ;;  %v4631_v56 = vld [vmem:[#allocation6 + $0x288] sm:$0xff] }
 0x7d6   :  { %8940 = vtanh.f32 %v3926_v27  ;;  %v4600_v27 = vld [vmem:[#allocation6 + $0x190] sm:$0xff] }
 0x7e0   :  { %v8941_v16 = vpop.eup %8940 }
 0x7e1   :  { %v3929_v36 = vmul.f32 %v8941_v16, %v3928_v53  ;;  %v4603_v53 = vld [vmem:[#allocation6 + $0x1a8] sm:$0xff] }
 0x7e2   :  { %v10588_v16 = vpack.c.bf16 %v4603_v53, %v4600_v27  ;;  %v4630_v27 = vld [vmem:[#allocation6 + $0x280] sm:$0xff]  ;;  %v10635_v53 = vpack.c.bf16 %v4631_v56, %v4628_v10 }
 0x7e3   :  { %v10483_v18 = vadd.f32 %v3930_v48, %v3929_v36  ;;  %v4605_v36 = vld [vmem:[#allocation6 + $0x1b8] sm:$0xff]  ;;  %v4608_v48 = vld [vmem:[#allocation6 + $0x1d0] sm:$0xff]  ;;  %v5883_v10 = vld [vmem:[%s10937_s3 + $0x3] sm:$0x7] }
 0x7e4   :  { %v3987_v56 = vrot.slane %v5883_v10, %v11150_v34 }
 0x7e5   :  { %4064 = vmatmul.mubr.f32.vlgmr.msra.gmra.mrb[22].mxu0 %v10483_v18  ;;  %6993 = vmatmul.mubr.f32.vlgmr.msra.gmra.mrb[56].mxu1 %v10483_v18 }
 0x7e6   :  { %8303 = vmatpush1.bf16.msra.mxu0 %v10271_v5  ;;  %8334 = vmatpush3.bf16.msra.mxu1 %v10273_v49  ;;  %v11156_v5 = vld [vmem:[#allocation18_spill] sm:$0xff]  ;;  %v11157_v49 = vld [vmem:[#allocation19_spill] sm:$0xff] }
 0x7e7   :  { %8305 = vmatprep.subr.bf16.mxu0 %v10277_v33  ;;  %8335 = vmatprep.subr.bf16.mxu1 %v11047_v1  ;;  %v11159_v33 = vld [vmem:[#allocation36_spill] sm:$0xff] }
 0x7e8   :  { %4269 = vmatprep.mubr.f32.mxu0 %v11049_v54  ;;  %7027 = vmatprep.mubr.msk.f32.mxu1 %vm9120_vm0, %v11049_v54 }
 0x7ea   :  { %8307 = vmatpush1.bf16.msra.mxu0 %v10283_v47  ;;  %8337 = vmatpush3.bf16.msra.mxu1 %v10285_v63  ;;  %v11161_v47 = vld [vmem:[#allocation21_spill] sm:$0xff]  ;;  %v11162_v63 = vld [vmem:[#allocation30_spill] sm:$0xff] }
 0x7eb   :  { %8309 = vmatprep.subr.bf16.mxu0 %v10289_v32  ;;  %8338 = vmatprep.subr.bf16.mxu1 %v11047_v1  ;;  %v11163_v32 = vld [vmem:[#allocation38_spill] sm:$0xff] }
 0x7ee   :  { %8311 = vmatpush1.bf16.msra.mxu0 %v10296_v14  ;;  %8340 = vmatpush3.bf16.msra.mxu1 %v11156_v5  ;;  %v11164_v14 = vld [vmem:[#allocation39_spill] sm:$0xff]  ;;  %v10592_v5 = vpack.c.bf16 %v4608_v48, %v4605_v36  ;;  %v4635_v48 = vld [vmem:[#allocation6 + $0x2a8] sm:$0xff] }
 0x7ef   :  { %8313 = vmatprep.subr.bf16.mxu0 %v11157_v49  ;;  %8341 = vmatprep.subr.bf16.mxu1 %v11047_v1  ;;  %v4604_v49 = vld [vmem:[#allocation6 + $0x1b0] sm:$0xff]  ;;  %v4633_v36 = vld [vmem:[#allocation6 + $0x298] sm:$0xff] }
 0x7f2   :  { %8315 = vmatpush1.bf16.msra.mxu0 %v11158_v40  ;;  %8343 = vmatpush3.bf16.msra.mxu1 %v11159_v33  ;;  %v4607_v40 = vld [vmem:[#allocation6 + $0x1c8] sm:$0xff]  ;;  %v4606_v33 = vld [vmem:[#allocation6 + $0x1c0] sm:$0xff] }
 0x7f3   :  { %8317 = vmatprep.subr.bf16.mxu0 %v11160_v50  ;;  %8344 = vmatprep.subr.bf16.mxu1 %v11047_v1  ;;  %v10595_v50 = vpack.c.bf16 %v4607_v40, %v4604_v49  ;;  %v4638_v49 = vld [vmem:[#allocation6 + $0x2c0] sm:$0xff]  ;;  %v10638_v40 = vpack.c.bf16 %v4633_v36, %v4630_v27  ;;  %v3991_v36 = vrot.slane %v5883_v10, %v11151_v37 }
 0x7f6   :  { %8319 = vmatpush1.bf16.msra.mxu0 %v11161_v47  ;;  %8346 = vmatpush3.bf16.msra.mxu1 %v11162_v63  ;;  %v4609_v47 = vld [vmem:[#allocation6 + $0x1d8] sm:$0xff] }
 0x7f7   :  { %8321 = vmatprep.subr.bf16.mxu0 %v11163_v32  ;;  %8347 = vmatprep.subr.bf16.mxu1 %v11047_v1  ;;  %v10598_v63 = vpack.c.bf16 %v4609_v47, %v4606_v33  ;;  %v4611_v32 = vld [vmem:[#allocation6 + $0x1e8] sm:$0xff]  ;;  %v10640_v33 = vpack.c.bf16 %v4638_v49, %v4635_v48  ;;  %v4634_v47 = vld [vmem:[#allocation6 + $0x2a0] sm:$0xff] }
 0x7fa   :  { %8323 = vmatpush1.bf16.msra.mxu0 %v10326_v13  ;;  %8349 = vmatpush3.bf16.msra.mxu1 %v10328_v51  ;;  %v10520_v13 = vpack.c.bf16 %v4374_v8, %v4371_v28  ;;  %v11166_v51 = vld [vmem:[#allocation41_spill] sm:$0xff]  ;;  %v4610_v28 = vld [vmem:[#allocation6 + $0x1e0] sm:$0xff]  ;;  %v4613_v8 = vld [vmem:[#allocation6 + $0x1f8] sm:$0xff] }
 0x7fb   :  { %8325 = vmatprep.subr.bf16.mxu0 %v11164_v14  ;;  %8350 = vmatprep.subr.bf16.mxu1 %v11047_v1  ;;  %v4614_v14 = vld [vmem:[#allocation6 + $0x200] sm:$0xff] }
 0x7fe   :  { %8327 = vmatpush1.bf16.msra.mxu0 %v11165_v52  ;;  %8352 = vmatpush3.bf16.msra.mxu1 %v10338_v22  ;;  %v11167_v22 = vld [vmem:[#allocation42_spill] sm:$0xff]  ;;  %v10602_v52 = vpack.c.bf16 %v4614_v14, %v4611_v32  ;;  %v4637_v32 = vld [vmem:[#allocation6 + $0x2b8] sm:$0xff] }
 0x7ff   :  { %8329 = vmatprep.subr.bf16.mxu0 %v10342_v46  ;;  %8353 = vmatprep.subr.bf16.mxu1 %v11047_v1  ;;  %v10528_v46 = vpack.c.bf16 %v4380_v21, %v4377_v11  ;;  %v10605_v11 = vpack.c.bf16 %v4613_v8, %v4610_v28  ;;  %v4615_v21 = vld [vmem:[#allocation6 + $0x208] sm:$0xff]  ;;  %v4636_v14 = vld [vmem:[#allocation6 + $0x2b0] sm:$0xff]  ;;  %v10643_v28 = vpack.c.bf16 %v4637_v32, %v4634_v47 }
 0x800   :  { %v4639_v8 = vld [vmem:[#allocation6 + $0x2c8] sm:$0xff] }
 0x802   :  { %8331 = vmatpush1.bf16.msra.mxu0 %v10346_v39  ;;  %8355 = vmatpush3.bf16.msra.mxu1 %v10348_v57  ;;  %v11168_v39 = vld [vmem:[#allocation43_spill] sm:$0xff]  ;;  %v4383_v57 = vld [vmem:[#allocation8 + $0x70] sm:$0xff] }
 0x803   :  { %8357 = vmatprep.subr.bf16.mxu0 %v11166_v51  ;;  %8388 = vmatprep.subr.bf16.mxu1 %v11047_v1  ;;  %v10537_v6 = vpack.c.bf16 %v4386_v41, %v4383_v57  ;;  %v4612_v51 = vld [vmem:[#allocation6 + $0x1f0] sm:$0xff] }
 0x804   :  { %v4620_v57 = vld [vmem:[#allocation6 + $0x230] sm:$0xff] }
 0x805   :  { %4270 = vmatmul.mubr.f32.vlgmr.msra.gmra.mrb[22].mxu0 %v10478_v25  ;;  %7028 = vmatmul.mubr.f32.vlgmr.msra.gmra.mrb[58].mxu1 %v10478_v25 }
 0x806   :  { %8359 = vmatpush1.bf16.msra.mxu0 %v11167_v22  ;;  %8390 = vmatpush3.bf16.msra.mxu1 %v10520_v13  ;;  %v10608_v22 = vpack.c.bf16 %v4615_v21, %v4612_v51  ;;  %v4641_v51 = vld [vmem:[#allocation6 + $0x2d8] sm:$0xff]  ;;  %v4644_v21 = vld [vmem:[#allocation6 + $0x2f0] sm:$0xff] }
 0x807   :  { %8361 = vmatprep.subr.bf16.mxu0 %v11168_v39  ;;  %8391 = vmatprep.subr.bf16.mxu1 %v11047_v1  ;;  %v4617_v39 = vld [vmem:[#allocation6 + $0x218] sm:$0xff] }
 0x808   :  { %4498 = vmatprep.mubr.f32.mxu0 %v11049_v54  ;;  %7062 = vmatprep.mubr.msk.f32.mxu1 %vm9120_vm0, %v11049_v54  ;;  %v10612_v41 = vpack.c.bf16 %v4620_v57, %v4617_v39  ;;  %v10647_v39 = vpack.c.bf16 %v4639_v8, %v4636_v14  ;;  %v10649_v57 = vpack.c.bf16 %v4644_v21, %v4641_v51 }
 0x80a   :  { %8363 = vmatpush1.bf16.msra.mxu0 %v10366_v38  ;;  %8393 = vmatpush3.bf16.msra.mxu1 %v10528_v46  ;;  %v4395_v38 = vld [vmem:[#allocation8 + $0xd0] sm:$0xff] }
 0x80b   :  { %8365 = vmatprep.subr.bf16.mxu0 %v11169_v19  ;;  %8394 = vmatprep.subr.bf16.mxu1 %v11047_v1  ;;  %v10549_v42 = vpack.c.bf16 %v4398_v9, %v4395_v38  ;;  %v4616_v19 = vld [vmem:[#allocation6 + $0x210] sm:$0xff]  ;;  %v4621_v38 = vld [vmem:[#allocation6 + $0x238] sm:$0xff] }
 0x80c   :  { %v10618_v9 = vpack.c.bf16 %v4621_v38, %v4618_v45  ;;  %v4642_v45 = vld [vmem:[#allocation6 + $0x2e0] sm:$0xff]  ;;  %v4645_v38 = vld [vmem:[#allocation6 + $0x2f8] sm:$0xff] }
 0x80e   :  { %8367 = vmatpush1.bf16.msra.mxu0 %v10377_v23  ;;  %8396 = vmatpush3.bf16.msra.mxu1 %v10537_v6  ;;  %v4401_v23 = vld [vmem:[#allocation8 + $0x100] sm:$0xff] }
 0x80f   :  { %8369 = vmatprep.subr.bf16.mxu0 %v11170_v62  ;;  %8397 = vmatprep.subr.bf16.mxu1 %v11047_v1  ;;  %v10555_v2 = vpack.c.bf16 %v4404_v29, %v4401_v23  ;;  %v10615_v62 = vpack.c.bf16 %v4619_v35, %v4616_v19  ;;  %v4623_v23 = vld [vmem:[#allocation6 + $0x248] sm:$0xff]  ;;  %v4626_v29 = vld [vmem:[#allocation6 + $0x260] sm:$0xff]  ;;  %v4640_v19 = vld [vmem:[#allocation6 + $0x2d0] sm:$0xff] }
 0x810   :  { %v4643_v35 = vld [vmem:[#allocation6 + $0x2e8] sm:$0xff] }
 0x812   :  { %8371 = vmatpush1.bf16.msra.mxu0 %v10385_v58  ;;  %8399 = vmatpush3.bf16.msra.mxu1 %v10543_v43  ;;  %v4407_v58 = vld [vmem:[#allocation8 + $0x130] sm:$0xff] }
 0x813   :  { %8373 = vmatprep.subr.bf16.mxu0 %v10389_v31  ;;  %8400 = vmatprep.subr.bf16.mxu1 %v11047_v1  ;;  %v10561_v31 = vpack.c.bf16 %v4410_v3, %v4407_v58  ;;  %v10622_v58 = vpack.c.bf16 %v4626_v29, %v4623_v23  ;;  %v4622_v3 = vld [vmem:[#allocation6 + $0x240] sm:$0xff]  ;;  %v4805_v23 = vld [vmem:[#allocation8 + $0x188] sm:$0xff] }
 0x814   :  { %v4808_v29 = vld [vmem:[#allocation8 + $0x1a0] sm:$0xff] }
 0x816   :  { %8375 = vmatpush1.bf16.msra.mxu0 %v10393_v60  ;;  %8402 = vmatpush3.bf16.msra.mxu1 %v10549_v42  ;;  %v10565_v60 = vpack.c.bf16 %v4415_v12, %v4412_v55  ;;  %v4625_v55 = vld [vmem:[#allocation6 + $0x258] sm:$0xff]  ;;  %v4624_v12 = vld [vmem:[#allocation6 + $0x250] sm:$0xff] }
 0x817   :  { %8377 = vmatprep.subr.bf16.mxu0 %v10397_v20  ;;  %8403 = vmatprep.subr.bf16.mxu1 %v11047_v1  ;;  %v4414_v20 = vld [vmem:[#allocation8 + $0x168] sm:$0xff] }
 0x818   :  { %v10569_v26 = vpack.c.bf16 %v4414_v20, %v4411_v15  ;;  %v10625_v15 = vpack.c.bf16 %v4625_v55, %v4622_v3  ;;  %v4627_v20 = vld [vmem:[#allocation6 + $0x268] sm:$0xff]  ;;  %v10653_v3 = vpack.c.bf16 %v4643_v35, %v4640_v19  ;;  %v10657_v55 = vpack.c.bf16 %v4645_v38, %v4642_v45 }
 0x81a   :  { %8379 = vmatpush1.bf16.msra.mxu0 %v10401_v59  ;;  %8405 = vmatpush3.bf16.msra.mxu1 %v10555_v2  ;;  %v10571_v59 = vpack.c.bf16 %v4416_v24, %v4413_v4  ;;  %v10628_v4 = vpack.c.bf16 %v4627_v20, %v4624_v12  ;;  %v4629_v24 = vld [vmem:[#allocation6 + $0x278] sm:$0xff]  ;;  %v10659_v12 = vpack.c.bf16 %v4808_v29, %v4805_v23 }
 0x81b   :  { %8381 = vmatprep.subr.bf16.mxu0 %v10405_v61  ;;  %8406 = vmatprep.subr.bf16.mxu1 %v11047_v1  ;;  %v4599_v61 = vld [vmem:[#allocation6 + $0x188] sm:$0xff] }
 0x81c   :  { %11171 = vst [vmem:[#allocation47_spill] sm:$0xff] %v10659_v12 }
 0x81e   :  { %8383 = vmatpush1.bf16.msra.mxu0 %v10409_v17  ;;  %8408 = vmatpush3.bf16.msra.mxu1 %v10561_v31  ;;  %v4602_v17 = vld [vmem:[#allocation6 + $0x1a0] sm:$0xff] }
 0x81f   :  { %8385 = vmatprep.subr.bf16.mxu0 %v10565_v60  ;;  %8409 = vmatprep.subr.bf16.mxu1 %v11047_v1  ;;  %v10583_v30 = vpack.c.bf16 %v4602_v17, %v4599_v61  ;;  %v4632_v61 = vld [vmem:[#allocation6 + $0x290] sm:$0xff] }
 0x820   :  { %v10632_v17 = vpack.c.bf16 %v4632_v61, %v4629_v24  ;;  %v5884_v61 = vld [vmem:[%s10938_s4 + $0x3] sm:$0x7] }
 0x821   :  { %v4193_v27 = vrot.slane %v5884_v61, %v11150_v34  ;;  %v4197_v48 = vrot.slane %v5884_v61, %v11151_v37 }
 0x822   :  { %8387 = vmatpush1.bf16.msra.mxu0 %v10569_v26  ;;  %8411 = vmatpush3.bf16.msra.mxu1 %v10571_v59 }
 0x823   :  { %8444 = vmatprep.subr.bf16.mxu1 %v11047_v1  ;;  %8413 = vmatprep.subr.bf16.mxu0 %v10583_v30  ;;  %v8792_v49 = vadd.f32 %v4193_v27, %v3987_v56  ;;  %v8794_v14 = vadd.f32 %v4197_v48, %v3991_v36  ;;  %v4417_v56 = vld [vmem:[%s10938_s4] sm:$0x7]  ;;  %v3995_v27 = vrot.slane %v5883_v10, %v9407_v0 }
 0x825   :  { %4499 = vmatmul.mubr.f32.vlgmr.msra.gmra.mrb[24].mxu0 %v10483_v18  ;;  %7063 = vmatmul.mubr.f32.vlgmr.msra.gmra.mrb[60].mxu1 %v10483_v18 }
 0x826   :  { %4727 = vmatprep.mubr.f32.mxu0 %v11049_v54  ;;  %7097 = vmatprep.mubr.msk.f32.mxu1 %vm9120_vm0, %v11049_v54 }
 0x827   :  { %8415 = vmatpush1.bf16.msra.mxu0 %v10585_v44  ;;  %8446 = vmatpush3.bf16.msra.mxu1 %v10588_v16 }
 0x828   :  { %8447 = vmatprep.subr.bf16.mxu1 %v11047_v1  ;;  %8417 = vmatprep.subr.bf16.mxu0 %v10592_v5 }
 0x82b   :  { %8419 = vmatpush1.bf16.msra.mxu0 %v10595_v50  ;;  %8449 = vmatpush3.bf16.msra.mxu1 %v10598_v63 }
 0x82c   :  { %8450 = vmatprep.subr.bf16.mxu1 %v11047_v1  ;;  %8421 = vmatprep.subr.bf16.mxu0 %v10602_v52 }
 0x82f   :  { %8423 = vmatpush1.bf16.msra.mxu0 %v10605_v11  ;;  %8452 = vmatpush3.bf16.msra.mxu1 %v10608_v22 }
 0x830   :  { %8453 = vmatprep.subr.bf16.mxu1 %v11047_v1  ;;  %8425 = vmatprep.subr.bf16.mxu0 %v10612_v41 }
 0x833   :  { %8427 = vmatpush1.bf16.msra.mxu0 %v10615_v62  ;;  %8455 = vmatpush3.bf16.msra.mxu1 %v10618_v9 }
 0x834   :  { %8456 = vmatprep.subr.bf16.mxu1 %v11047_v1  ;;  %8429 = vmatprep.subr.bf16.mxu0 %v10622_v58 }
 0x837   :  { %8431 = vmatpush1.bf16.msra.mxu0 %v10625_v15  ;;  %8458 = vmatpush3.bf16.msra.mxu1 %v10628_v4 }
 0x838   :  { %8459 = vmatprep.subr.bf16.mxu1 %v11047_v1  ;;  %8433 = vmatprep.subr.bf16.mxu0 %v10632_v17 }
 0x83b   :  { %8435 = vmatpush1.bf16.msra.mxu0 %v10635_v53  ;;  %8461 = vmatpush3.bf16.msra.mxu1 %v10638_v40 }
 0x83c   :  { %8437 = vmatprep.subr.bf16.mxu0 %v10640_v33  ;;  %8462 = vmatprep.subr.bf16.mxu1 %v11047_v1 }
 0x83f   :  { %8439 = vmatpush1.bf16.msra.mxu0 %v10643_v28  ;;  %8464 = vmatpush3.bf16.msra.mxu1 %v10647_v39 }
 0x840   :  { %8441 = vmatprep.subr.bf16.mxu0 %v10649_v57  ;;  %8465 = vmatprep.subr.bf16.mxu1 %v11047_v1 }
 0x843   :  { %8443 = vmatpush1.bf16.msra.mxu0 %v10653_v3  ;;  %8467 = vmatpush3.bf16.msra.mxu1 %v10657_v55 }
 0x844   :  { %8469 = vmatprep.subr.bf16.mxu0 %v10659_v12  ;;  %8500 = vmatprep.subr.bf16.mxu1 %v11047_v1 }
 0x8b8   :  { %v4136_v20 = vpop.f32.mrb[56].mxu1 }
 0x8b9   :  { %v6994_v24 = vpop.f32.mrb[57].mxu1 }
 0x8ba   :  { %v4201_v24 = vrot.slane %v5884_v61, %v9407_v0 }
 0x8d8   :  { %v4271_v47 = vpop.f32.mrb[22].mxu0  ;;  %v4342_v32 = vpop.f32.mrb[58].mxu1 }
 0x8d9   :  { %v8793_v8 = vadd.f32 %v8792_v49, %v4271_v47  ;;  %v4273_v51 = vpop.f32.mrb[23].mxu0  ;;  %v7029_v21 = vpop.f32.mrb[59].mxu1  ;;  %v4343_v48 = vadd.f32 %v4342_v32, %v4201_v24  ;;  %v4422_v49 = vrot.slane %v4417_v56, %v11150_v34 }
 0x8da   :  { %v8795_v35 = vadd.f32 %v8794_v14, %v4273_v51  ;;  %v4426_v14 = vrot.slane %v4417_v56, %v11151_v37 }
 0x8db   :  { %v5885_v19 = vmul.f32 -1.442695, %v8793_v8  ;;  %v4137_v8 = vadd.f32 %v4136_v20, %v3995_v27 }
 0x8dc   :  { %v5886_v45 = vmul.f32 -1.442695, %v8795_v35 }
 0x8dd   :  { %8942 = vpow2.f32 %v5885_v19  ;;  %v11172_v19 = vld [vmem:[#allocation26_spill] sm:$0xff] }
 0x8de   :  { %8944 = vpow2.f32 %v5886_v45  ;;  %v8761_v35 = vadd.f32 %v4422_v49, %v11172_v19 }
 0x8e7   :  { %v8943_v38 = vpop.eup %8942 }
 0x8e8   :  { %v4350_v23 = vadd.f32 1.0, %v8943_v38  ;;  %v8945_v29 = vpop.eup %8944  ;;  %v11173_v38 = vld [vmem:[#allocation27_spill] sm:$0xff] }
 0x8e9   :  { %v4357_v36 = vadd.f32 1.0, %v8945_v29 }
 0x8ea   :  { %8946 = vrcp.f32 %v4350_v23  ;;  %v8764_v23 = vadd.f32 %v4426_v14, %v11173_v38 }
 0x8eb   :  { %8948 = vrcp.f32 %v4357_v36 }
 0x8f4   :  { %v8947_v47 = vpop.eup %8946 }
 0x8f5   :  { %v4360_v51 = vmul.f32 %v8947_v47, %v4343_v48  ;;  %v8949_v34 = vpop.eup %8948 }
 0x8f6   :  { %v4363_v37 = vsub.f32 1.0, %v8949_v34  ;;  %v4365_v36 = vmul.f32 %v8949_v34, %v10478_v25  ;;  %v4807_v34 = vld [vmem:[#allocation8 + $0x198] sm:$0xff] }
 0x8f7   :  { %v4361_v21 = vadd.f32 %v4360_v51, %v4137_v8  ;;  %v4430_v8 = vrot.slane %v4417_v56, %v9407_v0  ;;  %v4839_v25 = vld [vmem:[#allocation8 + $0x298] sm:$0xff] }
 0x8f8   :  { %v4500_v61 = vpop.f32.mrb[24].mxu0  ;;  %v4571_v45 = vpop.f32.mrb[60].mxu1 }
 0x8f9   :  { %8950 = vtanh.f32 %v4361_v21  ;;  %v8762_v7 = vadd.f32 %v8761_v35, %v4500_v61  ;;  %v4502_v10 = vpop.f32.mrb[25].mxu0  ;;  %v7064_v29 = vpop.f32.mrb[61].mxu1  ;;  %v4572_v21 = vadd.f32 %v4571_v45, %v4430_v8  ;;  %v11174_v35 = vld [vmem:[#allocation35_spill] sm:$0xff]  ;;  %v4812_v8 = vld [vmem:[#allocation8 + $0x1c0] sm:$0xff] }
 0x8fa   :  { %v8765_v32 = vadd.f32 %v8764_v23, %v4502_v10  ;;  %v4806_v23 = vld [vmem:[#allocation8 + $0x190] sm:$0xff]  ;;  %v4809_v10 = vld [vmem:[#allocation8 + $0x1a8] sm:$0xff] }
 0x8fb   :  { %v5887_v24 = vmul.f32 -1.442695, %v8762_v7  ;;  %v10693_v45 = vpack.c.bf16 %v4809_v10, %v4806_v23  ;;  %v4826_v23 = vld [vmem:[#allocation8 + $0x230] sm:$0xff] }
 0x8fc   :  { %v5888_v12 = vmul.f32 -1.442695, %v8765_v32  ;;  %v4811_v32 = vld [vmem:[#allocation8 + $0x1b8] sm:$0xff] }
 0x8fd   :  { %8952 = vpow2.f32 %v5887_v24  ;;  %v4814_v24 = vld [vmem:[#allocation8 + $0x1d0] sm:$0xff] }
 0x8fe   :  { %8954 = vpow2.f32 %v5888_v12 }
 0x903   :  { %v8951_v20 = vpop.eup %8950 }
 0x904   :  { %v4364_v27 = vmul.f32 %v8951_v20, %v4363_v37  ;;  %v4804_v37 = vld [vmem:[#allocation8 + $0x180] sm:$0xff] }
 0x906   :  { %v10686_v48 = vadd.f32 %v4365_v36, %v4364_v27  ;;  %v10691_v27 = vpack.c.bf16 %v4807_v34, %v4804_v37  ;;  %v4810_v36 = vld [vmem:[#allocation8 + $0x1b0] sm:$0xff]  ;;  %v4823_v34 = vld [vmem:[#allocation8 + $0x218] sm:$0xff] }
 0x907   :  { %v8953_v49 = vpop.eup %8952  ;;  %v4818_v37 = vld [vmem:[#allocation8 + $0x1f0] sm:$0xff] }
 0x908   :  { %v4579_v47 = vadd.f32 1.0, %v8953_v49  ;;  %v8955_v14 = vpop.eup %8954 }
 0x909   :  { %v4586_v51 = vadd.f32 1.0, %v8955_v14  ;;  %v4813_v14 = vld [vmem:[#allocation8 + $0x1c8] sm:$0xff] }
 0x90a   :  { %8956 = vrcp.f32 %v4579_v47  ;;  %v10697_v47 = vpack.c.bf16 %v4814_v24, %v4811_v32  ;;  %v4822_v32 = vld [vmem:[#allocation8 + $0x210] sm:$0xff]  ;;  %v10722_v24 = vpack.c.bf16 %v4826_v23, %v4823_v34  ;;  %v4835_v34 = vld [vmem:[#allocation8 + $0x278] sm:$0xff] }
 0x90b   :  { %8958 = vrcp.f32 %v4586_v51  ;;  %v4815_v51 = vld [vmem:[#allocation8 + $0x1d8] sm:$0xff]  ;;  %v4838_v23 = vld [vmem:[#allocation8 + $0x290] sm:$0xff] }
 0x90c   :  { %11176 = vst [vmem:[#allocation49_spill] sm:$0xff] %v10722_v24 }
 0x914   :  { %v8957_v7 = vpop.eup %8956 }
 0x915   :  { %v4589_v19 = vmul.f32 %v8957_v7, %v4572_v21  ;;  %v8959_v12 = vpop.eup %8958  ;;  %v4817_v21 = vld [vmem:[#allocation8 + $0x1e8] sm:$0xff]  ;;  %v4820_v7 = vld [vmem:[#allocation8 + $0x200] sm:$0xff] }
 0x916   :  { %v4592_v38 = vsub.f32 1.0, %v8959_v12  ;;  %v4594_v56 = vmul.f32 %v8959_v12, %v10483_v18  ;;  %v10703_v18 = vpack.c.bf16 %v4813_v14, %v4810_v36  ;;  %v4819_v12 = vld [vmem:[#allocation8 + $0x1f8] sm:$0xff]  ;;  %v4829_v14 = vld [vmem:[#allocation8 + $0x248] sm:$0xff] }
 0x917   :  { %v4590_v61 = vadd.f32 %v4589_v19, %v11174_v35  ;;  %v10705_v19 = vpack.c.bf16 %v4815_v51, %v4812_v8  ;;  %v4816_v35 = vld [vmem:[#allocation8 + $0x1e0] sm:$0xff]  ;;  %v4827_v36 = vld [vmem:[#allocation8 + $0x238] sm:$0xff] }
 0x918   :  { %v10716_v10 = vpack.c.bf16 %v4819_v12, %v4816_v35  ;;  %v4832_v8 = vld [vmem:[#allocation8 + $0x260] sm:$0xff]  ;;  %v4831_v12 = vld [vmem:[#allocation8 + $0x258] sm:$0xff] }
 0x919   :  { %8960 = vtanh.f32 %v4590_v61  ;;  %v10709_v61 = vpack.c.bf16 %v4820_v7, %v4817_v21  ;;  %v4828_v7 = vld [vmem:[#allocation8 + $0x240] sm:$0xff]  ;;  %v10732_v35 = vpack.c.bf16 %v4832_v8, %v4829_v14  ;;  %v4837_v14 = vld [vmem:[#allocation8 + $0x288] sm:$0xff] }
 0x91a   :  { %v4836_v8 = vld [vmem:[#allocation8 + $0x280] sm:$0xff] }
 0x91b   :  { %11179 = vst [vmem:[#allocation52_spill] sm:$0xff] %v10732_v35 }
 0x923   :  { %v8961_v29 = vpop.eup %8960 }
 0x924   :  { %v4593_v20 = vmul.f32 %v8961_v29, %v4592_v38  ;;  %v4821_v38 = vld [vmem:[#allocation8 + $0x208] sm:$0xff] }
 0x925   :  { %v10718_v29 = vpack.c.bf16 %v4821_v38, %v4818_v37  ;;  %v4830_v37 = vld [vmem:[#allocation8 + $0x250] sm:$0xff]  ;;  %v4833_v38 = vld [vmem:[#allocation8 + $0x268] sm:$0xff] }
 0x926   :  { %v10695_v49 = vadd.f32 %v4594_v56, %v4593_v20  ;;  %v4825_v20 = vld [vmem:[#allocation8 + $0x228] sm:$0xff]  ;;  %v4824_v56 = vld [vmem:[#allocation8 + $0x220] sm:$0xff] }
 0x927   :  { %11175 = vst [vmem:[#allocation48_spill] sm:$0xff] %v10718_v29  ;;  %v10726_v51 = vpack.c.bf16 %v4825_v20, %v4822_v32  ;;  %v10728_v21 = vpack.c.bf16 %v4827_v36, %v4824_v56  ;;  %v10736_v32 = vpack.c.bf16 %v4831_v12, %v4828_v7  ;;  %v10738_v20 = vpack.c.bf16 %v4833_v38, %v4830_v37  ;;  %v4834_v56 = vld [vmem:[#allocation8 + $0x270] sm:$0xff]  ;;  %v4840_v37 = vld [vmem:[#allocation8 + $0x2a0] sm:$0xff] }
 0x928   :  { %4728 = vmatmul.mubr.f32.vlgmr.msra.gmra.mrb[26].mxu0 %v10695_v49  ;;  %7098 = vmatmul.mubr.f32.vlgmr.msra.gmra.mrb[62].mxu1 %v10695_v49  ;;  %v10742_v36 = vpack.c.bf16 %v4838_v23, %v4835_v34  ;;  %v10746_v7 = vpack.c.bf16 %v4837_v14, %v4834_v56  ;;  %v10748_v12 = vpack.c.bf16 %v4839_v25, %v4836_v8  ;;  %v4843_v34 = vld [vmem:[#allocation8 + $0x2b8] sm:$0xff]  ;;  %v4842_v23 = vld [vmem:[#allocation8 + $0x2b0] sm:$0xff]  ;;  %v4848_v8 = vld [vmem:[#allocation8 + $0x2e0] sm:$0xff] }
 0x929   :  { %8471 = vmatpush1.bf16.msra.mxu0 %v10691_v27  ;;  %8502 = vmatpush3.bf16.msra.mxu1 %v10693_v45  ;;  %11177 = vst [vmem:[#allocation50_spill] sm:$0xff] %v10726_v51  ;;  %11178 = vst [vmem:[#allocation51_spill] sm:$0xff] %v10728_v21  ;;  %v10756_v56 = vpack.c.bf16 %v4843_v34, %v4840_v37  ;;  %v4846_v14 = vld [vmem:[#allocation8 + $0x2d0] sm:$0xff] }
 0x92a   :  { %8473 = vmatprep.subr.bf16.mxu0 %v10697_v47  ;;  %8503 = vmatprep.subr.bf16.mxu1 %v11047_v1  ;;  %11180 = vst [vmem:[#allocation22_spill] sm:$0xff] %v10736_v32  ;;  %11181 = vst [vmem:[#allocation23_spill] sm:$0xff] %v10738_v20 }
 0x92b   :  { %4933 = vmatprep.mubr.f32.mxu0 %v11049_v54  ;;  %7132 = vmatprep.mubr.msk.f32.mxu1 %vm9120_vm0, %v11049_v54  ;;  %11182 = vst [vmem:[#allocation33_spill] sm:$0xff] %v10742_v36  ;;  %11184 = vst [vmem:[#allocation24_spill] sm:$0xff] %v10756_v56 }
 0x92d   :  { %8475 = vmatpush1.bf16.msra.mxu0 %v10703_v18  ;;  %8505 = vmatpush3.bf16.msra.mxu1 %v10705_v19 }
 0x92e   :  { %8477 = vmatprep.subr.bf16.mxu0 %v10709_v61  ;;  %8506 = vmatprep.subr.bf16.mxu1 %v11047_v1 }
 0x931   :  { %8479 = vmatpush1.bf16.msra.mxu0 %v10716_v10  ;;  %8508 = vmatpush3.bf16.msra.mxu1 %v10718_v29  ;;  %v4844_v29 = vld [vmem:[#allocation8 + $0x2c0] sm:$0xff] }
 0x932   :  { %8481 = vmatprep.subr.bf16.mxu0 %v10722_v24  ;;  %8509 = vmatprep.subr.bf16.mxu1 %v11047_v1  ;;  %v4841_v24 = vld [vmem:[#allocation8 + $0x2a8] sm:$0xff] }
 0x933   :  { %v10752_v38 = vpack.c.bf16 %v4844_v29, %v4841_v24  ;;  %v4849_v24 = vld [vmem:[#allocation8 + $0x2e8] sm:$0xff] }
 0x934   :  { %v10766_v37 = vpack.c.bf16 %v4849_v24, %v4846_v14  ;;  %v5042_v24 = vld [vmem:[#allocation8 + $0x48] sm:$0xff] }
 0x935   :  { %8483 = vmatpush1.bf16.msra.mxu0 %v10726_v51  ;;  %8511 = vmatpush3.bf16.msra.mxu1 %v10728_v21  ;;  %11183 = vst [vmem:[#allocation54_spill] sm:$0xff] %v10752_v38  ;;  %v4847_v21 = vld [vmem:[#allocation8 + $0x2d8] sm:$0xff]  ;;  %v4850_v51 = vld [vmem:[#allocation8 + $0x2f0] sm:$0xff] }
 0x936   :  { %8485 = vmatprep.subr.bf16.mxu0 %v10732_v35  ;;  %8512 = vmatprep.subr.bf16.mxu1 %v11047_v1  ;;  %v4845_v35 = vld [vmem:[#allocation8 + $0x2c8] sm:$0xff]  ;;  %v10762_v29 = vpack.c.bf16 %v4850_v51, %v4847_v21  ;;  %v5033_v51 = vld [vmem:[#allocation8] sm:$0xff]  ;;  %v5036_v21 = vld [vmem:[#allocation8 + $0x18] sm:$0xff] }
 0x937   :  { %v10758_v25 = vpack.c.bf16 %v4845_v35, %v4842_v23  ;;  %v5040_v23 = vld [vmem:[#allocation8 + $0x38] sm:$0xff] }
 0x938   :  { %11185 = vst [vmem:[#allocation25_spill] sm:$0xff] %v10762_v29 }
 0x939   :  { %8487 = vmatpush1.bf16.msra.mxu0 %v10736_v32  ;;  %8514 = vmatpush3.bf16.msra.mxu1 %v10738_v20  ;;  %v5034_v20 = vld [vmem:[#allocation8 + $0x8] sm:$0xff]  ;;  %v5037_v32 = vld [vmem:[#allocation8 + $0x20] sm:$0xff] }
 0x93a   :  { %8489 = vmatprep.subr.bf16.mxu0 %v10742_v36  ;;  %8515 = vmatprep.subr.bf16.mxu1 %v11047_v1  ;;  %v4851_v36 = vld [vmem:[#allocation8 + $0x2f8] sm:$0xff]  ;;  %v8524_v34 = vpack.c.bf16 %v5037_v32, %v5034_v20 }
 0x93b   :  { %v10768_v35 = vpack.c.bf16 %v4851_v36, %v4848_v8  ;;  %v5039_v36 = vld [vmem:[#allocation8 + $0x30] sm:$0xff]  ;;  %v5046_v8 = vld [vmem:[#allocation8 + $0x68] sm:$0xff] }
 0x93c   :  { %v8530_v32 = vpack.c.bf16 %v5042_v24, %v5039_v36  ;;  %v5061_v36 = vld [vmem:[#allocation8 + $0xe0] sm:$0xff] }
 0x93d   :  { %8491 = vmatpush1.bf16.msra.mxu0 %v10746_v7  ;;  %8517 = vmatpush3.bf16.msra.mxu1 %v10748_v12  ;;  %11186 = vst [vmem:[#allocation32_spill] sm:$0xff] %v10768_v35 }
 0x93e   :  { %8493 = vmatprep.subr.bf16.mxu0 %v10752_v38  ;;  %8518 = vmatprep.subr.bf16.mxu1 %v11047_v1  ;;  %v5043_v38 = vld [vmem:[#allocation8 + $0x50] sm:$0xff] }
 0x93f   :  { %v8528_v14 = vpack.c.bf16 %v5043_v38, %v5040_v23  ;;  %v5055_v38 = vld [vmem:[#allocation8 + $0xb0] sm:$0xff] }
 0x940   :  { %v5051_v23 = vld [vmem:[#allocation8 + $0x90] sm:$0xff] }
 0x941   :  { %8495 = vmatpush1.bf16.msra.mxu0 %v10756_v56  ;;  %8520 = vmatpush3.bf16.msra.mxu1 %v10758_v25  ;;  %v8526_v56 = vpack.c.bf16 %v5036_v21, %v5033_v51  ;;  %v5048_v51 = vld [vmem:[#allocation8 + $0x78] sm:$0xff] }
 0x942   :  { %8497 = vmatprep.subr.bf16.mxu0 %v10762_v29  ;;  %8521 = vmatprep.subr.bf16.mxu1 %v11047_v1  ;;  %v5049_v29 = vld [vmem:[#allocation8 + $0x80] sm:$0xff]  ;;  %v5052_v21 = vld [vmem:[#allocation8 + $0x98] sm:$0xff] }
 0x943   :  { %v8532_v20 = vpack.c.bf16 %v5049_v29, %v5046_v8  ;;  %v5058_v29 = vld [vmem:[#allocation8 + $0xc8] sm:$0xff] }
 0x944   :  { %v8540_v8 = vpack.c.bf16 %v5061_v36, %v5058_v29  ;;  %v5072_v29 = vld [vmem:[#allocation8 + $0x138] sm:$0xff] }
 0x945   :  { %8499 = vmatpush1.bf16.msra.mxu0 %v10766_v37  ;;  %8523 = vmatpush3.bf16.msra.mxu1 %v10768_v35  ;;  %v5060_v35 = vld [vmem:[#allocation8 + $0xd8] sm:$0xff] }
 0x946   :  { %8525 = vmatprep.subr.bf16.mxu0 %v8524_v34  ;;  %8556 = vmatprep.subr.bf16.mxu1 %v11047_v1  ;;  %v5045_v34 = vld [vmem:[#allocation8 + $0x60] sm:$0xff] }
 0x948   :  { %4934 = vmatmul.mubr.f32.vlgmr.msra.gmra.mrb[26].mxu0 %v10686_v48  ;;  %7133 = vmatmul.mubr.f32.vlgmr.msra.gmra.mrb[64].mxu1 %v10686_v48 }
 0x949   :  { %8527 = vmatpush1.bf16.msra.mxu0 %v8526_v56  ;;  %8558 = vmatpush3.bf16.msra.mxu1 %v10520_v13  ;;  %v8534_v56 = vpack.c.bf16 %v5048_v51, %v5045_v34  ;;  %v8536_v13 = vpack.c.bf16 %v5055_v38, %v5052_v21  ;;  %v5067_v34 = vld [vmem:[#allocation8 + $0x110] sm:$0xff]  ;;  %v5066_v38 = vld [vmem:[#allocation8 + $0x108] sm:$0xff] }
 0x94a   :  { %8529 = vmatprep.subr.bf16.mxu0 %v8528_v14  ;;  %8559 = vmatprep.subr.bf16.mxu1 %v11047_v1  ;;  %v5054_v14 = vld [vmem:[#allocation8 + $0xa8] sm:$0xff]  ;;  %v5063_v21 = vld [vmem:[#allocation8 + $0xf0] sm:$0xff] }
 0x94b   :  { %5162 = vmatprep.mubr.f32.mxu0 %v11049_v54  ;;  %7167 = vmatprep.mubr.msk.f32.mxu1 %vm9120_vm0, %v11049_v54  ;;  %v8538_v24 = vpack.c.bf16 %v5054_v14, %v5051_v23  ;;  %v5069_v14 = vld [vmem:[#allocation8 + $0x120] sm:$0xff] }
 0x94d   :  { %8531 = vmatpush1.bf16.msra.mxu0 %v8530_v32  ;;  %8561 = vmatpush3.bf16.msra.mxu1 %v10528_v46  ;;  %v5057_v32 = vld [vmem:[#allocation8 + $0xc0] sm:$0xff]  ;;  %v5064_v46 = vld [vmem:[#allocation8 + $0xf8] sm:$0xff] }
 0x94e   :  { %8533 = vmatprep.subr.bf16.mxu0 %v8532_v20  ;;  %8562 = vmatprep.subr.bf16.mxu1 %v11047_v1  ;;  %v8542_v20 = vpack.c.bf16 %v5060_v35, %v5057_v32  ;;  %v8544_v51 = vpack.c.bf16 %v5067_v34, %v5064_v46  ;;  %v11190_v46 = vld [vmem:[#allocation28_spill] sm:$0xff] }
 0x951   :  { %8535 = vmatpush1.bf16.msra.mxu0 %v8534_v56  ;;  %8564 = vmatpush3.bf16.msra.mxu1 %v10537_v6  ;;  %v5070_v6 = vld [vmem:[#allocation8 + $0x128] sm:$0xff]  ;;  %v5073_v56 = vld [vmem:[#allocation8 + $0x140] sm:$0xff] }
 0x952   :  { %8537 = vmatprep.subr.bf16.mxu0 %v8536_v13  ;;  %8565 = vmatprep.subr.bf16.mxu1 %v11047_v1  ;;  %v8546_v13 = vpack.c.bf16 %v5066_v38, %v5063_v21  ;;  %v8548_v23 = vpack.c.bf16 %v5073_v56, %v5070_v6  ;;  %v11191_v21 = vld [vmem:[#allocation29_spill] sm:$0xff] }
 0x955   :  { %8539 = vmatpush1.bf16.msra.mxu0 %v8538_v24  ;;  %8567 = vmatpush3.bf16.msra.mxu1 %v10543_v43  ;;  %v8550_v43 = vpack.c.bf16 %v5072_v29, %v5069_v14 }
 0x956   :  { %8541 = vmatprep.subr.bf16.mxu0 %v8540_v8  ;;  %8568 = vmatprep.subr.bf16.mxu1 %v11047_v1 }
 0x959   :  { %8543 = vmatpush1.bf16.msra.mxu0 %v8542_v20  ;;  %8570 = vmatpush3.bf16.msra.mxu1 %v10549_v42  ;;  %v11187_v42 = vld [vmem:[#allocation47_spill] sm:$0xff] }
 0x95a   :  { %8545 = vmatprep.subr.bf16.mxu0 %v8544_v51  ;;  %8571 = vmatprep.subr.bf16.mxu1 %v11047_v1 }
 0x95d   :  { %8547 = vmatpush1.bf16.msra.mxu0 %v8546_v13  ;;  %8573 = vmatpush3.bf16.msra.mxu1 %v10555_v2 }
 0x95e   :  { %8549 = vmatprep.subr.bf16.mxu0 %v8548_v23  ;;  %8574 = vmatprep.subr.bf16.mxu1 %v11047_v1 }
 0x961   :  { %8551 = vmatpush1.bf16.msra.mxu0 %v8550_v43  ;;  %8576 = vmatpush3.bf16.msra.mxu1 %v10561_v31 }
 0x962   :  { %8553 = vmatprep.subr.bf16.mxu0 %v10565_v60  ;;  %8577 = vmatprep.subr.bf16.mxu1 %v11047_v1  ;;  %v5890_v60 = vld [vmem:[%s10938_s4 + $0x3] sm:$0x7] }
 0x965   :  { %8555 = vmatpush1.bf16.msra.mxu0 %v10569_v26  ;;  %8579 = vmatpush3.bf16.msra.mxu1 %v10571_v59  ;;  %v5889_v26 = vld [vmem:[%s10937_s3 + $0x3] sm:$0x7] }
 0x966   :  { %8581 = vmatprep.subr.bf16.mxu0 %v10583_v30  ;;  %8612 = vmatprep.subr.bf16.mxu1 %v11047_v1  ;;  %v11188_v59 = vld [vmem:[#allocation16_spill] sm:$0xff] }
 0x967   :  { %v4651_v30 = vrot.slane %v5889_v26, %v11188_v59 }
 0x968   :  { %5163 = vmatmul.mubr.f32.vlgmr.msra.gmra.mrb[28].mxu0 %v10695_v49  ;;  %7168 = vmatmul.mubr.f32.vlgmr.msra.gmra.mrb[66].mxu1 %v10695_v49 }
 0x969   :  { %8583 = vmatpush1.bf16.msra.mxu0 %v10585_v44  ;;  %8614 = vmatpush3.bf16.msra.mxu1 %v10588_v16  ;;  %v4857_v44 = vrot.slane %v5890_v60, %v11188_v59  ;;  %v11189_v16 = vld [vmem:[#allocation17_spill] sm:$0xff] }
 0x96a   :  { %8585 = vmatprep.subr.bf16.mxu0 %v10592_v5  ;;  %8615 = vmatprep.subr.bf16.mxu1 %v11047_v1  ;;  %v4655_v5 = vrot.slane %v5889_v26, %v11189_v16 }
 0x96b   :  { %5391 = vmatprep.mubr.f32.mxu0 %v11049_v54  ;;  %7202 = vmatprep.mubr.msk.f32.mxu1 %vm9120_vm0, %v11049_v54 }
 0x96d   :  { %8587 = vmatpush1.bf16.msra.mxu0 %v10595_v50  ;;  %8617 = vmatpush3.bf16.msra.mxu1 %v10598_v63  ;;  %v4861_v50 = vrot.slane %v5890_v60, %v11189_v16  ;;  %v8796_v63 = vadd.f32 %v4857_v44, %v4651_v30 }
 0x96e   :  { %8589 = vmatprep.subr.bf16.mxu0 %v10602_v52  ;;  %8618 = vmatprep.subr.bf16.mxu1 %v11047_v1 }
 0x971   :  { %8591 = vmatpush1.bf16.msra.mxu0 %v10605_v11  ;;  %8620 = vmatpush3.bf16.msra.mxu1 %v10608_v22  ;;  %v8798_v22 = vadd.f32 %v4861_v50, %v4655_v5 }
 0x972   :  { %8593 = vmatprep.subr.bf16.mxu0 %v10612_v41  ;;  %8621 = vmatprep.subr.bf16.mxu1 %v11047_v1 }
 0x975   :  { %8595 = vmatpush1.bf16.msra.mxu0 %v10615_v62  ;;  %8623 = vmatpush3.bf16.msra.mxu1 %v10618_v9 }
 0x976   :  { %8597 = vmatprep.subr.bf16.mxu0 %v10622_v58  ;;  %8624 = vmatprep.subr.bf16.mxu1 %v11047_v1 }
 0x979   :  { %8599 = vmatpush1.bf16.msra.mxu0 %v10625_v15  ;;  %8626 = vmatpush3.bf16.msra.mxu1 %v10628_v4 }
 0x97a   :  { %8601 = vmatprep.subr.bf16.mxu0 %v10632_v17  ;;  %8627 = vmatprep.subr.bf16.mxu1 %v11047_v1 }
 0x97d   :  { %8603 = vmatpush1.bf16.msra.mxu0 %v10635_v53  ;;  %8629 = vmatpush3.bf16.msra.mxu1 %v10638_v40 }
 0x97e   :  { %8605 = vmatprep.subr.bf16.mxu0 %v10640_v33  ;;  %8630 = vmatprep.subr.bf16.mxu1 %v11047_v1  ;;  %v4865_v33 = vrot.slane %v5890_v60, %v9407_v0 }
 0x981   :  { %8607 = vmatpush1.bf16.msra.mxu0 %v10643_v28  ;;  %8632 = vmatpush3.bf16.msra.mxu1 %v10647_v39  ;;  %v5081_v28 = vld [vmem:[%s10938_s4] sm:$0x7]  ;;  %v4659_v39 = vrot.slane %v5889_v26, %v9407_v0 }
 0x982   :  { %8609 = vmatprep.subr.bf16.mxu0 %v10649_v57  ;;  %8633 = vmatprep.subr.bf16.mxu1 %v11047_v1  ;;  %v5090_v36 = vrot.slane %v5081_v28, %v11189_v16  ;;  %v5094_v50 = vrot.slane %v5081_v28, %v9407_v0 }
 0x984   :  { %v8770_v38 = vadd.f32 %v5090_v36, %v11191_v21  ;;  %v5701_v36 = vld [vmem:[#allocation9 + $0x28] sm:$0xff] }
 0x985   :  { %8611 = vmatpush1.bf16.msra.mxu0 %v10653_v3  ;;  %8635 = vmatpush3.bf16.msra.mxu1 %v10657_v55  ;;  %v5086_v55 = vrot.slane %v5081_v28, %v11188_v59  ;;  %v11202_v28 = vld [vmem:[#allocation24_spill] sm:$0xff] }
 0x986   :  { %8637 = vmatprep.subr.bf16.mxu0 %v11187_v42  ;;  %8668 = vmatprep.subr.bf16.mxu1 %v11047_v1 }
 0x987   :  { %v8767_v34 = vadd.f32 %v5086_v55, %v11190_v46  ;;  %v5699_v55 = vld [vmem:[#allocation9 + $0x18] sm:$0xff]  ;;  %v5705_v46 = vld [vmem:[#allocation9 + $0x48] sm:$0xff] }
 0x9fb   :  { %v4800_v2 = vpop.f32.mrb[62].mxu1 }
 0x9fc   :  { %v7099_v31 = vpop.f32.mrb[63].mxu1  ;;  %v4801_v24 = vadd.f32 %v4800_v2, %v4659_v39  ;;  %v11203_v39 = vld [vmem:[#allocation25_spill] sm:$0xff] }
 0xa1b   :  { %v4935_v52 = vpop.f32.mrb[26].mxu0  ;;  %v5006_v11 = vpop.f32.mrb[64].mxu1 }
 0xa1c   :  { %v8797_v41 = vadd.f32 %v8796_v63, %v4935_v52  ;;  %v4937_v62 = vpop.f32.mrb[27].mxu0  ;;  %v7134_v9 = vpop.f32.mrb[65].mxu1  ;;  %v5007_v3 = vadd.f32 %v5006_v11, %v4865_v33  ;;  %v5697_v33 = vld [vmem:[#allocation9 + $0x8] sm:$0xff] }
 0xa1d   :  { %v8799_v15 = vadd.f32 %v8798_v22, %v4937_v62 }
 0xa1e   :  { %v5891_v58 = vmul.f32 -1.442695, %v8797_v41  ;;  %v11192_v41 = vld [vmem:[#allocation34_spill] sm:$0xff] }
 0xa1f   :  { %v5892_v4 = vmul.f32 -1.442695, %v8799_v15 }
 0xa20   :  { %8962 = vpow2.f32 %v5891_v58 }
 0xa21   :  { %8964 = vpow2.f32 %v5892_v4 }
 0xa2a   :  { %v8963_v17 = vpop.eup %8962 }
 0xa2b   :  { %v5014_v53 = vadd.f32 1.0, %v8963_v17  ;;  %v8965_v40 = vpop.eup %8964 }
 0xa2c   :  { %v5021_v57 = vadd.f32 1.0, %v8965_v40  ;;  %v5696_v40 = vld [vmem:[#allocation9] sm:$0xff] }
 0xa2d   :  { %8966 = vrcp.f32 %v5014_v53 }
 0xa2e   :  { %8968 = vrcp.f32 %v5021_v57  ;;  %v8692_v57 = vpack.c.bf16 %v5697_v33, %v5696_v40 }
 0xa37   :  { %v8967_v35 = vpop.eup %8966 }
 0xa38   :  { %v5024_v8 = vmul.f32 %v8967_v35, %v5007_v3  ;;  %v8969_v29 = vpop.eup %8968  ;;  %v5698_v3 = vld [vmem:[#allocation9 + $0x10] sm:$0xff]  ;;  %v5700_v35 = vld [vmem:[#allocation9 + $0x20] sm:$0xff] }
 0xa39   :  { %v5027_v42 = vsub.f32 1.0, %v8969_v29  ;;  %v5029_v60 = vmul.f32 %v8969_v29, %v10686_v48  ;;  %v11206_v29 = vld [vmem:[#allocation37_spill] sm:$0xff] }
 0xa3a   :  { %v5025_v32 = vadd.f32 %v5024_v8, %v4801_v24  ;;  %v5702_v24 = vld [vmem:[#allocation9 + $0x30] sm:$0xff]  ;;  %v5703_v8 = vld [vmem:[#allocation9 + $0x38] sm:$0xff] }
 0xa3b   :  { %v5164_v20 = vpop.f32.mrb[28].mxu0  ;;  %v5235_v51 = vpop.f32.mrb[66].mxu1 }
 0xa3c   :  { %8970 = vtanh.f32 %v5025_v32  ;;  %v8768_v6 = vadd.f32 %v8767_v34, %v5164_v20  ;;  %v5166_v56 = vpop.f32.mrb[29].mxu0  ;;  %v7169_v13 = vpop.f32.mrb[67].mxu1  ;;  %v5236_v52 = vadd.f32 %v5235_v51, %v5094_v50  ;;  %v5704_v32 = vld [vmem:[#allocation9 + $0x40] sm:$0xff]  ;;  %v5706_v20 = vld [vmem:[#allocation9 + $0x50] sm:$0xff]  ;;  %v5707_v51 = vld [vmem:[#allocation9 + $0x58] sm:$0xff] }
 0xa3d   :  { %v8771_v23 = vadd.f32 %v8770_v38, %v5166_v56  ;;  %v8708_v34 = vpack.c.bf16 %v5705_v46, %v5704_v32  ;;  %v8712_v21 = vpack.c.bf16 %v5707_v51, %v5706_v20  ;;  %v5708_v38 = vld [vmem:[#allocation9 + $0x60] sm:$0xff]  ;;  %v5710_v13 = vld [vmem:[#allocation9 + $0x70] sm:$0xff] }
 0xa3e   :  { %v5893_v14 = vmul.f32 -1.442695, %v8768_v6  ;;  %v5709_v6 = vld [vmem:[#allocation9 + $0x68] sm:$0xff] }
 0xa3f   :  { %v5894_v43 = vmul.f32 -1.442695, %v8771_v23  ;;  %v8716_v56 = vpack.c.bf16 %v5709_v6, %v5708_v38  ;;  %v5711_v23 = vld [vmem:[#allocation9 + $0x78] sm:$0xff] }
 0xa40   :  { %8972 = vpow2.f32 %v5893_v14  ;;  %v8720_v14 = vpack.c.bf16 %v5711_v23, %v5710_v13 }
 0xa41   :  { %8974 = vpow2.f32 %v5894_v43  ;;  %v11207_v43 = vld [vmem:[#allocation53_spill] sm:$0xff] }
 0xa46   :  { %v8971_v2 = vpop.eup %8970 }
 0xa47   :  { %v5028_v31 = vmul.f32 %v8971_v2, %v5027_v42  ;;  %v11208_v42 = vld [vmem:[#allocation55_spill] sm:$0xff]  ;;  %v11209_v2 = vld [vmem:[#allocation46_spill] sm:$0xff] }
 0xa49   :  { %v10856_v26 = vadd.f32 %v5029_v60, %v5028_v31 }
 0xa4a   :  { %v8973_v30 = vpop.eup %8972 }
 0xa4b   :  { %v5243_v44 = vadd.f32 1.0, %v8973_v30  ;;  %v8975_v5 = vpop.eup %8974  ;;  %v5896_v30 = vld [vmem:[%s10938_s4 + $0x3] sm:$0x7] }
 0xa4c   :  { %v5250_v63 = vadd.f32 1.0, %v8975_v5  ;;  %v5521_v50 = vrot.slane %v5896_v30, %v11188_v59 }
 0xa4d   :  { %8976 = vrcp.f32 %v5243_v44  ;;  %v5895_v44 = vld [vmem:[%s10937_s3 + $0x3] sm:$0x7] }
 0xa4e   :  { %8978 = vrcp.f32 %v5250_v63  ;;  %v5315_v5 = vrot.slane %v5895_v44, %v11188_v59  ;;  %v5319_v63 = vrot.slane %v5895_v44, %v11189_v16 }
 0xa57   :  { %v8977_v11 = vpop.eup %8976 }
 0xa58   :  { %v5253_v22 = vmul.f32 %v8977_v11, %v5236_v52  ;;  %v8979_v9 = vpop.eup %8978  ;;  %v8800_v52 = vadd.f32 %v5521_v50, %v5315_v5 }
 0xa59   :  { %v5256_v58 = vsub.f32 1.0, %v8979_v9  ;;  %v5258_v17 = vmul.f32 %v8979_v9, %v10695_v49  ;;  %v11195_v49 = vld [vmem:[#allocation50_spill] sm:$0xff] }
 0xa5a   :  { %v5254_v62 = vadd.f32 %v5253_v22, %v11192_v41 }
 0xa5c   :  { %8980 = vtanh.f32 %v5254_v62 }
 0xa66   :  { %v8981_v15 = vpop.eup %8980 }
 0xa67   :  { %v5257_v4 = vmul.f32 %v8981_v15, %v5256_v58 }
 0xa69   :  { %v5259_v53 = vadd.f32 %v5258_v17, %v5257_v4 }
 0xa6b   :  { %5392 = vmatmul.mubr.f32.vlgmr.msra.gmra.mrb[30].mxu0 %v5259_v53  ;;  %7203 = vmatmul.mubr.f32.vlgmr.msra.gmra.mrb[68].mxu1 %v5259_v53 }
 0xa6c   :  { %8639 = vmatpush1.bf16.msra.mxu0 %v10691_v27  ;;  %8670 = vmatpush3.bf16.msra.mxu1 %v10693_v45  ;;  %v11193_v27 = vld [vmem:[#allocation48_spill] sm:$0xff]  ;;  %v11194_v45 = vld [vmem:[#allocation49_spill] sm:$0xff] }
 0xa6d   :  { %8641 = vmatprep.subr.bf16.mxu0 %v10697_v47  ;;  %8671 = vmatprep.subr.bf16.mxu1 %v11047_v1  ;;  %v11196_v47 = vld [vmem:[#allocation51_spill] sm:$0xff] }
 0xa6e   :  { %5597 = vmatprep.mubr.f32.mxu0 %v11049_v54  ;;  %7237 = vmatprep.mubr.msk.f32.mxu1 %vm9120_vm0, %v11049_v54  ;;  %v11197_v54 = vld [vmem:[#allocation52_spill] sm:$0xff] }
 0xa70   :  { %8643 = vmatpush1.bf16.msra.mxu0 %v10703_v18  ;;  %8673 = vmatpush3.bf16.msra.mxu1 %v10705_v19  ;;  %v11198_v18 = vld [vmem:[#allocation22_spill] sm:$0xff]  ;;  %v11199_v19 = vld [vmem:[#allocation23_spill] sm:$0xff] }
 0xa71   :  { %8645 = vmatprep.subr.bf16.mxu0 %v10709_v61  ;;  %8674 = vmatprep.subr.bf16.mxu1 %v11047_v1  ;;  %v11200_v61 = vld [vmem:[#allocation33_spill] sm:$0xff] }
 0xa74   :  { %8647 = vmatpush1.bf16.msra.mxu0 %v10716_v10  ;;  %8676 = vmatpush3.bf16.msra.mxu1 %v11193_v27  ;;  %v11201_v10 = vld [vmem:[#allocation54_spill] sm:$0xff] }
 0xa75   :  { %8649 = vmatprep.subr.bf16.mxu0 %v11194_v45  ;;  %8677 = vmatprep.subr.bf16.mxu1 %v11047_v1  ;;  %v5529_v45 = vrot.slane %v5896_v30, %v9407_v0 }
 0xa78   :  { %8651 = vmatpush1.bf16.msra.mxu0 %v11195_v49  ;;  %8679 = vmatpush3.bf16.msra.mxu1 %v11196_v47 }
 0xa79   :  { %8653 = vmatprep.subr.bf16.mxu0 %v11197_v54  ;;  %8680 = vmatprep.subr.bf16.mxu1 %v11047_v1 }
 0xa7c   :  { %8655 = vmatpush1.bf16.msra.mxu0 %v11198_v18  ;;  %8682 = vmatpush3.bf16.msra.mxu1 %v11199_v19 }
 0xa7d   :  { %8657 = vmatprep.subr.bf16.mxu0 %v11200_v61  ;;  %8683 = vmatprep.subr.bf16.mxu1 %v11047_v1  ;;  %v5899_v61 = vld [vmem:[%s10940_s6] ss:$0 sm:$0xff]  ;;  %s9121_s6 = smov [#allocation11]  }
 0xa7e   :  { %s5837_s5 = sshll.u32 %s9121_s6, 4  ;;  %s5838_s5 = int_to_ptr.vmem [resolvable:$true] %s5837_s5 }
 0xa7f   :  { %s9080_s12 = scalar_lea.vmem %s5838_s5, 1024  ;;  %p9085_p5 = scmp.lt.s32.totalorder %s5838_s5, %s5838_s5 }
 0xa80   :  { %8659 = vmatpush1.bf16.msra.mxu0 %v10746_v7  ;;  %8685 = vmatpush3.bf16.msra.mxu1 %v10748_v12  ;;  %v11204_v7 = vld [vmem:[#allocation32_spill] sm:$0xff]  ;;  %v8696_v12 = vpack.c.bf16 %v5699_v55, %v5698_v3  ;;  %p9081_p4 = scmp.ne.s32.totalorder %s5838_s5, %s9080_s12  ;;  %p9086_p6 = scmp.lt.s32.totalorder %s9080_s12, %s9080_s12 }
 0xa81   :  { %8661 = vmatprep.subr.bf16.mxu0 %v11201_v10  ;;  %8686 = vmatprep.subr.bf16.mxu1 %v11047_v1 }
 0xa82   :  { %p9087_p7 = por %p9086_p6, %p9085_p5 }
 0xa84   :  { %8663 = vmatpush1.bf16.msra.mxu0 %v11202_v28  ;;  %8688 = vmatpush3.bf16.msra.mxu1 %v10758_v25  ;;  %v11205_v25 = vld [vmem:[#allocation56_spill] sm:$0xff]  ;;  %p9088_p8 = pnand %p9087_p7, %p9081_p4 }
 0xa85   :  { %8665 = vmatprep.subr.bf16.mxu0 %v11203_v39  ;;  %8689 = vmatprep.subr.bf16.mxu1 %v11047_v1  ;;  %v8700_v1 = vpack.c.bf16 %v5701_v36, %v5700_v35 }
 0xa88   :  { %8667 = vmatpush1.bf16.msra.mxu0 %v10766_v37  ;;  %8691 = vmatpush3.bf16.msra.mxu1 %v11204_v7  ;;  %v8704_v37 = vpack.c.bf16 %v5703_v8, %v5702_v24 }
 0xa89   :  { %8693 = vmatprep.subr.bf16.mxu0 %v8692_v57 }
 0xa8b   :  { %5598 = vmatmul.mubr.f32.vlgmr.msra.gmra.mrb[30].mxu0 %v10856_v26  ;;  %7238 = vmatmul.mubr.f32.vlgmr.msra.gmra.mrb[70].mxu1 %v10856_v26 }
 0xa8c   :  { %8695 = vmatpush3.bf16.msra.mxu0 %v8692_v57  ;;  %7272 = vmatprep.mubr.f32.mxu0 %v11205_v25 }
 0xa8d   :  { %8697 = vmatprep.subr.bf16.mxu0 %v8696_v12 }
 0xa90   :  { %8699 = vmatpush3.bf16.msra.mxu0 %v8696_v12 }
 0xa91   :  { %8701 = vmatprep.subr.bf16.mxu0 %v8700_v1 }
 0xa94   :  { %8703 = vmatpush3.bf16.msra.mxu0 %v8700_v1 }
 0xa95   :  { %8705 = vmatprep.subr.bf16.mxu0 %v8704_v37 }
 0xa98   :  { %8707 = vmatpush3.bf16.msra.mxu0 %v8704_v37 }
 0xa99   :  { %8709 = vmatprep.subr.bf16.mxu0 %v8708_v34 }
 0xa9c   :  { %8711 = vmatpush3.bf16.msra.mxu0 %v8708_v34 }
 0xa9d   :  { %8713 = vmatprep.subr.bf16.mxu0 %v8712_v21 }
 0xaa0   :  { %8715 = vmatpush3.bf16.msra.mxu0 %v8712_v21 }
 0xaa1   :  { %8717 = vmatprep.subr.bf16.mxu0 %v8716_v56 }
 0xaa4   :  { %8719 = vmatpush3.bf16.msra.mxu0 %v8716_v56 }
 0xaa5   :  { %8721 = vmatprep.subr.bf16.mxu0 %v8720_v14 }
 0xaa8   :  { %8723 = vmatpush3.bf16.msra.mxu0 %v8720_v14 }
 0xaab   :  { %7273 = vmatmul.mubr.f32.vlgmr.msra.gmra.mrb[32].mxu0 %v11206_v29 }
 0xaac   :  { %7275 = vmatprep.mubr.f32.mxu0 %v11207_v43 }
 0xaaf   :  { %7276 = vmatmul.mubr.f32.gmra.mrb[34].mxu0 %v11208_v42 }
 0xab0   :  { %7278 = vmatprep.mubr.f32.mxu0 %v11209_v2 }
 0xab3   :  { %7279 = vmatmul.mubr.f32.gmra.mrb[36].mxu0 %v10686_v48  ;;  %v5525_v48 = vrot.slane %v5896_v30, %v11189_v16  ;;  %v5323_v16 = vrot.slane %v5895_v44, %v9407_v0 }
 0xab4   :  { %7281 = vmatprep.mubr.f32.mxu0 %v10856_v26 }
 0xab5   :  { %v8802_v41 = vadd.f32 %v5525_v48, %v5319_v63 }
 0xb3e   :  { %v5464_v31 = vpop.f32.mrb[68].mxu1 }
 0xb3f   :  { %v7204_v60 = vpop.f32.mrb[69].mxu1  ;;  %v5465_v18 = vadd.f32 %v5464_v31, %v5323_v16 }
 0xb5e   :  { %v5599_v11 = vpop.f32.mrb[30].mxu0  ;;  %v5670_v22 = vpop.f32.mrb[70].mxu1 }
 0xb5f   :  { %v8801_v62 = vadd.f32 %v8800_v52, %v5599_v11  ;;  %v5601_v9 = vpop.f32.mrb[31].mxu0  ;;  %v7239_v58 = vpop.f32.mrb[71].mxu1  ;;  %v5671_v47 = vadd.f32 %v5670_v22, %v5529_v45 }
 0xb60   :  { %v8803_v4 = vadd.f32 %v8802_v41, %v5601_v9 }
 0xb61   :  { %v5897_v15 = vmul.f32 -1.442695, %v8801_v62 }
 0xb62   :  { %v5898_v17 = vmul.f32 -1.442695, %v8803_v4 }
 0xb63   :  { %8982 = vpow2.f32 %v5897_v15 }
 0xb64   :  { %8984 = vpow2.f32 %v5898_v17 }
 0xb6d   :  { %v8983_v53 = vpop.eup %8982 }
 0xb6e   :  { %v5678_v27 = vadd.f32 1.0, %v8983_v53  ;;  %v8985_v59 = vpop.eup %8984 }
 0xb6f   :  { %v5685_v49 = vadd.f32 1.0, %v8985_v59 }
 0xb70   :  { %8986 = vrcp.f32 %v5678_v27 }
 0xb71   :  { %8988 = vrcp.f32 %v5685_v49 }
 0xb7a   :  { %v8987_v54 = vpop.eup %8986 }
 0xb7b   :  { %v5688_v19 = vmul.f32 %v8987_v54, %v5671_v47  ;;  %v8989_v7 = vpop.eup %8988 }
 0xb7c   :  { %v5691_v1 = vsub.f32 1.0, %v8989_v7  ;;  %v5693_v37 = vmul.f32 %v8989_v7, %v10856_v26 }
 0xb7d   :  { %v5689_v10 = vadd.f32 %v5688_v19, %v5465_v18 }
 0xb7e   :  { %v7274_v40 = vpop.f32.mrb[32].mxu0 }
 0xb7f   :  { %8990 = vtanh.f32 %v5689_v10  ;;  %v5791_v33 = vadd.f32 %v7274_v40, %v5899_v61  ;;  %v5785_v28 = vpop.f32.mrb[33].mxu0 }
 0xb80   :  { %v5786_v39 = vadd.f32 %v5899_v61, %v5785_v28 }
 0xb81   :  { %5825 = vst [vmem:[#allocation11 + $0x8] sm:$0xff] %v5791_v33 }
 0xb82   :  { %5824 = vst [vmem:[#allocation11] sm:$0xff] %v5786_v39  ;;  %v7277_v57 = vpop.f32.mrb[34].mxu0 }
 0xb83   :  { %v5801_v0 = vadd.f32 %v7277_v57, %v5899_v61  ;;  %v5795_v3 = vpop.f32.mrb[35].mxu0 }
 0xb84   :  { %v5796_v55 = vadd.f32 %v5899_v61, %v5795_v3 }
 0xb85   :  { %5827 = vst [vmem:[#allocation11 + $0x18] sm:$0xff] %v5801_v0 }
 0xb86   :  { %5826 = vst [vmem:[#allocation11 + $0x10] sm:$0xff] %v5796_v55  ;;  %v7280_v12 = vpop.f32.mrb[36].mxu0 }
 0xb87   :  { %v5811_v35 = vadd.f32 %v7280_v12, %v5899_v61  ;;  %v5805_v36 = vpop.f32.mrb[37].mxu0 }
 0xb88   :  { %v5806_v25 = vadd.f32 %v5899_v61, %v5805_v36 }
 0xb89   :  { %v8991_v24 = vpop.eup %8990  ;;  %5829 = vst [vmem:[#allocation11 + $0x28] sm:$0xff] %v5811_v35 }
 0xb8a   :  { %5828 = vst [vmem:[#allocation11 + $0x20] sm:$0xff] %v5806_v25  ;;  %v5692_v8 = vmul.f32 %v8991_v24, %v5691_v1 }
 0xb8c   :  { %v5694_v32 = vadd.f32 %v5693_v37, %v5692_v8 }
 0xb8e   :  { %7282 = vmatmul.mubr.f32.gmra.mrb[38].mxu0 %v5694_v32 }
 0xc61   :  { %v7283_v46 = vpop.f32.mrb[38].mxu0 }
 0xc62   :  { %v5821_v34 = vadd.f32 %v7283_v46, %v5899_v61  ;;  %v5815_v20 = vpop.f32.mrb[39].mxu0 }
 0xc63   :  { %v5816_v51 = vadd.f32 %v5899_v61, %v5815_v20 }
 0xc64   :  { %5831 = vst [vmem:[#allocation11 + $0x38] sm:$0xff] %v5821_v34 }
 0xc65   :  { %5830 = vst [vmem:[#allocation11 + $0x30] sm:$0xff] %v5816_v51 }
 0xc66   :  { %9091 = shalt.err (!%p9088_p8)
}
 0xc67   :  { %s9092_s8 = scalar_lea.hbm %s10941_s7, 1024 }
 0xc68   :  { %p9093_p9 = scmp.ne.s32.totalorder %s10941_s7, %s9092_s8  ;;  %p9096_p10 = scmp.lt.u32.totalorder %s9092_s8, %s10941_s7 }
 0xc6a   :  { %p9098_p11 = pnand %p9096_p10, %p9093_p9 }
 0xc6c   :  { %9101 = shalt.err (!%p9098_p11)
}
 0xc6d   :  { %5843 = dma.vmem_to_hbm [thread:$0]  %s5838_s5, 1024, %s10941_s7, [#allocation5], %s9114_s1, %s9114_s1, %s9115_s25  }
 0xc6e   :  { %9108 = dma.done.wait [#allocation5], 1024  }
 0xc6f   :  { %9109 = vsyncadd [#allocation5], 4294966272 }
 0xc70   :  { %5847 = vsyncpa [#allocation4], 1 }
 0xc71   :  { %5848 = vsyncpa [#allocation7], 1 }
 0xc72   :  { %5849 = vsyncpa [#allocation10], 1 }
 0xc73   :  { %5850 = vsyncpa [#allocation5], 1 }

</bundles_post_ra>
